<compile_context>
chip_gen: v5e
topology: v5e:2x2
jax: 0.10.0
libtpu: 0.0.40
codegen_flags: <defaults>
</compile_context>

<pallas_src>
import functools

import jax
import jax.numpy as jnp
import numpy as np
from jax.experimental import pallas as pl
from jax.experimental.pallas import tpu as pltpu

NEAR_INF = 1e20


# --------------------------------------------------------------------------------------
# Pass 1: sequential GRU recurrence (only the part that is actually serial).
# --------------------------------------------------------------------------------------
def _gru_seq_kernel(L, Tc, B, H, fused, *refs):
    # refs = [gi0, h0,
    #         (w_hh, b_hn)                  for layer 0,
    #         (w_ih, b_gi, w_hh, b_hn)      for layers 1..L-1,
    #         hseq_out, hfin_out, h_scratch]
    gi0_ref, h0_ref = refs[0], refs[1]
    idx = 2
    layer_refs = []
    for l in range(L):
        if l == 0:
            layer_refs.append((None, None, refs[idx], refs[idx + 1]))
            idx += 2
        else:
            layer_refs.append(tuple(refs[idx:idx + 4]))
            idx += 4
    hseq_ref, hfin_ref = refs[idx], refs[idx + 1]
    h_scr = refs[idx + 2]

    f32 = jnp.float32
    tchunk = pl.program_id(0)

    @pl.when(tchunk == 0)
    def _():
        h_scr[...] = h0_ref[...]

    # Hoist weight reads and bias broadcasts out of the unrolled time loop
    # (JAX does not CSE broadcast_in_dim; with full unroll it would be re-emitted every step).
    w_ih, b_gi, w_hh, b_hn = [], [], [], []
    for l in range(L):
        wi_r, bg_r, wh_r, bn_r = layer_refs[l]
        wh = wh_r[...]
        w_hh.append(wh if fused else (wh[0], wh[1], wh[2]))
        b_hn.append(jnp.broadcast_to(bn_r[...].astype(f32), (B, H)))
        if l == 0:
            w_ih.append(None)
            b_gi.append(None)
        else:
            wi = wi_r[...]
            w_ih.append(wi if fused else (wi[0], wi[1], wi[2]))
            bg = bg_r[...].astype(f32)  # (1, 3H); b_hr / b_hz already folded in
            b_gi.append((jnp.broadcast_to(bg[:, 0:H], (B, H)),
                         jnp.broadcast_to(bg[:, H:2 * H], (B, H)),
                         jnp.broadcast_to(bg[:, 2 * H:3 * H], (B, H))))

    wdt = (w_hh[0] if fused else w_hh[0][0]).dtype

    # Hidden state carried in vregs across the chunk; VMEM scratch only at chunk boundaries.
    hs = [h_scr[l] for l in range(L)]

    for tt in range(Tc):                         # full static unroll -> static indices only
        gi0 = gi0_ref[tt].astype(f32)            # (3, B, H) layer-0 gate inputs, biases folded
        x = None
        for l in range(L):
            h_prev = hs[l]
            hb = h_prev.astype(wdt)
            if fused:
                gh = jnp.dot(hb, w_hh[l], preferred_element_type=f32)          # (B, 3H)
                gh_r, gh_z, gh_n = gh[:, 0:H], gh[:, H:2 * H], gh[:, 2 * H:3 * H]
            else:
                gh_r = jnp.dot(hb, w_hh[l][0], preferred_element_type=f32)
                gh_z = jnp.dot(hb, w_hh[l][1], preferred_element_type=f32)
                gh_n = jnp.dot(hb, w_hh[l][2], preferred_element_type=f32)
            if l == 0:
                gi_r, gi_z, gi_n = gi0[0], gi0[1], gi0[2]
            else:
                xb = x.astype(wdt)
                if fused:
                    gi = jnp.dot(xb, w_ih[l], preferred_element_type=f32)      # (B, 3H)
                    gi_r = gi[:, 0:H] + b_gi[l][0]
                    gi_z = gi[:, H:2 * H] + b_gi[l][1]
                    gi_n = gi[:, 2 * H:3 * H] + b_gi[l][2]
                else:
                    gi_r = jnp.dot(xb, w_ih[l][0], preferred_element_type=f32) + b_gi[l][0]
                    gi_z = jnp.dot(xb, w_ih[l][1], preferred_element_type=f32) + b_gi[l][1]
                    gi_n = jnp.dot(xb, w_ih[l][2], preferred_element_type=f32) + b_gi[l][2]
            # PyTorch GRU cell (f32 gate math); only b_hn sits inside the r* term.
            r = jax.nn.sigmoid(gi_r + gh_r)
            z = jax.nn.sigmoid(gi_z + gh_z)
            n = jnp.tanh(gi_n + r * (gh_n + b_hn[l]))
            h_new = (1.0 - z) * n + z * h_prev
            hs[l] = h_new
            x = h_new
        # Batch-major write (static slice) -> no wrapper transpose between the two passes.
        hseq_ref[:, tt:tt + 1, :] = x.astype(hseq_ref.dtype)[:, None, :]

    for l in range(L):
        h_scr[l] = hs[l]

    @pl.when(tchunk == pl.num_programs(0) - 1)
    def _():
        hfin_ref[...] = h_scr[...]


# --------------------------------------------------------------------------------------
# Pass 2: time-parallel attention + vocab-tiled output projection.
# --------------------------------------------------------------------------------------
def _attn_out_kernel(approx_recip, hseq_ref, enc_ref, maskb_ref, w_ain_ref, w_ao_dec_ref,
                     w_ao_mix_ref, w_out_ref, b_out_ref, scores_ref, attn_ref, att_scr):
    B, Tc, H = hseq_ref.shape
    Vc = w_out_ref.shape[1]
    f32 = jnp.float32
    wdt = w_ain_ref.dtype
    vj = pl.program_id(1)

    @pl.when(vj == 0)
    def _():
        dec2d = hseq_ref[...].reshape(B * Tc, H).astype(wdt)   # MXU-friendly M = B*Tc
        # "general" attention input projection.
        hid = jnp.dot(dec2d, w_ain_ref[...], preferred_element_type=f32)
        hid = hid.reshape(B, Tc, H).astype(wdt)
        enc = enc_ref[...]                                     # (B, S, H)
        scores = jnp.einsum('bth,bsh->bts', hid, enc, preferred_element_type=f32)
        scores = scores + maskb_ref[...][:, None, :]           # additive -NEAR_INF mask bias
        m = jnp.max(scores, axis=-1, keepdims=True)
        e = jnp.exp(scores - m)
        denom = jnp.sum(e, axis=-1, keepdims=True)
        if approx_recip:
            attn = e * pl.reciprocal(denom, approx=True)
        else:
            attn = e / denom                                   # exact on the strict f32 path
        attn_ref[...] = attn.astype(attn_ref.dtype)
        mix = jnp.einsum('bts,bsh->bth', attn.astype(enc.dtype), enc,
                         preferred_element_type=f32)           # (B, Tc, H)
        # concat([dec, mix]) @ W  ==  dec @ W_dec + mix @ W_mix  (no lane-axis concat).
        attended = jnp.tanh(
            jnp.dot(dec2d, w_ao_dec_ref[...], preferred_element_type=f32)
            + jnp.dot(mix.reshape(B * Tc, H).astype(wdt), w_ao_mix_ref[...],
                      preferred_element_type=f32))
        att_scr[...] = attended.astype(att_scr.dtype)

    # Vocab-tiled projection; attended is resident in VMEM scratch across the vocab axis.
    logits = (jnp.dot(att_scr[...], w_out_ref[...], preferred_element_type=f32)
              + b_out_ref[...])
    scores_ref[...] = logits.reshape(B, Tc, Vc).astype(scores_ref.dtype)


# --------------------------------------------------------------------------------------
# Wrapper
# --------------------------------------------------------------------------------------
def _pick_time_chunk(T, req):
    # Chunk must divide T and be a multiple of 8 (sublane) or equal T (block-shape rule).
    if req >= T or T <= 8:
        return T
    c = (min(req, T) // 8) * 8
    while c >= 8:
        if T % c == 0:
            return c
        c -= 8
    return T


def _pick_vocab_chunk(V, req):
    # Chunk must divide V and be a multiple of 128 (lane) or equal V.
    if req >= V or V <= 128:
        return V
    c = (min(req, V) // 128) * 128
    while c >= 128:
        if V % c == 0:
            return c
        c -= 128
    return V


def decoder_rnn_forward(text_vec, decoder_hidden, encoder_output, attention_mask, params,
                        *, weight_dtype=jnp.bfloat16, time_chunk=16, attn_chunk=128,
                        vocab_chunk=2048):
    """Pallas implementation of DecoderRNN.forward (dropout=0, attention_type='general')."""
    B0, T = text_vec.shape
    L, _, H = decoder_hidden.shape
    S = encoder_output.shape[1]
    V = params["w_out"].shape[1]
    E = params["embedding"].shape[1]
    f32 = jnp.float32
    wdt = jnp.dtype(weight_dtype)
    fused = (H % 128 == 0)

    # Pad batch to sublane granularity (8): tiny configs otherwise waste >90% of every
    # (8,128) vreg and hit masked loads/stores everywhere.  Padded rows are sliced off.
    B = max(8, -(-B0 // 8) * 8)
    if B != B0:
        pb = B - B0
        text_vec = jnp.pad(text_vec, ((0, pb), (0, 0)))
        decoder_hidden = jnp.pad(decoder_hidden, ((0, 0), (0, pb), (0, 0)))
        encoder_output = jnp.pad(encoder_output, ((0, pb), (0, 0), (0, 0)))
        attention_mask = jnp.pad(attention_mask, ((0, pb), (0, 0)))

    Tc1 = _pick_time_chunk(T, time_chunk)
    Tc2 = _pick_time_chunk(T, attn_chunk)
    Vc = _pick_vocab_chunk(V, vocab_chunk)

    # ---- pass 0 (plain JAX glue): embedding gather + layer-0 gate inputs for all steps.
    # b_hr / b_hz are folded into the gi-side bias; only b_hn stays on the recurrent side. ----
    emb = jnp.take(params["embedding"], text_vec, axis=0).astype(wdt)        # (B, T, E)
    w_ih0, w_hh0, b_ih0, b_hh0 = params["gru"][0]
    zero_h = jnp.zeros((1, H), f32)
    gi0_bias = b_ih0.astype(f32) + jnp.concatenate(
        [b_hh0[:, :H], b_hh0[:, H:2 * H], zero_h], axis=1).astype(f32)       # (1, 3H)
    gi0 = jnp.dot(emb.reshape(B * T, E), w_ih0.astype(wdt),
                  preferred_element_type=f32) + gi0_bias                     # f32 accumulate
    gi0 = gi0.reshape(B, T, 3, H).transpose(1, 2, 0, 3).astype(wdt)          # (T, 3, B, H)

    def split_w(w):   # (H, 3H) -> (3, H, H), gate order [r, z, n]
        return jnp.stack([w[:, g * H:(g + 1) * H] for g in range(3)], axis=0)

    def inv_spec(shape):
        nd = len(shape)
        return pl.BlockSpec(shape, lambda *_, nd=nd: (0,) * nd)

    # ---- Pass 1: sequential GRU ----
    seq_inputs = [gi0, decoder_hidden.astype(f32)]
    seq_specs = [pl.BlockSpec((Tc1, 3, B, H), lambda t: (t, 0, 0, 0)),
                 inv_spec((L, B, H))]
    for l in range(L):
        w_ih_l, w_hh_l, b_ih_l, b_hh_l = params["gru"][l]
        whh = (w_hh_l if fused else split_w(w_hh_l)).astype(wdt)
        bhn = b_hh_l[:, 2 * H:3 * H].astype(f32)                             # (1, H)
        if l == 0:
            seq_inputs += [whh, bhn]
            seq_specs += [inv_spec(whh.shape), inv_spec(bhn.shape)]
        else:
            wih = (w_ih_l if fused else split_w(w_ih_l)).astype(wdt)
            bgi = (b_ih_l + jnp.concatenate(
                [b_hh_l[:, :H], b_hh_l[:, H:2 * H], zero_h], axis=1)).astype(f32)   # (1, 3H)
            seq_inputs += [wih, bgi, whh, bhn]
            seq_specs += [inv_spec(wih.shape), inv_spec(bgi.shape),
                          inv_spec(whh.shape), inv_spec(bhn.shape)]

    hseq, h_final = pl.pallas_call(
        functools.partial(_gru_seq_kernel, L, Tc1, B, H, fused),
        out_shape=(jax.ShapeDtypeStruct((B, T, H), wdt),     # bf16 stream on production path
                   jax.ShapeDtypeStruct((L, B, H), f32)),
        grid_spec=pltpu.PrefetchScalarGridSpec(
            num_scalar_prefetch=0,
            grid=(T // Tc1,),
            in_specs=seq_specs,
            out_specs=(pl.BlockSpec((B, Tc1, H), lambda t: (0, t, 0)),       # batch-major
                       pl.BlockSpec((L, B, H), lambda t: (0, 0, 0))),
            scratch_shapes=[pltpu.VMEM((L, B, H), f32)],
        ),
        compiler_params=pltpu.CompilerParams(
            dimension_semantics=("arbitrary",)),   # true recurrence over time chunks
    )(*seq_inputs)

    # ---- Pass 2: time-parallel attention + vocab-tiled projection ----
    mask_bias = (attention_mask.astype(f32) - 1.0) * NEAR_INF               # (B, S) additive
    w_ao = params["w_attn_out"]                                              # (2H, H)

    attn_inputs = [hseq, encoder_output.astype(wdt), mask_bias,
                   params["w_attn_in"].astype(wdt),
                   w_ao[:H].astype(wdt), w_ao[H:].astype(wdt),
                   params["w_out"].astype(wdt), params["b_out"].astype(f32)]
    attn_specs = [pl.BlockSpec((B, Tc2, H), lambda t, j: (0, t, 0)),
                  inv_spec((B, S, H)), inv_spec((B, S)),
                  inv_spec((H, H)), inv_spec((H, H)), inv_spec((H, H)),
                  pl.BlockSpec((H, Vc), lambda t, j: (0, j)),
                  pl.BlockSpec((1, Vc), lambda t, j: (0, j))]

    scores, attn_w = pl.pallas_call(
        functools.partial(_attn_out_kernel, bool(wdt != jnp.float32)),
        out_shape=(jax.ShapeDtypeStruct((B, T, V), f32),
                   jax.ShapeDtypeStruct((B, T, S), f32)),
        grid_spec=pltpu.PrefetchScalarGridSpec(
            num_scalar_prefetch=0,
            grid=(T // Tc2, V // Vc),          # vocab axis innermost; attention done at j == 0
            in_specs=attn_specs,
            out_specs=(pl.BlockSpec((B, Tc2, Vc), lambda t, j: (0, t, j)),
                       pl.BlockSpec((B, Tc2, S), lambda t, j: (0, t, 0))),
            scratch_shapes=[pltpu.VMEM((B * Tc2, H), wdt)],
        ),
        compiler_params=pltpu.CompilerParams(
            dimension_semantics=("parallel", "arbitrary")),
    )(*attn_inputs)

    if B != B0:
        scores = scores[:B0]
        attn_w = attn_w[:B0]
        h_final = h_final[:, :B0]
    return scores, h_final, attn_w


# ---------------- pure-JAX reference (same math, no Pallas) ----------------
def decoder_rnn_reference(text_vec, decoder_hidden, encoder_output, attention_mask, params):
    L, _, H = decoder_hidden.shape
    emb = jnp.take(params["embedding"], text_vec, axis=0)
    B, T, _ = emb.shape
    h = decoder_hidden
    outs, attns = [], []
    for t in range(T):
        x = emb[:, t, :]
        new_h = []
        for l in range(L):
            w_ih, w_hh, b_ih, b_hh = params["gru"][l]
            gi = x @ w_ih + b_ih
            gh = h[l] @ w_hh + b_hh
            r = jax.nn.sigmoid(gi[:, :H] + gh[:, :H])
            z = jax.nn.sigmoid(gi[:, H:2 * H] + gh[:, H:2 * H])
            n = jnp.tanh(gi[:, 2 * H:] + r * gh[:, 2 * H:])
            hn = (1.0 - z) * n + z * h[l]
            new_h.append(hn)
            x = hn
        h = jnp.stack(new_h, axis=0)
        dec_out = x
        hid = h[-1] @ params["w_attn_in"]
        sc = jnp.einsum("bh,bsh->bs", hid, encoder_output)
        sc = jnp.where(attention_mask > 0, sc, -NEAR_INF)
        w = jax.nn.softmax(sc, axis=-1)
        mix = jnp.einsum("bs,bsh->bh", w, encoder_output)
        comb = jnp.concatenate([dec_out, mix], axis=1)
        outs.append(jnp.tanh(comb @ params["w_attn_out"]))
        attns.append(w)
    out = jnp.stack(outs, axis=1)                       # (B, T, H)
    logits = out @ params["w_out"] + params["b_out"]    # (B, T, V)
    return logits, h, jnp.stack(attns, axis=1)


def init_params(key, V, E, H, L, pad_idx):
    ks = jax.random.split(key, 8 + 4 * L)
    ki = iter(ks)
    emb = jax.random.normal(next(ki), (V, E), jnp.float32) * 0.1
    emb = emb.at[pad_idx].set(0.0)  # nn.Embedding padding_idx row is zero
    gru = []
    for l in range(L):
        in_dim = E if l == 0 else H
        s_i = 1.0 / np.sqrt(in_dim)
        s_h = 1.0 / np.sqrt(H)
        w_ih = jax.random.normal(next(ki), (in_dim, 3 * H), jnp.float32) * s_i
        w_hh = jax.random.normal(next(ki), (H, 3 * H), jnp.float32) * s_h
        b_ih = jax.random.normal(next(ki), (1, 3 * H), jnp.float32) * 0.05
        b_hh = jax.random.normal(next(ki), (1, 3 * H), jnp.float32) * 0.05
        gru.append((w_ih, w_hh, b_ih, b_hh))
    w_attn_in = jax.random.normal(next(ki), (H, H), jnp.float32) / np.sqrt(H)
    w_attn_out = jax.random.normal(next(ki), (2 * H, H), jnp.float32) / np.sqrt(2 * H)
    w_out = jax.random.normal(next(ki), (H, V), jnp.float32) / np.sqrt(H)
    b_out = jax.random.normal(next(ki), (1, V), jnp.float32) * 0.05
    return {
        "embedding": emb,
        "gru": gru,
        "w_attn_in": w_attn_in,
        "w_attn_out": w_attn_out,
        "w_out": w_out,
        "b_out": b_out,
    }


if __name__ == "__main__":
    # Small shapes consistent with DecoderRNN.forward
    B, T, S = 2, 8, 8           # batch, decoder seqlen, encoder seqlen
    V, E, H, L = 64, 16, 32, 2  # vocab, embed, hidden, num GRU layers
    pad_idx = 0

    key = jax.random.PRNGKey(0)
    k_p, k_tok, k_h0, k_enc = jax.random.split(key, 4)

    params = init_params(k_p, V, E, H, L, pad_idx)

    text_vec = jax.random.randint(k_tok, (B, T), 1, V)                       # (B, T) token ids
    decoder_hidden = jax.random.normal(k_h0, (L, B, H), jnp.float32) * 0.1   # (L, B, H)
    encoder_output = jax.random.normal(k_enc, (B, S, H), jnp.float32) * 0.1  # (B, S, H)
    lengths = jnp.array([S, S - 3])
    attention_mask = (jnp.arange(S)[None, :] < lengths[:, None]).astype(jnp.float32)  # (B, S)

    ref_scores, ref_h, ref_attn = decoder_rnn_reference(
        text_vec, decoder_hidden, encoder_output, attention_mask, params)

    # Strict correctness check: f32 weights in-kernel, exact softmax division.
    s32, h32, a32 = decoder_rnn_forward(
        text_vec, decoder_hidden, encoder_output, attention_mask, params,
        weight_dtype=jnp.float32)
    jax.block_until_ready(s32)
    assert np.allclose(np.asarray(s32), np.asarray(ref_scores), atol=5e-3, rtol=5e-3)
    assert np.allclose(np.asarray(h32), np.asarray(ref_h), atol=5e-3, rtol=5e-3)
    assert np.allclose(np.asarray(a32), np.asarray(ref_attn), atol=5e-3, rtol=5e-3)

    # Production path: bf16 weights/streams on the MXU, f32 accumulation (looser tolerance).
    sbf, hbf, abf = decoder_rnn_forward(
        text_vec, decoder_hidden, encoder_output, attention_mask, params,
        weight_dtype=jnp.bfloat16)
    jax.block_until_ready(sbf)
    assert np.allclose(np.asarray(sbf), np.asarray(ref_scores), atol=1e-1, rtol=1e-1)
    assert np.allclose(np.asarray(hbf), np.asarray(ref_h), atol=1e-1, rtol=1e-1)
    assert np.allclose(np.asarray(abf), np.asarray(ref_attn), atol=1e-1, rtol=1e-1)

    # Exercise the fused (H % 128 == 0) single-dot-per-layer recurrent path as well.
    H2 = 128
    params2 = init_params(jax.random.PRNGKey(1), V, E, H2, L, pad_idx)
    dh2 = jax.random.normal(jax.random.PRNGKey(2), (L, B, H2), jnp.float32) * 0.1
    eo2 = jax.random.normal(jax.random.PRNGKey(3), (B, S, H2), jnp.float32) * 0.1
    r_s, r_h, r_a = decoder_rnn_reference(text_vec, dh2, eo2, attention_mask, params2)
    f_s, f_h, f_a = decoder_rnn_forward(text_vec, dh2, eo2, attention_mask, params2,
                                        weight_dtype=jnp.float32)
    jax.block_until_ready(f_s)
    assert np.allclose(np.asarray(f_s), np.asarray(r_s), atol=5e-3, rtol=5e-3)
    assert np.allclose(np.asarray(f_h), np.asarray(r_h), atol=5e-3, rtol=5e-3)
    assert np.allclose(np.asarray(f_a), np.asarray(r_a), atol=5e-3, rtol=5e-3)

    print("KERNEL_OK")
</pallas_src>

<mosaic_0001>
module attributes {stable_mosaic.version = 11 : i64} {
  func.func @_gru_seq_kernel(%arg0: i32, %arg1: memref<8x3x8x32xf32, #tpu.memory_space<vmem>>, %arg2: memref<2x8x32xf32, #tpu.memory_space<vmem>>, %arg3: memref<3x32x32xf32, #tpu.memory_space<vmem>>, %arg4: memref<1x32xf32, #tpu.memory_space<vmem>>, %arg5: memref<3x32x32xf32, #tpu.memory_space<vmem>>, %arg6: memref<1x96xf32, #tpu.memory_space<vmem>>, %arg7: memref<3x32x32xf32, #tpu.memory_space<vmem>>, %arg8: memref<1x32xf32, #tpu.memory_space<vmem>>, %arg9: memref<8x8x32xf32, #tpu.memory_space<vmem>>, %arg10: memref<2x8x32xf32, #tpu.memory_space<vmem>>, %arg11: memref<2x8x32xf32, #tpu.memory_space<vmem>>) attributes {dimension_semantics = [#tpu.dimension_semantics<arbitrary>], iteration_bounds = array<i64: 1>, scalar_prefetch = 0 : i64, scratch_operands = 1 : i64, tpu.core_type = #tpu.core_type<tc>, window_params = [{transform_indices = @transform_0, window_bounds = array<i64: 8, 3, 8, 32>}, {pipeline_mode = #tpu.pipeline_mode<synchronous>, transform_indices = @transform_1, window_bounds = array<i64: 2, 8, 32>}, {pipeline_mode = #tpu.pipeline_mode<synchronous>, transform_indices = @transform_2, window_bounds = array<i64: 3, 32, 32>}, {pipeline_mode = #tpu.pipeline_mode<synchronous>, transform_indices = @transform_3, window_bounds = array<i64: 1, 32>}, {pipeline_mode = #tpu.pipeline_mode<synchronous>, transform_indices = @transform_4, window_bounds = array<i64: 3, 32, 32>}, {pipeline_mode = #tpu.pipeline_mode<synchronous>, transform_indices = @transform_5, window_bounds = array<i64: 1, 96>}, {pipeline_mode = #tpu.pipeline_mode<synchronous>, transform_indices = @transform_6, window_bounds = array<i64: 3, 32, 32>}, {pipeline_mode = #tpu.pipeline_mode<synchronous>, transform_indices = @transform_7, window_bounds = array<i64: 1, 32>}, {transform_indices = @transform_8, window_bounds = array<i64: 8, 8, 32>}, {pipeline_mode = #tpu.pipeline_mode<synchronous>, transform_indices = @transform_9, window_bounds = array<i64: 2, 8, 32>}]} {
    %c0_i32 = arith.constant 0 : i32
    %0 = arith.cmpi eq, %arg0, %c0_i32 : i32
    %1 = arith.extui %0 : i1 to i32
    %c0_i32_0 = arith.constant 0 : i32
    %2 = arith.cmpi ne, %1, %c0_i32_0 : i32
    scf.if %2 {
      %c0_197 = arith.constant 0 : index
      %c0_198 = arith.constant 0 : index
      %c0_199 = arith.constant 0 : index
      %565 = vector.load %arg2[%c0_197, %c0_198, %c0_199] : memref<2x8x32xf32, #tpu.memory_space<vmem>>, vector<2x8x32xf32>
      %c0_200 = arith.constant 0 : index
      %c0_201 = arith.constant 0 : index
      %c0_202 = arith.constant 0 : index
      %566 = vector.load %arg11[%c0_200, %c0_201, %c0_202] : memref<2x8x32xf32, #tpu.memory_space<vmem>>, vector<2x8x32xf32>
      tpu.vector_store %arg11[%c0_200, %c0_201, %c0_202], %565 {strides = array<i32>} : memref<2x8x32xf32, #tpu.memory_space<vmem>>, vector<2x8x32xf32>,
    } else {
    }
    %c0 = arith.constant 0 : index
    %c0_1 = arith.constant 0 : index
    %c0_2 = arith.constant 0 : index
    %3 = vector.load %arg3[%c0, %c0_1, %c0_2] : memref<3x32x32xf32, #tpu.memory_space<vmem>>, vector<3x32x32xf32>
    %4 = vector.extract_strided_slice %3 {offsets = [0, 0, 0], sizes = [1, 32, 32], strides = [1, 1, 1]} : vector<3x32x32xf32> to vector<1x32x32xf32>
    %5 = vector.shape_cast %4 : vector<1x32x32xf32> to vector<32x32xf32>
    %6 = vector.extract_strided_slice %3 {offsets = [1, 0, 0], sizes = [1, 32, 32], strides = [1, 1, 1]} : vector<3x32x32xf32> to vector<1x32x32xf32>
    %7 = vector.shape_cast %6 : vector<1x32x32xf32> to vector<32x32xf32>
    %8 = vector.extract_strided_slice %3 {offsets = [2, 0, 0], sizes = [1, 32, 32], strides = [1, 1, 1]} : vector<3x32x32xf32> to vector<1x32x32xf32>
    %9 = vector.shape_cast %8 : vector<1x32x32xf32> to vector<32x32xf32>
    %c0_3 = arith.constant 0 : index
    %c0_4 = arith.constant 0 : index
    %10 = vector.load %arg4[%c0_3, %c0_4] : memref<1x32xf32, #tpu.memory_space<vmem>>, vector<1x32xf32>
    %11 = vector.shape_cast %10 : vector<1x32xf32> to vector<1x32xf32>
    %12 = vector.broadcast %11 : vector<1x32xf32> to vector<8x32xf32>
    %c0_5 = arith.constant 0 : index
    %c0_6 = arith.constant 0 : index
    %c0_7 = arith.constant 0 : index
    %13 = vector.load %arg7[%c0_5, %c0_6, %c0_7] : memref<3x32x32xf32, #tpu.memory_space<vmem>>, vector<3x32x32xf32>
    %14 = vector.extract_strided_slice %13 {offsets = [0, 0, 0], sizes = [1, 32, 32], strides = [1, 1, 1]} : vector<3x32x32xf32> to vector<1x32x32xf32>
    %15 = vector.shape_cast %14 : vector<1x32x32xf32> to vector<32x32xf32>
    %16 = vector.extract_strided_slice %13 {offsets = [1, 0, 0], sizes = [1, 32, 32], strides = [1, 1, 1]} : vector<3x32x32xf32> to vector<1x32x32xf32>
    %17 = vector.shape_cast %16 : vector<1x32x32xf32> to vector<32x32xf32>
    %18 = vector.extract_strided_slice %13 {offsets = [2, 0, 0], sizes = [1, 32, 32], strides = [1, 1, 1]} : vector<3x32x32xf32> to vector<1x32x32xf32>
    %19 = vector.shape_cast %18 : vector<1x32x32xf32> to vector<32x32xf32>
    %c0_8 = arith.constant 0 : index
    %c0_9 = arith.constant 0 : index
    %20 = vector.load %arg8[%c0_8, %c0_9] : memref<1x32xf32, #tpu.memory_space<vmem>>, vector<1x32xf32>
    %21 = vector.shape_cast %20 : vector<1x32xf32> to vector<1x32xf32>
    %22 = vector.broadcast %21 : vector<1x32xf32> to vector<8x32xf32>
    %c0_10 = arith.constant 0 : index
    %c0_11 = arith.constant 0 : index
    %c0_12 = arith.constant 0 : index
    %23 = vector.load %arg5[%c0_10, %c0_11, %c0_12] : memref<3x32x32xf32, #tpu.memory_space<vmem>>, vector<3x32x32xf32>
    %24 = vector.extract_strided_slice %23 {offsets = [0, 0, 0], sizes = [1, 32, 32], strides = [1, 1, 1]} : vector<3x32x32xf32> to vector<1x32x32xf32>
    %25 = vector.shape_cast %24 : vector<1x32x32xf32> to vector<32x32xf32>
    %26 = vector.extract_strided_slice %23 {offsets = [1, 0, 0], sizes = [1, 32, 32], strides = [1, 1, 1]} : vector<3x32x32xf32> to vector<1x32x32xf32>
    %27 = vector.shape_cast %26 : vector<1x32x32xf32> to vector<32x32xf32>
    %28 = vector.extract_strided_slice %23 {offsets = [2, 0, 0], sizes = [1, 32, 32], strides = [1, 1, 1]} : vector<3x32x32xf32> to vector<1x32x32xf32>
    %29 = vector.shape_cast %28 : vector<1x32x32xf32> to vector<32x32xf32>
    %c0_13 = arith.constant 0 : index
    %c0_14 = arith.constant 0 : index
    %30 = vector.load %arg6[%c0_13, %c0_14] : memref<1x96xf32, #tpu.memory_space<vmem>>, vector<1x96xf32>
    %31 = vector.extract_strided_slice %30 {offsets = [0, 0], sizes = [1, 32], strides = [1, 1]} : vector<1x96xf32> to vector<1x32xf32>
    %32 = vector.shape_cast %31 : vector<1x32xf32> to vector<1x32xf32>
    %33 = vector.broadcast %32 : vector<1x32xf32> to vector<8x32xf32>
    %34 = vector.extract_strided_slice %30 {offsets = [0, 32], sizes = [1, 32], strides = [1, 1]} : vector<1x96xf32> to vector<1x32xf32>
    %35 = vector.shape_cast %34 : vector<1x32xf32> to vector<1x32xf32>
    %36 = vector.broadcast %35 : vector<1x32xf32> to vector<8x32xf32>
    %37 = vector.extract_strided_slice %30 {offsets = [0, 64], sizes = [1, 32], strides = [1, 1]} : vector<1x96xf32> to vector<1x32xf32>
    %38 = vector.shape_cast %37 : vector<1x32xf32> to vector<1x32xf32>
    %39 = vector.broadcast %38 : vector<1x32xf32> to vector<8x32xf32>
    %c0_15 = arith.constant 0 : index
    %c0_16 = arith.constant 0 : index
    %c0_17 = arith.constant 0 : index
    %40 = vector.load %arg11[%c0_15, %c0_16, %c0_17] : memref<2x8x32xf32, #tpu.memory_space<vmem>>, vector<1x8x32xf32>
    %41 = vector.shape_cast %40 : vector<1x8x32xf32> to vector<8x32xf32>
    %c1 = arith.constant 1 : index
    %c0_18 = arith.constant 0 : index
    %c0_19 = arith.constant 0 : index
    %42 = vector.load %arg11[%c1, %c0_18, %c0_19] : memref<2x8x32xf32, #tpu.memory_space<vmem>>, vector<1x8x32xf32>
    %43 = vector.shape_cast %42 : vector<1x8x32xf32> to vector<8x32xf32>
    %c0_20 = arith.constant 0 : index
    %c0_21 = arith.constant 0 : index
    %c0_22 = arith.constant 0 : index
    %c0_23 = arith.constant 0 : index
    %44 = vector.load %arg1[%c0_20, %c0_21, %c0_22, %c0_23] : memref<8x3x8x32xf32, #tpu.memory_space<vmem>>, vector<1x3x8x32xf32>
    %45 = vector.shape_cast %44 : vector<1x3x8x32xf32> to vector<3x8x32xf32>
    %cst = arith.constant dense<0.000000e+00> : vector<8x32xf32>
    %46 = tpu.matmul %41, %5, %cst {dimension_numbers = #tpu.dot_dimension_numbers<[1], [0], [0], [1], [0, 0, 1, 1], [], []>} : vector<8x32xf32>, vector<32x32xf32>, vector<8x32xf32> -> vector<8x32xf32>
    %cst_24 = arith.constant dense<0.000000e+00> : vector<8x32xf32>
    %47 = tpu.matmul %41, %7, %cst_24 {dimension_numbers = #tpu.dot_dimension_numbers<[1], [0], [0], [1], [0, 0, 1, 1], [], []>} : vector<8x32xf32>, vector<32x32xf32>, vector<8x32xf32> -> vector<8x32xf32>
    %cst_25 = arith.constant dense<0.000000e+00> : vector<8x32xf32>
    %48 = tpu.matmul %41, %9, %cst_25 {dimension_numbers = #tpu.dot_dimension_numbers<[1], [0], [0], [1], [0, 0, 1, 1], [], []>} : vector<8x32xf32>, vector<32x32xf32>, vector<8x32xf32> -> vector<8x32xf32>
    %49 = vector.extract_strided_slice %45 {offsets = [0, 0, 0], sizes = [1, 8, 32], strides = [1, 1, 1]} : vector<3x8x32xf32> to vector<1x8x32xf32>
    %50 = vector.shape_cast %49 : vector<1x8x32xf32> to vector<8x32xf32>
    %51 = vector.extract_strided_slice %45 {offsets = [1, 0, 0], sizes = [1, 8, 32], strides = [1, 1, 1]} : vector<3x8x32xf32> to vector<1x8x32xf32>
    %52 = vector.shape_cast %51 : vector<1x8x32xf32> to vector<8x32xf32>
    %53 = vector.extract_strided_slice %45 {offsets = [2, 0, 0], sizes = [1, 8, 32], strides = [1, 1, 1]} : vector<3x8x32xf32> to vector<1x8x32xf32>
    %54 = vector.shape_cast %53 : vector<1x8x32xf32> to vector<8x32xf32>
    %55 = arith.addf %50, %46 : vector<8x32xf32>
    %56 = arith.negf %55 : vector<8x32xf32>
    %57 = math.exp %56 : vector<8x32xf32>
    %cst_26 = arith.constant 1.000000e+00 : f32
    %58 = vector.broadcast %cst_26 : f32 to vector<8x32xf32>
    %59 = arith.addf %58, %57 : vector<8x32xf32>
    %60 = arith.divf %58, %59 : vector<8x32xf32>
    %61 = arith.addf %52, %47 : vector<8x32xf32>
    %62 = arith.negf %61 : vector<8x32xf32>
    %63 = math.exp %62 : vector<8x32xf32>
    %cst_27 = arith.constant 1.000000e+00 : f32
    %64 = vector.broadcast %cst_27 : f32 to vector<8x32xf32>
    %65 = arith.addf %64, %63 : vector<8x32xf32>
    %66 = arith.divf %64, %65 : vector<8x32xf32>
    %67 = arith.addf %48, %12 : vector<8x32xf32>
    %68 = arith.mulf %60, %67 : vector<8x32xf32>
    %69 = arith.addf %54, %68 : vector<8x32xf32>
    %70 = math.tanh %69 : vector<8x32xf32>
    %cst_28 = arith.constant 1.000000e+00 : f32
    %71 = vector.broadcast %cst_28 : f32 to vector<8x32xf32>
    %72 = arith.subf %71, %66 : vector<8x32xf32>
    %73 = arith.mulf %72, %70 : vector<8x32xf32>
    %74 = arith.mulf %66, %41 : vector<8x32xf32>
    %75 = arith.addf %73, %74 : vector<8x32xf32>
    %cst_29 = arith.constant dense<0.000000e+00> : vector<8x32xf32>
    %76 = tpu.matmul %43, %15, %cst_29 {dimension_numbers = #tpu.dot_dimension_numbers<[1], [0], [0], [1], [0, 0, 1, 1], [], []>} : vector<8x32xf32>, vector<32x32xf32>, vector<8x32xf32> -> vector<8x32xf32>
    %cst_30 = arith.constant dense<0.000000e+00> : vector<8x32xf32>
    %77 = tpu.matmul %43, %17, %cst_30 {dimension_numbers = #tpu.dot_dimension_numbers<[1], [0], [0], [1], [0, 0, 1, 1], [], []>} : vector<8x32xf32>, vector<32x32xf32>, vector<8x32xf32> -> vector<8x32xf32>
    %cst_31 = arith.constant dense<0.000000e+00> : vector<8x32xf32>
    %78 = tpu.matmul %43, %19, %cst_31 {dimension_numbers = #tpu.dot_dimension_numbers<[1], [0], [0], [1], [0, 0, 1, 1], [], []>} : vector<8x32xf32>, vector<32x32xf32>, vector<8x32xf32> -> vector<8x32xf32>
    %cst_32 = arith.constant dense<0.000000e+00> : vector<8x32xf32>
    %79 = tpu.matmul %75, %25, %cst_32 {dimension_numbers = #tpu.dot_dimension_numbers<[1], [0], [0], [1], [0, 0, 1, 1], [], []>} : vector<8x32xf32>, vector<32x32xf32>, vector<8x32xf32> -> vector<8x32xf32>
    %80 = arith.addf %79, %33 : vector<8x32xf32>
    %cst_33 = arith.constant dense<0.000000e+00> : vector<8x32xf32>
    %81 = tpu.matmul %75, %27, %cst_33 {dimension_numbers = #tpu.dot_dimension_numbers<[1], [0], [0], [1], [0, 0, 1, 1], [], []>} : vector<8x32xf32>, vector<32x32xf32>, vector<8x32xf32> -> vector<8x32xf32>
    %82 = arith.addf %81, %36 : vector<8x32xf32>
    %cst_34 = arith.constant dense<0.000000e+00> : vector<8x32xf32>
    %83 = tpu.matmul %75, %29, %cst_34 {dimension_numbers = #tpu.dot_dimension_numbers<[1], [0], [0], [1], [0, 0, 1, 1], [], []>} : vector<8x32xf32>, vector<32x32xf32>, vector<8x32xf32> -> vector<8x32xf32>
    %84 = arith.addf %83, %39 : vector<8x32xf32>
    %85 = arith.addf %80, %76 : vector<8x32xf32>
    %86 = arith.negf %85 : vector<8x32xf32>
    %87 = math.exp %86 : vector<8x32xf32>
    %cst_35 = arith.constant 1.000000e+00 : f32
    %88 = vector.broadcast %cst_35 : f32 to vector<8x32xf32>
    %89 = arith.addf %88, %87 : vector<8x32xf32>
    %90 = arith.divf %88, %89 : vector<8x32xf32>
    %91 = arith.addf %82, %77 : vector<8x32xf32>
    %92 = arith.negf %91 : vector<8x32xf32>
    %93 = math.exp %92 : vector<8x32xf32>
    %cst_36 = arith.constant 1.000000e+00 : f32
    %94 = vector.broadcast %cst_36 : f32 to vector<8x32xf32>
    %95 = arith.addf %94, %93 : vector<8x32xf32>
    %96 = arith.divf %94, %95 : vector<8x32xf32>
    %97 = arith.addf %78, %22 : vector<8x32xf32>
    %98 = arith.mulf %90, %97 : vector<8x32xf32>
    %99 = arith.addf %84, %98 : vector<8x32xf32>
    %100 = math.tanh %99 : vector<8x32xf32>
    %cst_37 = arith.constant 1.000000e+00 : f32
    %101 = vector.broadcast %cst_37 : f32 to vector<8x32xf32>
    %102 = arith.subf %101, %96 : vector<8x32xf32>
    %103 = arith.mulf %102, %100 : vector<8x32xf32>
    %104 = arith.mulf %96, %43 : vector<8x32xf32>
    %105 = arith.addf %103, %104 : vector<8x32xf32>
    %106 = vector.shape_cast %105 : vector<8x32xf32> to vector<8x1x32xf32>
    %c0_38 = arith.constant 0 : index
    %c0_39 = arith.constant 0 : index
    %c0_40 = arith.constant 0 : index
    %107 = vector.load %arg9[%c0_38, %c0_39, %c0_40] : memref<8x8x32xf32, #tpu.memory_space<vmem>>, vector<8x1x32xf32>
    tpu.vector_store %arg9[%c0_38, %c0_39, %c0_40], %106 {strides = array<i32>} : memref<8x8x32xf32, #tpu.memory_space<vmem>>, vector<8x1x32xf32>,
    %c1_41 = arith.constant 1 : index
    %c0_42 = arith.constant 0 : index
    %c0_43 = arith.constant 0 : index
    %c0_44 = arith.constant 0 : index
    %108 = vector.load %arg1[%c1_41, %c0_42, %c0_43, %c0_44] : memref<8x3x8x32xf32, #tpu.memory_space<vmem>>, vector<1x3x8x32xf32>
    %109 = vector.shape_cast %108 : vector<1x3x8x32xf32> to vector<3x8x32xf32>
    %cst_45 = arith.constant dense<0.000000e+00> : vector<8x32xf32>
    %110 = tpu.matmul %75, %5, %cst_45 {dimension_numbers = #tpu.dot_dimension_numbers<[1], [0], [0], [1], [0, 0, 1, 1], [], []>} : vector<8x32xf32>, vector<32x32xf32>, vector<8x32xf32> -> vector<8x32xf32>
    %cst_46 = arith.constant dense<0.000000e+00> : vector<8x32xf32>
    %111 = tpu.matmul %75, %7, %cst_46 {dimension_numbers = #tpu.dot_dimension_numbers<[1], [0], [0], [1], [0, 0, 1, 1], [], []>} : vector<8x32xf32>, vector<32x32xf32>, vector<8x32xf32> -> vector<8x32xf32>
    %cst_47 = arith.constant dense<0.000000e+00> : vector<8x32xf32>
    %112 = tpu.matmul %75, %9, %cst_47 {dimension_numbers = #tpu.dot_dimension_numbers<[1], [0], [0], [1], [0, 0, 1, 1], [], []>} : vector<8x32xf32>, vector<32x32xf32>, vector<8x32xf32> -> vector<8x32xf32>
    %113 = vector.extract_strided_slice %109 {offsets = [0, 0, 0], sizes = [1, 8, 32], strides = [1, 1, 1]} : vector<3x8x32xf32> to vector<1x8x32xf32>
    %114 = vector.shape_cast %113 : vector<1x8x32xf32> to vector<8x32xf32>
    %115 = vector.extract_strided_slice %109 {offsets = [1, 0, 0], sizes = [1, 8, 32], strides = [1, 1, 1]} : vector<3x8x32xf32> to vector<1x8x32xf32>
    %116 = vector.shape_cast %115 : vector<1x8x32xf32> to vector<8x32xf32>
    %117 = vector.extract_strided_slice %109 {offsets = [2, 0, 0], sizes = [1, 8, 32], strides = [1, 1, 1]} : vector<3x8x32xf32> to vector<1x8x32xf32>
    %118 = vector.shape_cast %117 : vector<1x8x32xf32> to vector<8x32xf32>
    %119 = arith.addf %114, %110 : vector<8x32xf32>
    %120 = arith.negf %119 : vector<8x32xf32>
    %121 = math.exp %120 : vector<8x32xf32>
    %cst_48 = arith.constant 1.000000e+00 : f32
    %122 = vector.broadcast %cst_48 : f32 to vector<8x32xf32>
    %123 = arith.addf %122, %121 : vector<8x32xf32>
    %124 = arith.divf %122, %123 : vector<8x32xf32>
    %125 = arith.addf %116, %111 : vector<8x32xf32>
    %126 = arith.negf %125 : vector<8x32xf32>
    %127 = math.exp %126 : vector<8x32xf32>
    %cst_49 = arith.constant 1.000000e+00 : f32
    %128 = vector.broadcast %cst_49 : f32 to vector<8x32xf32>
    %129 = arith.addf %128, %127 : vector<8x32xf32>
    %130 = arith.divf %128, %129 : vector<8x32xf32>
    %131 = arith.addf %112, %12 : vector<8x32xf32>
    %132 = arith.mulf %124, %131 : vector<8x32xf32>
    %133 = arith.addf %118, %132 : vector<8x32xf32>
    %134 = math.tanh %133 : vector<8x32xf32>
    %cst_50 = arith.constant 1.000000e+00 : f32
    %135 = vector.broadcast %cst_50 : f32 to vector<8x32xf32>
    %136 = arith.subf %135, %130 : vector<8x32xf32>
    %137 = arith.mulf %136, %134 : vector<8x32xf32>
    %138 = arith.mulf %130, %75 : vector<8x32xf32>
    %139 = arith.addf %137, %138 : vector<8x32xf32>
    %cst_51 = arith.constant dense<0.000000e+00> : vector<8x32xf32>
    %140 = tpu.matmul %105, %15, %cst_51 {dimension_numbers = #tpu.dot_dimension_numbers<[1], [0], [0], [1], [0, 0, 1, 1], [], []>} : vector<8x32xf32>, vector<32x32xf32>, vector<8x32xf32> -> vector<8x32xf32>
    %cst_52 = arith.constant dense<0.000000e+00> : vector<8x32xf32>
    %141 = tpu.matmul %105, %17, %cst_52 {dimension_numbers = #tpu.dot_dimension_numbers<[1], [0], [0], [1], [0, 0, 1, 1], [], []>} : vector<8x32xf32>, vector<32x32xf32>, vector<8x32xf32> -> vector<8x32xf32>
    %cst_53 = arith.constant dense<0.000000e+00> : vector<8x32xf32>
    %142 = tpu.matmul %105, %19, %cst_53 {dimension_numbers = #tpu.dot_dimension_numbers<[1], [0], [0], [1], [0, 0, 1, 1], [], []>} : vector<8x32xf32>, vector<32x32xf32>, vector<8x32xf32> -> vector<8x32xf32>
    %cst_54 = arith.constant dense<0.000000e+00> : vector<8x32xf32>
    %143 = tpu.matmul %139, %25, %cst_54 {dimension_numbers = #tpu.dot_dimension_numbers<[1], [0], [0], [1], [0, 0, 1, 1], [], []>} : vector<8x32xf32>, vector<32x32xf32>, vector<8x32xf32> -> vector<8x32xf32>
    %144 = arith.addf %143, %33 : vector<8x32xf32>
    %cst_55 = arith.constant dense<0.000000e+00> : vector<8x32xf32>
    %145 = tpu.matmul %139, %27, %cst_55 {dimension_numbers = #tpu.dot_dimension_numbers<[1], [0], [0], [1], [0, 0, 1, 1], [], []>} : vector<8x32xf32>, vector<32x32xf32>, vector<8x32xf32> -> vector<8x32xf32>
    %146 = arith.addf %145, %36 : vector<8x32xf32>
    %cst_56 = arith.constant dense<0.000000e+00> : vector<8x32xf32>
    %147 = tpu.matmul %139, %29, %cst_56 {dimension_numbers = #tpu.dot_dimension_numbers<[1], [0], [0], [1], [0, 0, 1, 1], [], []>} : vector<8x32xf32>, vector<32x32xf32>, vector<8x32xf32> -> vector<8x32xf32>
    %148 = arith.addf %147, %39 : vector<8x32xf32>
    %149 = arith.addf %144, %140 : vector<8x32xf32>
    %150 = arith.negf %149 : vector<8x32xf32>
    %151 = math.exp %150 : vector<8x32xf32>
    %cst_57 = arith.constant 1.000000e+00 : f32
    %152 = vector.broadcast %cst_57 : f32 to vector<8x32xf32>
    %153 = arith.addf %152, %151 : vector<8x32xf32>
    %154 = arith.divf %152, %153 : vector<8x32xf32>
    %155 = arith.addf %146, %141 : vector<8x32xf32>
    %156 = arith.negf %155 : vector<8x32xf32>
    %157 = math.exp %156 : vector<8x32xf32>
    %cst_58 = arith.constant 1.000000e+00 : f32
    %158 = vector.broadcast %cst_58 : f32 to vector<8x32xf32>
    %159 = arith.addf %158, %157 : vector<8x32xf32>
    %160 = arith.divf %158, %159 : vector<8x32xf32>
    %161 = arith.addf %142, %22 : vector<8x32xf32>
    %162 = arith.mulf %154, %161 : vector<8x32xf32>
    %163 = arith.addf %148, %162 : vector<8x32xf32>
    %164 = math.tanh %163 : vector<8x32xf32>
    %cst_59 = arith.constant 1.000000e+00 : f32
    %165 = vector.broadcast %cst_59 : f32 to vector<8x32xf32>
    %166 = arith.subf %165, %160 : vector<8x32xf32>
    %167 = arith.mulf %166, %164 : vector<8x32xf32>
    %168 = arith.mulf %160, %105 : vector<8x32xf32>
    %169 = arith.addf %167, %168 : vector<8x32xf32>
    %170 = vector.shape_cast %169 : vector<8x32xf32> to vector<8x1x32xf32>
    %c0_60 = arith.constant 0 : index
    %c1_61 = arith.constant 1 : index
    %c0_62 = arith.constant 0 : index
    %171 = vector.load %arg9[%c0_60, %c1_61, %c0_62] : memref<8x8x32xf32, #tpu.memory_space<vmem>>, vector<8x1x32xf32>
    tpu.vector_store %arg9[%c0_60, %c1_61, %c0_62], %170 {strides = array<i32>} : memref<8x8x32xf32, #tpu.memory_space<vmem>>, vector<8x1x32xf32>,
    %c2 = arith.constant 2 : index
    %c0_63 = arith.constant 0 : index
    %c0_64 = arith.constant 0 : index
    %c0_65 = arith.constant 0 : index
    %172 = vector.load %arg1[%c2, %c0_63, %c0_64, %c0_65] : memref<8x3x8x32xf32, #tpu.memory_space<vmem>>, vector<1x3x8x32xf32>
    %173 = vector.shape_cast %172 : vector<1x3x8x32xf32> to vector<3x8x32xf32>
    %cst_66 = arith.constant dense<0.000000e+00> : vector<8x32xf32>
    %174 = tpu.matmul %139, %5, %cst_66 {dimension_numbers = #tpu.dot_dimension_numbers<[1], [0], [0], [1], [0, 0, 1, 1], [], []>} : vector<8x32xf32>, vector<32x32xf32>, vector<8x32xf32> -> vector<8x32xf32>
    %cst_67 = arith.constant dense<0.000000e+00> : vector<8x32xf32>
    %175 = tpu.matmul %139, %7, %cst_67 {dimension_numbers = #tpu.dot_dimension_numbers<[1], [0], [0], [1], [0, 0, 1, 1], [], []>} : vector<8x32xf32>, vector<32x32xf32>, vector<8x32xf32> -> vector<8x32xf32>
    %cst_68 = arith.constant dense<0.000000e+00> : vector<8x32xf32>
    %176 = tpu.matmul %139, %9, %cst_68 {dimension_numbers = #tpu.dot_dimension_numbers<[1], [0], [0], [1], [0, 0, 1, 1], [], []>} : vector<8x32xf32>, vector<32x32xf32>, vector<8x32xf32> -> vector<8x32xf32>
    %177 = vector.extract_strided_slice %173 {offsets = [0, 0, 0], sizes = [1, 8, 32], strides = [1, 1, 1]} : vector<3x8x32xf32> to vector<1x8x32xf32>
    %178 = vector.shape_cast %177 : vector<1x8x32xf32> to vector<8x32xf32>
    %179 = vector.extract_strided_slice %173 {offsets = [1, 0, 0], sizes = [1, 8, 32], strides = [1, 1, 1]} : vector<3x8x32xf32> to vector<1x8x32xf32>
    %180 = vector.shape_cast %179 : vector<1x8x32xf32> to vector<8x32xf32>
    %181 = vector.extract_strided_slice %173 {offsets = [2, 0, 0], sizes = [1, 8, 32], strides = [1, 1, 1]} : vector<3x8x32xf32> to vector<1x8x32xf32>
    %182 = vector.shape_cast %181 : vector<1x8x32xf32> to vector<8x32xf32>
    %183 = arith.addf %178, %174 : vector<8x32xf32>
    %184 = arith.negf %183 : vector<8x32xf32>
    %185 = math.exp %184 : vector<8x32xf32>
    %cst_69 = arith.constant 1.000000e+00 : f32
    %186 = vector.broadcast %cst_69 : f32 to vector<8x32xf32>
    %187 = arith.addf %186, %185 : vector<8x32xf32>
    %188 = arith.divf %186, %187 : vector<8x32xf32>
    %189 = arith.addf %180, %175 : vector<8x32xf32>
    %190 = arith.negf %189 : vector<8x32xf32>
    %191 = math.exp %190 : vector<8x32xf32>
    %cst_70 = arith.constant 1.000000e+00 : f32
    %192 = vector.broadcast %cst_70 : f32 to vector<8x32xf32>
    %193 = arith.addf %192, %191 : vector<8x32xf32>
    %194 = arith.divf %192, %193 : vector<8x32xf32>
    %195 = arith.addf %176, %12 : vector<8x32xf32>
    %196 = arith.mulf %188, %195 : vector<8x32xf32>
    %197 = arith.addf %182, %196 : vector<8x32xf32>
    %198 = math.tanh %197 : vector<8x32xf32>
    %cst_71 = arith.constant 1.000000e+00 : f32
    %199 = vector.broadcast %cst_71 : f32 to vector<8x32xf32>
    %200 = arith.subf %199, %194 : vector<8x32xf32>
    %201 = arith.mulf %200, %198 : vector<8x32xf32>
    %202 = arith.mulf %194, %139 : vector<8x32xf32>
    %203 = arith.addf %201, %202 : vector<8x32xf32>
    %cst_72 = arith.constant dense<0.000000e+00> : vector<8x32xf32>
    %204 = tpu.matmul %169, %15, %cst_72 {dimension_numbers = #tpu.dot_dimension_numbers<[1], [0], [0], [1], [0, 0, 1, 1], [], []>} : vector<8x32xf32>, vector<32x32xf32>, vector<8x32xf32> -> vector<8x32xf32>
    %cst_73 = arith.constant dense<0.000000e+00> : vector<8x32xf32>
    %205 = tpu.matmul %169, %17, %cst_73 {dimension_numbers = #tpu.dot_dimension_numbers<[1], [0], [0], [1], [0, 0, 1, 1], [], []>} : vector<8x32xf32>, vector<32x32xf32>, vector<8x32xf32> -> vector<8x32xf32>
    %cst_74 = arith.constant dense<0.000000e+00> : vector<8x32xf32>
    %206 = tpu.matmul %169, %19, %cst_74 {dimension_numbers = #tpu.dot_dimension_numbers<[1], [0], [0], [1], [0, 0, 1, 1], [], []>} : vector<8x32xf32>, vector<32x32xf32>, vector<8x32xf32> -> vector<8x32xf32>
    %cst_75 = arith.constant dense<0.000000e+00> : vector<8x32xf32>
    %207 = tpu.matmul %203, %25, %cst_75 {dimension_numbers = #tpu.dot_dimension_numbers<[1], [0], [0], [1], [0, 0, 1, 1], [], []>} : vector<8x32xf32>, vector<32x32xf32>, vector<8x32xf32> -> vector<8x32xf32>
    %208 = arith.addf %207, %33 : vector<8x32xf32>
    %cst_76 = arith.constant dense<0.000000e+00> : vector<8x32xf32>
    %209 = tpu.matmul %203, %27, %cst_76 {dimension_numbers = #tpu.dot_dimension_numbers<[1], [0], [0], [1], [0, 0, 1, 1], [], []>} : vector<8x32xf32>, vector<32x32xf32>, vector<8x32xf32> -> vector<8x32xf32>
    %210 = arith.addf %209, %36 : vector<8x32xf32>
    %cst_77 = arith.constant dense<0.000000e+00> : vector<8x32xf32>
    %211 = tpu.matmul %203, %29, %cst_77 {dimension_numbers = #tpu.dot_dimension_numbers<[1], [0], [0], [1], [0, 0, 1, 1], [], []>} : vector<8x32xf32>, vector<32x32xf32>, vector<8x32xf32> -> vector<8x32xf32>
    %212 = arith.addf %211, %39 : vector<8x32xf32>
    %213 = arith.addf %208, %204 : vector<8x32xf32>
    %214 = arith.negf %213 : vector<8x32xf32>
    %215 = math.exp %214 : vector<8x32xf32>
    %cst_78 = arith.constant 1.000000e+00 : f32
    %216 = vector.broadcast %cst_78 : f32 to vector<8x32xf32>
    %217 = arith.addf %216, %215 : vector<8x32xf32>
    %218 = arith.divf %216, %217 : vector<8x32xf32>
    %219 = arith.addf %210, %205 : vector<8x32xf32>
    %220 = arith.negf %219 : vector<8x32xf32>
    %221 = math.exp %220 : vector<8x32xf32>
    %cst_79 = arith.constant 1.000000e+00 : f32
    %222 = vector.broadcast %cst_79 : f32 to vector<8x32xf32>
    %223 = arith.addf %222, %221 : vector<8x32xf32>
    %224 = arith.divf %222, %223 : vector<8x32xf32>
    %225 = arith.addf %206, %22 : vector<8x32xf32>
    %226 = arith.mulf %218, %225 : vector<8x32xf32>
    %227 = arith.addf %212, %226 : vector<8x32xf32>
    %228 = math.tanh %227 : vector<8x32xf32>
    %cst_80 = arith.constant 1.000000e+00 : f32
    %229 = vector.broadcast %cst_80 : f32 to vector<8x32xf32>
    %230 = arith.subf %229, %224 : vector<8x32xf32>
    %231 = arith.mulf %230, %228 : vector<8x32xf32>
    %232 = arith.mulf %224, %169 : vector<8x32xf32>
    %233 = arith.addf %231, %232 : vector<8x32xf32>
    %234 = vector.shape_cast %233 : vector<8x32xf32> to vector<8x1x32xf32>
    %c0_81 = arith.constant 0 : index
    %c2_82 = arith.constant 2 : index
    %c0_83 = arith.constant 0 : index
    %235 = vector.load %arg9[%c0_81, %c2_82, %c0_83] : memref<8x8x32xf32, #tpu.memory_space<vmem>>, vector<8x1x32xf32>
    tpu.vector_store %arg9[%c0_81, %c2_82, %c0_83], %234 {strides = array<i32>} : memref<8x8x32xf32, #tpu.memory_space<vmem>>, vector<8x1x32xf32>,
    %c3 = arith.constant 3 : index
    %c0_84 = arith.constant 0 : index
    %c0_85 = arith.constant 0 : index
    %c0_86 = arith.constant 0 : index
    %236 = vector.load %arg1[%c3, %c0_84, %c0_85, %c0_86] : memref<8x3x8x32xf32, #tpu.memory_space<vmem>>, vector<1x3x8x32xf32>
    %237 = vector.shape_cast %236 : vector<1x3x8x32xf32> to vector<3x8x32xf32>
    %cst_87 = arith.constant dense<0.000000e+00> : vector<8x32xf32>
    %238 = tpu.matmul %203, %5, %cst_87 {dimension_numbers = #tpu.dot_dimension_numbers<[1], [0], [0], [1], [0, 0, 1, 1], [], []>} : vector<8x32xf32>, vector<32x32xf32>, vector<8x32xf32> -> vector<8x32xf32>
    %cst_88 = arith.constant dense<0.000000e+00> : vector<8x32xf32>
    %239 = tpu.matmul %203, %7, %cst_88 {dimension_numbers = #tpu.dot_dimension_numbers<[1], [0], [0], [1], [0, 0, 1, 1], [], []>} : vector<8x32xf32>, vector<32x32xf32>, vector<8x32xf32> -> vector<8x32xf32>
    %cst_89 = arith.constant dense<0.000000e+00> : vector<8x32xf32>
    %240 = tpu.matmul %203, %9, %cst_89 {dimension_numbers = #tpu.dot_dimension_numbers<[1], [0], [0], [1], [0, 0, 1, 1], [], []>} : vector<8x32xf32>, vector<32x32xf32>, vector<8x32xf32> -> vector<8x32xf32>
    %241 = vector.extract_strided_slice %237 {offsets = [0, 0, 0], sizes = [1, 8, 32], strides = [1, 1, 1]} : vector<3x8x32xf32> to vector<1x8x32xf32>
    %242 = vector.shape_cast %241 : vector<1x8x32xf32> to vector<8x32xf32>
    %243 = vector.extract_strided_slice %237 {offsets = [1, 0, 0], sizes = [1, 8, 32], strides = [1, 1, 1]} : vector<3x8x32xf32> to vector<1x8x32xf32>
    %244 = vector.shape_cast %243 : vector<1x8x32xf32> to vector<8x32xf32>
    %245 = vector.extract_strided_slice %237 {offsets = [2, 0, 0], sizes = [1, 8, 32], strides = [1, 1, 1]} : vector<3x8x32xf32> to vector<1x8x32xf32>
    %246 = vector.shape_cast %245 : vector<1x8x32xf32> to vector<8x32xf32>
    %247 = arith.addf %242, %238 : vector<8x32xf32>
    %248 = arith.negf %247 : vector<8x32xf32>
    %249 = math.exp %248 : vector<8x32xf32>
    %cst_90 = arith.constant 1.000000e+00 : f32
    %250 = vector.broadcast %cst_90 : f32 to vector<8x32xf32>
    %251 = arith.addf %250, %249 : vector<8x32xf32>
    %252 = arith.divf %250, %251 : vector<8x32xf32>
    %253 = arith.addf %244, %239 : vector<8x32xf32>
    %254 = arith.negf %253 : vector<8x32xf32>
    %255 = math.exp %254 : vector<8x32xf32>
    %cst_91 = arith.constant 1.000000e+00 : f32
    %256 = vector.broadcast %cst_91 : f32 to vector<8x32xf32>
    %257 = arith.addf %256, %255 : vector<8x32xf32>
    %258 = arith.divf %256, %257 : vector<8x32xf32>
    %259 = arith.addf %240, %12 : vector<8x32xf32>
    %260 = arith.mulf %252, %259 : vector<8x32xf32>
    %261 = arith.addf %246, %260 : vector<8x32xf32>
    %262 = math.tanh %261 : vector<8x32xf32>
    %cst_92 = arith.constant 1.000000e+00 : f32
    %263 = vector.broadcast %cst_92 : f32 to vector<8x32xf32>
    %264 = arith.subf %263, %258 : vector<8x32xf32>
    %265 = arith.mulf %264, %262 : vector<8x32xf32>
    %266 = arith.mulf %258, %203 : vector<8x32xf32>
    %267 = arith.addf %265, %266 : vector<8x32xf32>
    %cst_93 = arith.constant dense<0.000000e+00> : vector<8x32xf32>
    %268 = tpu.matmul %233, %15, %cst_93 {dimension_numbers = #tpu.dot_dimension_numbers<[1], [0], [0], [1], [0, 0, 1, 1], [], []>} : vector<8x32xf32>, vector<32x32xf32>, vector<8x32xf32> -> vector<8x32xf32>
    %cst_94 = arith.constant dense<0.000000e+00> : vector<8x32xf32>
    %269 = tpu.matmul %233, %17, %cst_94 {dimension_numbers = #tpu.dot_dimension_numbers<[1], [0], [0], [1], [0, 0, 1, 1], [], []>} : vector<8x32xf32>, vector<32x32xf32>, vector<8x32xf32> -> vector<8x32xf32>
    %cst_95 = arith.constant dense<0.000000e+00> : vector<8x32xf32>
    %270 = tpu.matmul %233, %19, %cst_95 {dimension_numbers = #tpu.dot_dimension_numbers<[1], [0], [0], [1], [0, 0, 1, 1], [], []>} : vector<8x32xf32>, vector<32x32xf32>, vector<8x32xf32> -> vector<8x32xf32>
    %cst_96 = arith.constant dense<0.000000e+00> : vector<8x32xf32>
    %271 = tpu.matmul %267, %25, %cst_96 {dimension_numbers = #tpu.dot_dimension_numbers<[1], [0], [0], [1], [0, 0, 1, 1], [], []>} : vector<8x32xf32>, vector<32x32xf32>, vector<8x32xf32> -> vector<8x32xf32>
    %272 = arith.addf %271, %33 : vector<8x32xf32>
    %cst_97 = arith.constant dense<0.000000e+00> : vector<8x32xf32>
    %273 = tpu.matmul %267, %27, %cst_97 {dimension_numbers = #tpu.dot_dimension_numbers<[1], [0], [0], [1], [0, 0, 1, 1], [], []>} : vector<8x32xf32>, vector<32x32xf32>, vector<8x32xf32> -> vector<8x32xf32>
    %274 = arith.addf %273, %36 : vector<8x32xf32>
    %cst_98 = arith.constant dense<0.000000e+00> : vector<8x32xf32>
    %275 = tpu.matmul %267, %29, %cst_98 {dimension_numbers = #tpu.dot_dimension_numbers<[1], [0], [0], [1], [0, 0, 1, 1], [], []>} : vector<8x32xf32>, vector<32x32xf32>, vector<8x32xf32> -> vector<8x32xf32>
    %276 = arith.addf %275, %39 : vector<8x32xf32>
    %277 = arith.addf %272, %268 : vector<8x32xf32>
    %278 = arith.negf %277 : vector<8x32xf32>
    %279 = math.exp %278 : vector<8x32xf32>
    %cst_99 = arith.constant 1.000000e+00 : f32
    %280 = vector.broadcast %cst_99 : f32 to vector<8x32xf32>
    %281 = arith.addf %280, %279 : vector<8x32xf32>
    %282 = arith.divf %280, %281 : vector<8x32xf32>
    %283 = arith.addf %274, %269 : vector<8x32xf32>
    %284 = arith.negf %283 : vector<8x32xf32>
    %285 = math.exp %284 : vector<8x32xf32>
    %cst_100 = arith.constant 1.000000e+00 : f32
    %286 = vector.broadcast %cst_100 : f32 to vector<8x32xf32>
    %287 = arith.addf %286, %285 : vector<8x32xf32>
    %288 = arith.divf %286, %287 : vector<8x32xf32>
    %289 = arith.addf %270, %22 : vector<8x32xf32>
    %290 = arith.mulf %282, %289 : vector<8x32xf32>
    %291 = arith.addf %276, %290 : vector<8x32xf32>
    %292 = math.tanh %291 : vector<8x32xf32>
    %cst_101 = arith.constant 1.000000e+00 : f32
    %293 = vector.broadcast %cst_101 : f32 to vector<8x32xf32>
    %294 = arith.subf %293, %288 : vector<8x32xf32>
    %295 = arith.mulf %294, %292 : vector<8x32xf32>
    %296 = arith.mulf %288, %233 : vector<8x32xf32>
    %297 = arith.addf %295, %296 : vector<8x32xf32>
    %298 = vector.shape_cast %297 : vector<8x32xf32> to vector<8x1x32xf32>
    %c0_102 = arith.constant 0 : index
    %c3_103 = arith.constant 3 : index
    %c0_104 = arith.constant 0 : index
    %299 = vector.load %arg9[%c0_102, %c3_103, %c0_104] : memref<8x8x32xf32, #tpu.memory_space<vmem>>, vector<8x1x32xf32>
    tpu.vector_store %arg9[%c0_102, %c3_103, %c0_104], %298 {strides = array<i32>} : memref<8x8x32xf32, #tpu.memory_space<vmem>>, vector<8x1x32xf32>,
    %c4 = arith.constant 4 : index
    %c0_105 = arith.constant 0 : index
    %c0_106 = arith.constant 0 : index
    %c0_107 = arith.constant 0 : index
    %300 = vector.load %arg1[%c4, %c0_105, %c0_106, %c0_107] : memref<8x3x8x32xf32, #tpu.memory_space<vmem>>, vector<1x3x8x32xf32>
    %301 = vector.shape_cast %300 : vector<1x3x8x32xf32> to vector<3x8x32xf32>
    %cst_108 = arith.constant dense<0.000000e+00> : vector<8x32xf32>
    %302 = tpu.matmul %267, %5, %cst_108 {dimension_numbers = #tpu.dot_dimension_numbers<[1], [0], [0], [1], [0, 0, 1, 1], [], []>} : vector<8x32xf32>, vector<32x32xf32>, vector<8x32xf32> -> vector<8x32xf32>
    %cst_109 = arith.constant dense<0.000000e+00> : vector<8x32xf32>
    %303 = tpu.matmul %267, %7, %cst_109 {dimension_numbers = #tpu.dot_dimension_numbers<[1], [0], [0], [1], [0, 0, 1, 1], [], []>} : vector<8x32xf32>, vector<32x32xf32>, vector<8x32xf32> -> vector<8x32xf32>
    %cst_110 = arith.constant dense<0.000000e+00> : vector<8x32xf32>
    %304 = tpu.matmul %267, %9, %cst_110 {dimension_numbers = #tpu.dot_dimension_numbers<[1], [0], [0], [1], [0, 0, 1, 1], [], []>} : vector<8x32xf32>, vector<32x32xf32>, vector<8x32xf32> -> vector<8x32xf32>
    %305 = vector.extract_strided_slice %301 {offsets = [0, 0, 0], sizes = [1, 8, 32], strides = [1, 1, 1]} : vector<3x8x32xf32> to vector<1x8x32xf32>
    %306 = vector.shape_cast %305 : vector<1x8x32xf32> to vector<8x32xf32>
    %307 = vector.extract_strided_slice %301 {offsets = [1, 0, 0], sizes = [1, 8, 32], strides = [1, 1, 1]} : vector<3x8x32xf32> to vector<1x8x32xf32>
    %308 = vector.shape_cast %307 : vector<1x8x32xf32> to vector<8x32xf32>
    %309 = vector.extract_strided_slice %301 {offsets = [2, 0, 0], sizes = [1, 8, 32], strides = [1, 1, 1]} : vector<3x8x32xf32> to vector<1x8x32xf32>
    %310 = vector.shape_cast %309 : vector<1x8x32xf32> to vector<8x32xf32>
    %311 = arith.addf %306, %302 : vector<8x32xf32>
    %312 = arith.negf %311 : vector<8x32xf32>
    %313 = math.exp %312 : vector<8x32xf32>
    %cst_111 = arith.constant 1.000000e+00 : f32
    %314 = vector.broadcast %cst_111 : f32 to vector<8x32xf32>
    %315 = arith.addf %314, %313 : vector<8x32xf32>
    %316 = arith.divf %314, %315 : vector<8x32xf32>
    %317 = arith.addf %308, %303 : vector<8x32xf32>
    %318 = arith.negf %317 : vector<8x32xf32>
    %319 = math.exp %318 : vector<8x32xf32>
    %cst_112 = arith.constant 1.000000e+00 : f32
    %320 = vector.broadcast %cst_112 : f32 to vector<8x32xf32>
    %321 = arith.addf %320, %319 : vector<8x32xf32>
    %322 = arith.divf %320, %321 : vector<8x32xf32>
    %323 = arith.addf %304, %12 : vector<8x32xf32>
    %324 = arith.mulf %316, %323 : vector<8x32xf32>
    %325 = arith.addf %310, %324 : vector<8x32xf32>
    %326 = math.tanh %325 : vector<8x32xf32>
    %cst_113 = arith.constant 1.000000e+00 : f32
    %327 = vector.broadcast %cst_113 : f32 to vector<8x32xf32>
    %328 = arith.subf %327, %322 : vector<8x32xf32>
    %329 = arith.mulf %328, %326 : vector<8x32xf32>
    %330 = arith.mulf %322, %267 : vector<8x32xf32>
    %331 = arith.addf %329, %330 : vector<8x32xf32>
    %cst_114 = arith.constant dense<0.000000e+00> : vector<8x32xf32>
    %332 = tpu.matmul %297, %15, %cst_114 {dimension_numbers = #tpu.dot_dimension_numbers<[1], [0], [0], [1], [0, 0, 1, 1], [], []>} : vector<8x32xf32>, vector<32x32xf32>, vector<8x32xf32> -> vector<8x32xf32>
    %cst_115 = arith.constant dense<0.000000e+00> : vector<8x32xf32>
    %333 = tpu.matmul %297, %17, %cst_115 {dimension_numbers = #tpu.dot_dimension_numbers<[1], [0], [0], [1], [0, 0, 1, 1], [], []>} : vector<8x32xf32>, vector<32x32xf32>, vector<8x32xf32> -> vector<8x32xf32>
    %cst_116 = arith.constant dense<0.000000e+00> : vector<8x32xf32>
    %334 = tpu.matmul %297, %19, %cst_116 {dimension_numbers = #tpu.dot_dimension_numbers<[1], [0], [0], [1], [0, 0, 1, 1], [], []>} : vector<8x32xf32>, vector<32x32xf32>, vector<8x32xf32> -> vector<8x32xf32>
    %cst_117 = arith.constant dense<0.000000e+00> : vector<8x32xf32>
    %335 = tpu.matmul %331, %25, %cst_117 {dimension_numbers = #tpu.dot_dimension_numbers<[1], [0], [0], [1], [0, 0, 1, 1], [], []>} : vector<8x32xf32>, vector<32x32xf32>, vector<8x32xf32> -> vector<8x32xf32>
    %336 = arith.addf %335, %33 : vector<8x32xf32>
    %cst_118 = arith.constant dense<0.000000e+00> : vector<8x32xf32>
    %337 = tpu.matmul %331, %27, %cst_118 {dimension_numbers = #tpu.dot_dimension_numbers<[1], [0], [0], [1], [0, 0, 1, 1], [], []>} : vector<8x32xf32>, vector<32x32xf32>, vector<8x32xf32> -> vector<8x32xf32>
    %338 = arith.addf %337, %36 : vector<8x32xf32>
    %cst_119 = arith.constant dense<0.000000e+00> : vector<8x32xf32>
    %339 = tpu.matmul %331, %29, %cst_119 {dimension_numbers = #tpu.dot_dimension_numbers<[1], [0], [0], [1], [0, 0, 1, 1], [], []>} : vector<8x32xf32>, vector<32x32xf32>, vector<8x32xf32> -> vector<8x32xf32>
    %340 = arith.addf %339, %39 : vector<8x32xf32>
    %341 = arith.addf %336, %332 : vector<8x32xf32>
    %342 = arith.negf %341 : vector<8x32xf32>
    %343 = math.exp %342 : vector<8x32xf32>
    %cst_120 = arith.constant 1.000000e+00 : f32
    %344 = vector.broadcast %cst_120 : f32 to vector<8x32xf32>
    %345 = arith.addf %344, %343 : vector<8x32xf32>
    %346 = arith.divf %344, %345 : vector<8x32xf32>
    %347 = arith.addf %338, %333 : vector<8x32xf32>
    %348 = arith.negf %347 : vector<8x32xf32>
    %349 = math.exp %348 : vector<8x32xf32>
    %cst_121 = arith.constant 1.000000e+00 : f32
    %350 = vector.broadcast %cst_121 : f32 to vector<8x32xf32>
    %351 = arith.addf %350, %349 : vector<8x32xf32>
    %352 = arith.divf %350, %351 : vector<8x32xf32>
    %353 = arith.addf %334, %22 : vector<8x32xf32>
    %354 = arith.mulf %346, %353 : vector<8x32xf32>
    %355 = arith.addf %340, %354 : vector<8x32xf32>
    %356 = math.tanh %355 : vector<8x32xf32>
    %cst_122 = arith.constant 1.000000e+00 : f32
    %357 = vector.broadcast %cst_122 : f32 to vector<8x32xf32>
    %358 = arith.subf %357, %352 : vector<8x32xf32>
    %359 = arith.mulf %358, %356 : vector<8x32xf32>
    %360 = arith.mulf %352, %297 : vector<8x32xf32>
    %361 = arith.addf %359, %360 : vector<8x32xf32>
    %362 = vector.shape_cast %361 : vector<8x32xf32> to vector<8x1x32xf32>
    %c0_123 = arith.constant 0 : index
    %c4_124 = arith.constant 4 : index
    %c0_125 = arith.constant 0 : index
    %363 = vector.load %arg9[%c0_123, %c4_124, %c0_125] : memref<8x8x32xf32, #tpu.memory_space<vmem>>, vector<8x1x32xf32>
    tpu.vector_store %arg9[%c0_123, %c4_124, %c0_125], %362 {strides = array<i32>} : memref<8x8x32xf32, #tpu.memory_space<vmem>>, vector<8x1x32xf32>,
    %c5 = arith.constant 5 : index
    %c0_126 = arith.constant 0 : index
    %c0_127 = arith.constant 0 : index
    %c0_128 = arith.constant 0 : index
    %364 = vector.load %arg1[%c5, %c0_126, %c0_127, %c0_128] : memref<8x3x8x32xf32, #tpu.memory_space<vmem>>, vector<1x3x8x32xf32>
    %365 = vector.shape_cast %364 : vector<1x3x8x32xf32> to vector<3x8x32xf32>
    %cst_129 = arith.constant dense<0.000000e+00> : vector<8x32xf32>
    %366 = tpu.matmul %331, %5, %cst_129 {dimension_numbers = #tpu.dot_dimension_numbers<[1], [0], [0], [1], [0, 0, 1, 1], [], []>} : vector<8x32xf32>, vector<32x32xf32>, vector<8x32xf32> -> vector<8x32xf32>
    %cst_130 = arith.constant dense<0.000000e+00> : vector<8x32xf32>
    %367 = tpu.matmul %331, %7, %cst_130 {dimension_numbers = #tpu.dot_dimension_numbers<[1], [0], [0], [1], [0, 0, 1, 1], [], []>} : vector<8x32xf32>, vector<32x32xf32>, vector<8x32xf32> -> vector<8x32xf32>
    %cst_131 = arith.constant dense<0.000000e+00> : vector<8x32xf32>
    %368 = tpu.matmul %331, %9, %cst_131 {dimension_numbers = #tpu.dot_dimension_numbers<[1], [0], [0], [1], [0, 0, 1, 1], [], []>} : vector<8x32xf32>, vector<32x32xf32>, vector<8x32xf32> -> vector<8x32xf32>
    %369 = vector.extract_strided_slice %365 {offsets = [0, 0, 0], sizes = [1, 8, 32], strides = [1, 1, 1]} : vector<3x8x32xf32> to vector<1x8x32xf32>
    %370 = vector.shape_cast %369 : vector<1x8x32xf32> to vector<8x32xf32>
    %371 = vector.extract_strided_slice %365 {offsets = [1, 0, 0], sizes = [1, 8, 32], strides = [1, 1, 1]} : vector<3x8x32xf32> to vector<1x8x32xf32>
    %372 = vector.shape_cast %371 : vector<1x8x32xf32> to vector<8x32xf32>
    %373 = vector.extract_strided_slice %365 {offsets = [2, 0, 0], sizes = [1, 8, 32], strides = [1, 1, 1]} : vector<3x8x32xf32> to vector<1x8x32xf32>
    %374 = vector.shape_cast %373 : vector<1x8x32xf32> to vector<8x32xf32>
    %375 = arith.addf %370, %366 : vector<8x32xf32>
    %376 = arith.negf %375 : vector<8x32xf32>
    %377 = math.exp %376 : vector<8x32xf32>
    %cst_132 = arith.constant 1.000000e+00 : f32
    %378 = vector.broadcast %cst_132 : f32 to vector<8x32xf32>
    %379 = arith.addf %378, %377 : vector<8x32xf32>
    %380 = arith.divf %378, %379 : vector<8x32xf32>
    %381 = arith.addf %372, %367 : vector<8x32xf32>
    %382 = arith.negf %381 : vector<8x32xf32>
    %383 = math.exp %382 : vector<8x32xf32>
    %cst_133 = arith.constant 1.000000e+00 : f32
    %384 = vector.broadcast %cst_133 : f32 to vector<8x32xf32>
    %385 = arith.addf %384, %383 : vector<8x32xf32>
    %386 = arith.divf %384, %385 : vector<8x32xf32>
    %387 = arith.addf %368, %12 : vector<8x32xf32>
    %388 = arith.mulf %380, %387 : vector<8x32xf32>
    %389 = arith.addf %374, %388 : vector<8x32xf32>
    %390 = math.tanh %389 : vector<8x32xf32>
    %cst_134 = arith.constant 1.000000e+00 : f32
    %391 = vector.broadcast %cst_134 : f32 to vector<8x32xf32>
    %392 = arith.subf %391, %386 : vector<8x32xf32>
    %393 = arith.mulf %392, %390 : vector<8x32xf32>
    %394 = arith.mulf %386, %331 : vector<8x32xf32>
    %395 = arith.addf %393, %394 : vector<8x32xf32>
    %cst_135 = arith.constant dense<0.000000e+00> : vector<8x32xf32>
    %396 = tpu.matmul %361, %15, %cst_135 {dimension_numbers = #tpu.dot_dimension_numbers<[1], [0], [0], [1], [0, 0, 1, 1], [], []>} : vector<8x32xf32>, vector<32x32xf32>, vector<8x32xf32> -> vector<8x32xf32>
    %cst_136 = arith.constant dense<0.000000e+00> : vector<8x32xf32>
    %397 = tpu.matmul %361, %17, %cst_136 {dimension_numbers = #tpu.dot_dimension_numbers<[1], [0], [0], [1], [0, 0, 1, 1], [], []>} : vector<8x32xf32>, vector<32x32xf32>, vector<8x32xf32> -> vector<8x32xf32>
    %cst_137 = arith.constant dense<0.000000e+00> : vector<8x32xf32>
    %398 = tpu.matmul %361, %19, %cst_137 {dimension_numbers = #tpu.dot_dimension_numbers<[1], [0], [0], [1], [0, 0, 1, 1], [], []>} : vector<8x32xf32>, vector<32x32xf32>, vector<8x32xf32> -> vector<8x32xf32>
    %cst_138 = arith.constant dense<0.000000e+00> : vector<8x32xf32>
    %399 = tpu.matmul %395, %25, %cst_138 {dimension_numbers = #tpu.dot_dimension_numbers<[1], [0], [0], [1], [0, 0, 1, 1], [], []>} : vector<8x32xf32>, vector<32x32xf32>, vector<8x32xf32> -> vector<8x32xf32>
    %400 = arith.addf %399, %33 : vector<8x32xf32>
    %cst_139 = arith.constant dense<0.000000e+00> : vector<8x32xf32>
    %401 = tpu.matmul %395, %27, %cst_139 {dimension_numbers = #tpu.dot_dimension_numbers<[1], [0], [0], [1], [0, 0, 1, 1], [], []>} : vector<8x32xf32>, vector<32x32xf32>, vector<8x32xf32> -> vector<8x32xf32>
    %402 = arith.addf %401, %36 : vector<8x32xf32>
    %cst_140 = arith.constant dense<0.000000e+00> : vector<8x32xf32>
    %403 = tpu.matmul %395, %29, %cst_140 {dimension_numbers = #tpu.dot_dimension_numbers<[1], [0], [0], [1], [0, 0, 1, 1], [], []>} : vector<8x32xf32>, vector<32x32xf32>, vector<8x32xf32> -> vector<8x32xf32>
    %404 = arith.addf %403, %39 : vector<8x32xf32>
    %405 = arith.addf %400, %396 : vector<8x32xf32>
    %406 = arith.negf %405 : vector<8x32xf32>
    %407 = math.exp %406 : vector<8x32xf32>
    %cst_141 = arith.constant 1.000000e+00 : f32
    %408 = vector.broadcast %cst_141 : f32 to vector<8x32xf32>
    %409 = arith.addf %408, %407 : vector<8x32xf32>
    %410 = arith.divf %408, %409 : vector<8x32xf32>
    %411 = arith.addf %402, %397 : vector<8x32xf32>
    %412 = arith.negf %411 : vector<8x32xf32>
    %413 = math.exp %412 : vector<8x32xf32>
    %cst_142 = arith.constant 1.000000e+00 : f32
    %414 = vector.broadcast %cst_142 : f32 to vector<8x32xf32>
    %415 = arith.addf %414, %413 : vector<8x32xf32>
    %416 = arith.divf %414, %415 : vector<8x32xf32>
    %417 = arith.addf %398, %22 : vector<8x32xf32>
    %418 = arith.mulf %410, %417 : vector<8x32xf32>
    %419 = arith.addf %404, %418 : vector<8x32xf32>
    %420 = math.tanh %419 : vector<8x32xf32>
    %cst_143 = arith.constant 1.000000e+00 : f32
    %421 = vector.broadcast %cst_143 : f32 to vector<8x32xf32>
    %422 = arith.subf %421, %416 : vector<8x32xf32>
    %423 = arith.mulf %422, %420 : vector<8x32xf32>
    %424 = arith.mulf %416, %361 : vector<8x32xf32>
    %425 = arith.addf %423, %424 : vector<8x32xf32>
    %426 = vector.shape_cast %425 : vector<8x32xf32> to vector<8x1x32xf32>
    %c0_144 = arith.constant 0 : index
    %c5_145 = arith.constant 5 : index
    %c0_146 = arith.constant 0 : index
    %427 = vector.load %arg9[%c0_144, %c5_145, %c0_146] : memref<8x8x32xf32, #tpu.memory_space<vmem>>, vector<8x1x32xf32>
    tpu.vector_store %arg9[%c0_144, %c5_145, %c0_146], %426 {strides = array<i32>} : memref<8x8x32xf32, #tpu.memory_space<vmem>>, vector<8x1x32xf32>,
    %c6 = arith.constant 6 : index
    %c0_147 = arith.constant 0 : index
    %c0_148 = arith.constant 0 : index
    %c0_149 = arith.constant 0 : index
    %428 = vector.load %arg1[%c6, %c0_147, %c0_148, %c0_149] : memref<8x3x8x32xf32, #tpu.memory_space<vmem>>, vector<1x3x8x32xf32>
    %429 = vector.shape_cast %428 : vector<1x3x8x32xf32> to vector<3x8x32xf32>
    %cst_150 = arith.constant dense<0.000000e+00> : vector<8x32xf32>
    %430 = tpu.matmul %395, %5, %cst_150 {dimension_numbers = #tpu.dot_dimension_numbers<[1], [0], [0], [1], [0, 0, 1, 1], [], []>} : vector<8x32xf32>, vector<32x32xf32>, vector<8x32xf32> -> vector<8x32xf32>
    %cst_151 = arith.constant dense<0.000000e+00> : vector<8x32xf32>
    %431 = tpu.matmul %395, %7, %cst_151 {dimension_numbers = #tpu.dot_dimension_numbers<[1], [0], [0], [1], [0, 0, 1, 1], [], []>} : vector<8x32xf32>, vector<32x32xf32>, vector<8x32xf32> -> vector<8x32xf32>
    %cst_152 = arith.constant dense<0.000000e+00> : vector<8x32xf32>
    %432 = tpu.matmul %395, %9, %cst_152 {dimension_numbers = #tpu.dot_dimension_numbers<[1], [0], [0], [1], [0, 0, 1, 1], [], []>} : vector<8x32xf32>, vector<32x32xf32>, vector<8x32xf32> -> vector<8x32xf32>
    %433 = vector.extract_strided_slice %429 {offsets = [0, 0, 0], sizes = [1, 8, 32], strides = [1, 1, 1]} : vector<3x8x32xf32> to vector<1x8x32xf32>
    %434 = vector.shape_cast %433 : vector<1x8x32xf32> to vector<8x32xf32>
    %435 = vector.extract_strided_slice %429 {offsets = [1, 0, 0], sizes = [1, 8, 32], strides = [1, 1, 1]} : vector<3x8x32xf32> to vector<1x8x32xf32>
    %436 = vector.shape_cast %435 : vector<1x8x32xf32> to vector<8x32xf32>
    %437 = vector.extract_strided_slice %429 {offsets = [2, 0, 0], sizes = [1, 8, 32], strides = [1, 1, 1]} : vector<3x8x32xf32> to vector<1x8x32xf32>
    %438 = vector.shape_cast %437 : vector<1x8x32xf32> to vector<8x32xf32>
    %439 = arith.addf %434, %430 : vector<8x32xf32>
    %440 = arith.negf %439 : vector<8x32xf32>
    %441 = math.exp %440 : vector<8x32xf32>
    %cst_153 = arith.constant 1.000000e+00 : f32
    %442 = vector.broadcast %cst_153 : f32 to vector<8x32xf32>
    %443 = arith.addf %442, %441 : vector<8x32xf32>
    %444 = arith.divf %442, %443 : vector<8x32xf32>
    %445 = arith.addf %436, %431 : vector<8x32xf32>
    %446 = arith.negf %445 : vector<8x32xf32>
    %447 = math.exp %446 : vector<8x32xf32>
    %cst_154 = arith.constant 1.000000e+00 : f32
    %448 = vector.broadcast %cst_154 : f32 to vector<8x32xf32>
    %449 = arith.addf %448, %447 : vector<8x32xf32>
    %450 = arith.divf %448, %449 : vector<8x32xf32>
    %451 = arith.addf %432, %12 : vector<8x32xf32>
    %452 = arith.mulf %444, %451 : vector<8x32xf32>
    %453 = arith.addf %438, %452 : vector<8x32xf32>
    %454 = math.tanh %453 : vector<8x32xf32>
    %cst_155 = arith.constant 1.000000e+00 : f32
    %455 = vector.broadcast %cst_155 : f32 to vector<8x32xf32>
    %456 = arith.subf %455, %450 : vector<8x32xf32>
    %457 = arith.mulf %456, %454 : vector<8x32xf32>
    %458 = arith.mulf %450, %395 : vector<8x32xf32>
    %459 = arith.addf %457, %458 : vector<8x32xf32>
    %cst_156 = arith.constant dense<0.000000e+00> : vector<8x32xf32>
    %460 = tpu.matmul %425, %15, %cst_156 {dimension_numbers = #tpu.dot_dimension_numbers<[1], [0], [0], [1], [0, 0, 1, 1], [], []>} : vector<8x32xf32>, vector<32x32xf32>, vector<8x32xf32> -> vector<8x32xf32>
    %cst_157 = arith.constant dense<0.000000e+00> : vector<8x32xf32>
    %461 = tpu.matmul %425, %17, %cst_157 {dimension_numbers = #tpu.dot_dimension_numbers<[1], [0], [0], [1], [0, 0, 1, 1], [], []>} : vector<8x32xf32>, vector<32x32xf32>, vector<8x32xf32> -> vector<8x32xf32>
    %cst_158 = arith.constant dense<0.000000e+00> : vector<8x32xf32>
    %462 = tpu.matmul %425, %19, %cst_158 {dimension_numbers = #tpu.dot_dimension_numbers<[1], [0], [0], [1], [0, 0, 1, 1], [], []>} : vector<8x32xf32>, vector<32x32xf32>, vector<8x32xf32> -> vector<8x32xf32>
    %cst_159 = arith.constant dense<0.000000e+00> : vector<8x32xf32>
    %463 = tpu.matmul %459, %25, %cst_159 {dimension_numbers = #tpu.dot_dimension_numbers<[1], [0], [0], [1], [0, 0, 1, 1], [], []>} : vector<8x32xf32>, vector<32x32xf32>, vector<8x32xf32> -> vector<8x32xf32>
    %464 = arith.addf %463, %33 : vector<8x32xf32>
    %cst_160 = arith.constant dense<0.000000e+00> : vector<8x32xf32>
    %465 = tpu.matmul %459, %27, %cst_160 {dimension_numbers = #tpu.dot_dimension_numbers<[1], [0], [0], [1], [0, 0, 1, 1], [], []>} : vector<8x32xf32>, vector<32x32xf32>, vector<8x32xf32> -> vector<8x32xf32>
    %466 = arith.addf %465, %36 : vector<8x32xf32>
    %cst_161 = arith.constant dense<0.000000e+00> : vector<8x32xf32>
    %467 = tpu.matmul %459, %29, %cst_161 {dimension_numbers = #tpu.dot_dimension_numbers<[1], [0], [0], [1], [0, 0, 1, 1], [], []>} : vector<8x32xf32>, vector<32x32xf32>, vector<8x32xf32> -> vector<8x32xf32>
    %468 = arith.addf %467, %39 : vector<8x32xf32>
    %469 = arith.addf %464, %460 : vector<8x32xf32>
    %470 = arith.negf %469 : vector<8x32xf32>
    %471 = math.exp %470 : vector<8x32xf32>
    %cst_162 = arith.constant 1.000000e+00 : f32
    %472 = vector.broadcast %cst_162 : f32 to vector<8x32xf32>
    %473 = arith.addf %472, %471 : vector<8x32xf32>
    %474 = arith.divf %472, %473 : vector<8x32xf32>
    %475 = arith.addf %466, %461 : vector<8x32xf32>
    %476 = arith.negf %475 : vector<8x32xf32>
    %477 = math.exp %476 : vector<8x32xf32>
    %cst_163 = arith.constant 1.000000e+00 : f32
    %478 = vector.broadcast %cst_163 : f32 to vector<8x32xf32>
    %479 = arith.addf %478, %477 : vector<8x32xf32>
    %480 = arith.divf %478, %479 : vector<8x32xf32>
    %481 = arith.addf %462, %22 : vector<8x32xf32>
    %482 = arith.mulf %474, %481 : vector<8x32xf32>
    %483 = arith.addf %468, %482 : vector<8x32xf32>
    %484 = math.tanh %483 : vector<8x32xf32>
    %cst_164 = arith.constant 1.000000e+00 : f32
    %485 = vector.broadcast %cst_164 : f32 to vector<8x32xf32>
    %486 = arith.subf %485, %480 : vector<8x32xf32>
    %487 = arith.mulf %486, %484 : vector<8x32xf32>
    %488 = arith.mulf %480, %425 : vector<8x32xf32>
    %489 = arith.addf %487, %488 : vector<8x32xf32>
    %490 = vector.shape_cast %489 : vector<8x32xf32> to vector<8x1x32xf32>
    %c0_165 = arith.constant 0 : index
    %c6_166 = arith.constant 6 : index
    %c0_167 = arith.constant 0 : index
    %491 = vector.load %arg9[%c0_165, %c6_166, %c0_167] : memref<8x8x32xf32, #tpu.memory_space<vmem>>, vector<8x1x32xf32>
    tpu.vector_store %arg9[%c0_165, %c6_166, %c0_167], %490 {strides = array<i32>} : memref<8x8x32xf32, #tpu.memory_space<vmem>>, vector<8x1x32xf32>,
    %c7 = arith.constant 7 : index
    %c0_168 = arith.constant 0 : index
    %c0_169 = arith.constant 0 : index
    %c0_170 = arith.constant 0 : index
    %492 = vector.load %arg1[%c7, %c0_168, %c0_169, %c0_170] : memref<8x3x8x32xf32, #tpu.memory_space<vmem>>, vector<1x3x8x32xf32>
    %493 = vector.shape_cast %492 : vector<1x3x8x32xf32> to vector<3x8x32xf32>
    %cst_171 = arith.constant dense<0.000000e+00> : vector<8x32xf32>
    %494 = tpu.matmul %459, %5, %cst_171 {dimension_numbers = #tpu.dot_dimension_numbers<[1], [0], [0], [1], [0, 0, 1, 1], [], []>} : vector<8x32xf32>, vector<32x32xf32>, vector<8x32xf32> -> vector<8x32xf32>
    %cst_172 = arith.constant dense<0.000000e+00> : vector<8x32xf32>
    %495 = tpu.matmul %459, %7, %cst_172 {dimension_numbers = #tpu.dot_dimension_numbers<[1], [0], [0], [1], [0, 0, 1, 1], [], []>} : vector<8x32xf32>, vector<32x32xf32>, vector<8x32xf32> -> vector<8x32xf32>
    %cst_173 = arith.constant dense<0.000000e+00> : vector<8x32xf32>
    %496 = tpu.matmul %459, %9, %cst_173 {dimension_numbers = #tpu.dot_dimension_numbers<[1], [0], [0], [1], [0, 0, 1, 1], [], []>} : vector<8x32xf32>, vector<32x32xf32>, vector<8x32xf32> -> vector<8x32xf32>
    %497 = vector.extract_strided_slice %493 {offsets = [0, 0, 0], sizes = [1, 8, 32], strides = [1, 1, 1]} : vector<3x8x32xf32> to vector<1x8x32xf32>
    %498 = vector.shape_cast %497 : vector<1x8x32xf32> to vector<8x32xf32>
    %499 = vector.extract_strided_slice %493 {offsets = [1, 0, 0], sizes = [1, 8, 32], strides = [1, 1, 1]} : vector<3x8x32xf32> to vector<1x8x32xf32>
    %500 = vector.shape_cast %499 : vector<1x8x32xf32> to vector<8x32xf32>
    %501 = vector.extract_strided_slice %493 {offsets = [2, 0, 0], sizes = [1, 8, 32], strides = [1, 1, 1]} : vector<3x8x32xf32> to vector<1x8x32xf32>
    %502 = vector.shape_cast %501 : vector<1x8x32xf32> to vector<8x32xf32>
    %503 = arith.addf %498, %494 : vector<8x32xf32>
    %504 = arith.negf %503 : vector<8x32xf32>
    %505 = math.exp %504 : vector<8x32xf32>
    %cst_174 = arith.constant 1.000000e+00 : f32
    %506 = vector.broadcast %cst_174 : f32 to vector<8x32xf32>
    %507 = arith.addf %506, %505 : vector<8x32xf32>
    %508 = arith.divf %506, %507 : vector<8x32xf32>
    %509 = arith.addf %500, %495 : vector<8x32xf32>
    %510 = arith.negf %509 : vector<8x32xf32>
    %511 = math.exp %510 : vector<8x32xf32>
    %cst_175 = arith.constant 1.000000e+00 : f32
    %512 = vector.broadcast %cst_175 : f32 to vector<8x32xf32>
    %513 = arith.addf %512, %511 : vector<8x32xf32>
    %514 = arith.divf %512, %513 : vector<8x32xf32>
    %515 = arith.addf %496, %12 : vector<8x32xf32>
    %516 = arith.mulf %508, %515 : vector<8x32xf32>
    %517 = arith.addf %502, %516 : vector<8x32xf32>
    %518 = math.tanh %517 : vector<8x32xf32>
    %cst_176 = arith.constant 1.000000e+00 : f32
    %519 = vector.broadcast %cst_176 : f32 to vector<8x32xf32>
    %520 = arith.subf %519, %514 : vector<8x32xf32>
    %521 = arith.mulf %520, %518 : vector<8x32xf32>
    %522 = arith.mulf %514, %459 : vector<8x32xf32>
    %523 = arith.addf %521, %522 : vector<8x32xf32>
    %cst_177 = arith.constant dense<0.000000e+00> : vector<8x32xf32>
    %524 = tpu.matmul %489, %15, %cst_177 {dimension_numbers = #tpu.dot_dimension_numbers<[1], [0], [0], [1], [0, 0, 1, 1], [], []>} : vector<8x32xf32>, vector<32x32xf32>, vector<8x32xf32> -> vector<8x32xf32>
    %cst_178 = arith.constant dense<0.000000e+00> : vector<8x32xf32>
    %525 = tpu.matmul %489, %17, %cst_178 {dimension_numbers = #tpu.dot_dimension_numbers<[1], [0], [0], [1], [0, 0, 1, 1], [], []>} : vector<8x32xf32>, vector<32x32xf32>, vector<8x32xf32> -> vector<8x32xf32>
    %cst_179 = arith.constant dense<0.000000e+00> : vector<8x32xf32>
    %526 = tpu.matmul %489, %19, %cst_179 {dimension_numbers = #tpu.dot_dimension_numbers<[1], [0], [0], [1], [0, 0, 1, 1], [], []>} : vector<8x32xf32>, vector<32x32xf32>, vector<8x32xf32> -> vector<8x32xf32>
    %cst_180 = arith.constant dense<0.000000e+00> : vector<8x32xf32>
    %527 = tpu.matmul %523, %25, %cst_180 {dimension_numbers = #tpu.dot_dimension_numbers<[1], [0], [0], [1], [0, 0, 1, 1], [], []>} : vector<8x32xf32>, vector<32x32xf32>, vector<8x32xf32> -> vector<8x32xf32>
    %528 = arith.addf %527, %33 : vector<8x32xf32>
    %cst_181 = arith.constant dense<0.000000e+00> : vector<8x32xf32>
    %529 = tpu.matmul %523, %27, %cst_181 {dimension_numbers = #tpu.dot_dimension_numbers<[1], [0], [0], [1], [0, 0, 1, 1], [], []>} : vector<8x32xf32>, vector<32x32xf32>, vector<8x32xf32> -> vector<8x32xf32>
    %530 = arith.addf %529, %36 : vector<8x32xf32>
    %cst_182 = arith.constant dense<0.000000e+00> : vector<8x32xf32>
    %531 = tpu.matmul %523, %29, %cst_182 {dimension_numbers = #tpu.dot_dimension_numbers<[1], [0], [0], [1], [0, 0, 1, 1], [], []>} : vector<8x32xf32>, vector<32x32xf32>, vector<8x32xf32> -> vector<8x32xf32>
    %532 = arith.addf %531, %39 : vector<8x32xf32>
    %533 = arith.addf %528, %524 : vector<8x32xf32>
    %534 = arith.negf %533 : vector<8x32xf32>
    %535 = math.exp %534 : vector<8x32xf32>
    %cst_183 = arith.constant 1.000000e+00 : f32
    %536 = vector.broadcast %cst_183 : f32 to vector<8x32xf32>
    %537 = arith.addf %536, %535 : vector<8x32xf32>
    %538 = arith.divf %536, %537 : vector<8x32xf32>
    %539 = arith.addf %530, %525 : vector<8x32xf32>
    %540 = arith.negf %539 : vector<8x32xf32>
    %541 = math.exp %540 : vector<8x32xf32>
    %cst_184 = arith.constant 1.000000e+00 : f32
    %542 = vector.broadcast %cst_184 : f32 to vector<8x32xf32>
    %543 = arith.addf %542, %541 : vector<8x32xf32>
    %544 = arith.divf %542, %543 : vector<8x32xf32>
    %545 = arith.addf %526, %22 : vector<8x32xf32>
    %546 = arith.mulf %538, %545 : vector<8x32xf32>
    %547 = arith.addf %532, %546 : vector<8x32xf32>
    %548 = math.tanh %547 : vector<8x32xf32>
    %cst_185 = arith.constant 1.000000e+00 : f32
    %549 = vector.broadcast %cst_185 : f32 to vector<8x32xf32>
    %550 = arith.subf %549, %544 : vector<8x32xf32>
    %551 = arith.mulf %550, %548 : vector<8x32xf32>
    %552 = arith.mulf %544, %489 : vector<8x32xf32>
    %553 = arith.addf %551, %552 : vector<8x32xf32>
    %554 = vector.shape_cast %553 : vector<8x32xf32> to vector<8x1x32xf32>
    %c0_186 = arith.constant 0 : index
    %c7_187 = arith.constant 7 : index
    %c0_188 = arith.constant 0 : index
    %555 = vector.load %arg9[%c0_186, %c7_187, %c0_188] : memref<8x8x32xf32, #tpu.memory_space<vmem>>, vector<8x1x32xf32>
    tpu.vector_store %arg9[%c0_186, %c7_187, %c0_188], %554 {strides = array<i32>} : memref<8x8x32xf32, #tpu.memory_space<vmem>>, vector<8x1x32xf32>,
    %c0_189 = arith.constant 0 : index
    %c0_190 = arith.constant 0 : index
    %c0_191 = arith.constant 0 : index
    %556 = vector.load %arg11[%c0_189, %c0_190, %c0_191] : memref<2x8x32xf32, #tpu.memory_space<vmem>>, vector<1x8x32xf32>
    %557 = vector.shape_cast %556 : vector<1x8x32xf32> to vector<8x32xf32>
    %558 = vector.shape_cast %523 : vector<8x32xf32> to vector<1x8x32xf32>
    tpu.vector_store %arg11[%c0_189, %c0_190, %c0_191], %558 {strides = array<i32>} : memref<2x8x32xf32, #tpu.memory_space<vmem>>, vector<1x8x32xf32>,
    %c1_192 = arith.constant 1 : index
    %c0_193 = arith.constant 0 : index
    %c0_194 = arith.constant 0 : index
    %559 = vector.load %arg11[%c1_192, %c0_193, %c0_194] : memref<2x8x32xf32, #tpu.memory_space<vmem>>, vector<1x8x32xf32>
    %560 = vector.shape_cast %559 : vector<1x8x32xf32> to vector<8x32xf32>
    %561 = vector.shape_cast %553 : vector<8x32xf32> to vector<1x8x32xf32>
    tpu.vector_store %arg11[%c1_192, %c0_193, %c0_194], %561 {strides = array<i32>} : memref<2x8x32xf32, #tpu.memory_space<vmem>>, vector<1x8x32xf32>,
    %c0_i32_195 = arith.constant 0 : i32
    %562 = arith.cmpi eq, %arg0, %c0_i32_195 : i32
    %563 = arith.extui %562 : i1 to i32
    %c0_i32_196 = arith.constant 0 : i32
    %564 = arith.cmpi ne, %563, %c0_i32_196 : i32
    scf.if %564 {
      %c0_197 = arith.constant 0 : index
      %c0_198 = arith.constant 0 : index
      %c0_199 = arith.constant 0 : index
      %565 = vector.load %arg11[%c0_197, %c0_198, %c0_199] : memref<2x8x32xf32, #tpu.memory_space<vmem>>, vector<2x8x32xf32>
      %c0_200 = arith.constant 0 : index
      %c0_201 = arith.constant 0 : index
      %c0_202 = arith.constant 0 : index
      %566 = vector.load %arg10[%c0_200, %c0_201, %c0_202] : memref<2x8x32xf32, #tpu.memory_space<vmem>>, vector<2x8x32xf32>
      tpu.vector_store %arg10[%c0_200, %c0_201, %c0_202], %565 {strides = array<i32>} : memref<2x8x32xf32, #tpu.memory_space<vmem>>, vector<2x8x32xf32>,
    } else {
    }
    return
  }
  func.func @transform_0(%arg0: i32) -> (i32, i32, i32, i32) {
    %c0_i32 = arith.constant 0 : i32
    %c0_i32_0 = arith.constant 0 : i32
    %c0_i32_1 = arith.constant 0 : i32
    %c0_i32_2 = arith.constant 0 : i32
    return %arg0, %c0_i32, %c0_i32_0, %c0_i32_1 : i32, i32, i32, i32
  }
  func.func @transform_1(%arg0: i32) -> (i32, i32, i32) {
    %c0_i32 = arith.constant 0 : i32
    %c0_i32_0 = arith.constant 0 : i32
    %c0_i32_1 = arith.constant 0 : i32
    %c0_i32_2 = arith.constant 0 : i32
    return %c0_i32, %c0_i32_0, %c0_i32_1 : i32, i32, i32
  }
  func.func @transform_2(%arg0: i32) -> (i32, i32, i32) {
    %c0_i32 = arith.constant 0 : i32
    %c0_i32_0 = arith.constant 0 : i32
    %c0_i32_1 = arith.constant 0 : i32
    %c0_i32_2 = arith.constant 0 : i32
    return %c0_i32, %c0_i32_0, %c0_i32_1 : i32, i32, i32
  }
  func.func @transform_3(%arg0: i32) -> (i32, i32) {
    %c0_i32 = arith.constant 0 : i32
    %c0_i32_0 = arith.constant 0 : i32
    %c0_i32_1 = arith.constant 0 : i32
    return %c0_i32, %c0_i32_0 : i32, i32
  }
  func.func @transform_4(%arg0: i32) -> (i32, i32, i32) {
    %c0_i32 = arith.constant 0 : i32
    %c0_i32_0 = arith.constant 0 : i32
    %c0_i32_1 = arith.constant 0 : i32
    %c0_i32_2 = arith.constant 0 : i32
    return %c0_i32, %c0_i32_0, %c0_i32_1 : i32, i32, i32
  }
  func.func @transform_5(%arg0: i32) -> (i32, i32) {
    %c0_i32 = arith.constant 0 : i32
    %c0_i32_0 = arith.constant 0 : i32
    %c0_i32_1 = arith.constant 0 : i32
    return %c0_i32, %c0_i32_0 : i32, i32
  }
  func.func @transform_6(%arg0: i32) -> (i32, i32, i32) {
    %c0_i32 = arith.constant 0 : i32
    %c0_i32_0 = arith.constant 0 : i32
    %c0_i32_1 = arith.constant 0 : i32
    %c0_i32_2 = arith.constant 0 : i32
    return %c0_i32, %c0_i32_0, %c0_i32_1 : i32, i32, i32
  }
  func.func @transform_7(%arg0: i32) -> (i32, i32) {
    %c0_i32 = arith.constant 0 : i32
    %c0_i32_0 = arith.constant 0 : i32
    %c0_i32_1 = arith.constant 0 : i32
    return %c0_i32, %c0_i32_0 : i32, i32
  }
  func.func @transform_8(%arg0: i32) -> (i32, i32, i32) {
    %c0_i32 = arith.constant 0 : i32
    %c0_i32_0 = arith.constant 0 : i32
    %c0_i32_1 = arith.constant 0 : i32
    return %c0_i32, %arg0, %c0_i32_0 : i32, i32, i32
  }
  func.func @transform_9(%arg0: i32) -> (i32, i32, i32) {
    %c0_i32 = arith.constant 0 : i32
    %c0_i32_0 = arith.constant 0 : i32
    %c0_i32_1 = arith.constant 0 : i32
    %c0_i32_2 = arith.constant 0 : i32
    return %c0_i32, %c0_i32_0, %c0_i32_1 : i32, i32, i32
  }
}

</mosaic_0001>

<bundles_post_ra>
// kernel: tpu_custom_call.1
= control target key start
LH: loop header
LB: loop body
LE: loop exit
PB: predicated region body
PF: predicated region fallthrough
CT: control target
= control target key end

     0   :  { %15 = vsyncpa [#allocation4], 0  ;;  %s4262_s0 = inlined_call_operand.hbm [shape: f32[8,3,8,32], index: 0, kind: input, shape index: {}]   ;;  %s4263_s1 = inlined_call_operand.hbm [shape: f32[2,8,32], index: 1, kind: input, shape index: {}]   ;;  %s4264_s2 = inlined_call_operand.hbm [shape: f32[3,32,32], index: 2, kind: input, shape index: {}]   ;;  %s4265_s3 = inlined_call_operand.vmem [shape: f32[1,32], index: 3, kind: input, shape index: {}]   ;;  %s4266_s4 = inlined_call_operand.hbm [shape: f32[3,32,32], index: 4, kind: input, shape index: {}]   ;;  %s4267_s5 = inlined_call_operand.vmem [shape: f32[1,96], index: 5, kind: input, shape index: {}]   ;;  %s4268_s6 = inlined_call_operand.hbm [shape: f32[3,32,32], index: 6, kind: input, shape index: {}]   ;;  %s4269_s7 = inlined_call_operand.vmem [shape: f32[1,32], index: 7, kind: input, shape index: {}]   ;;  %s4270_s8 = inlined_call_operand.hbm [shape: f32[8,8,32], index: 8, kind: output, shape index: {0}]   ;;  %s4271_s9 = inlined_call_operand.hbm [shape: f32[2,8,32], index: 9, kind: output, shape index: {1}]  }
   0x1   :  { %16 = vsyncpa [#allocation7], 0 }
   0x2   :  { %17 = vsyncpa [#allocation10], 0 }
   0x3   :  { %18 = vsyncpa [#allocation5], 0 }
   0x4   :  { %19 = vsyncpa [#allocation14], 0  ;;  %s37_s11 = sshll.u32 %s4263_s1, 4  ;;  %s3212_s12 = smov [#allocation6]   ;;  %s38_s11 = int_to_ptr.hbm [resolvable:$true] %s37_s11 }
   0x5   :  { %s39_s13 = sshll.u32 %s3212_s12, 4  ;;  %s65_s16 = sshll.u32 %s4266_s4, 4  ;;  %s40_s13 = int_to_ptr.vmem [resolvable:$true] %s39_s13  ;;  %s66_s16 = int_to_ptr.hbm [resolvable:$true] %s65_s16 }
   0x6   :  { %s3213_s17 = smov 128   ;;  %s3214_s18 = smov 8  }
   0x7   :  { %45 = dma.hbm_to_vmem [thread:$0]  %s38_s11, 256, %s40_s13, [#allocation7], %s3213_s17, %s3213_s17, %s3214_s18  }
   0x8   :  { %s3215_s19 = smov [#allocation9]   ;;  %s24_s1 = sshll.u32 %s4262_s0, 4  ;;  %s25_s1 = int_to_ptr.hbm [resolvable:$true] %s24_s1 }
   0x9   :  { %s67_s20 = sshll.u32 %s3215_s19, 4  ;;  %s50_s24 = sshll.u32 %s4264_s2, 4  ;;  %s68_s20 = int_to_ptr.vmem [resolvable:$true] %s67_s20  ;;  %s51_s24 = int_to_ptr.hbm [resolvable:$true] %s50_s24 }
   0xa   :  { %73 = dma.hbm_to_vmem [thread:$0]  %s66_s16, 1536, %s68_s20, [#allocation10], %s3213_s17, %s3213_s17, %s3214_s18  }
   0xb   :  { %s3216_s25 = smov [#allocation3]   ;;  %s3217_s27 = smov [#allocation8]  }
   0xc   :  { %s26_s26 = sshll.u32 %s3216_s25, 4  ;;  %s52_s0 = sshll.u32 %s3217_s27, 4  ;;  %s27_s26 = int_to_ptr.vmem [resolvable:$true] %s26_s26  ;;  %s53_s0 = int_to_ptr.vmem [resolvable:$true] %s52_s0 }
   0xd   :  { %32 = dma.hbm_to_vmem [thread:$0]  %s25_s1, 3072, %s27_s26, [#allocation4], %s3213_s17, %s3213_s17, %s3214_s18  }
   0xe   :  { %s80_s30 = sshll.u32 %s4268_s6, 4  ;;  %s3218_s2 = smov [#allocation11]   ;;  %s81_s30 = int_to_ptr.hbm [resolvable:$true] %s80_s30 }
   0xf   :  { %58 = dma.hbm_to_vmem [thread:$0]  %s51_s24, 1536, %s53_s0, [#allocation7], %s3213_s17, %s3213_s17, %s3214_s18  }
  0x10   :  { %s82_s10 = sshll.u32 %s3218_s2, 4  ;;  %s83_s10 = int_to_ptr.vmem [resolvable:$true] %s82_s10 }
  0x11   :  { %88 = dma.hbm_to_vmem [thread:$0]  %s81_s30, 1536, %s83_s10, [#allocation10], %s3213_s17, %s3213_s17, %s3214_s18  }
  0x12   :  { %3202 = dma.done.wait [#allocation4], 3072  }
  0x13   :  { %3203 = vsyncadd [#allocation4], 4294964224 }
  0x14   :  { %3204 = dma.done.wait [#allocation7], 1792  }
  0x15   :  { %3205 = vsyncadd [#allocation7], 4294965504 }
  0x16   :  { %3206 = dma.done.wait [#allocation10], 3072  }
  0x17   :  { %3207 = vsyncadd [#allocation10], 4294964224  ;;  %v3303_v0 = vld [vmem:[#allocation8 + $0x18] sm:$0xff]  ;;  %v3307_v2 = vld [vmem:[#allocation8 + $0x10] sm:$0xff]  ;;  %vm117_vm0 = vcmask 261120   ;;  %s3219_s14 = smov 96  }
  0x18   :  { %v3305_v1 = vld [vmem:[#allocation8 + $0x38] sm:$0xff]  ;;  %190 = vmatpush.msra.mxu0 %v3303_v0  ;;  %v3311_v3 = vld [vmem:[#allocation8 + $0x30] sm:$0xff]  ;;  %v3313_v4 = vld [vmem:[#allocation8 + $0x8] sm:$0xff]  ;;  %s3220_s15 = smov 64   ;;  %s2645_s30 = sshll.u32 %s4270_s8, 4  ;;  %s2646_s30 = int_to_ptr.hbm [resolvable:$true] %s2645_s30 }
  0x19   :  { %210 = vmatpush.msra.mxu1 %v3305_v1  ;;  %4292 = vst [vmem:[#allocation20_spill] sm:$0xff] %v3313_v4  ;;  %v3315_v5 = vld [vmem:[#allocation8 + $0x28] sm:$0xff]  ;;  %v115_v6 = vld [vmem:[#allocation6] sm:$0xff]  ;;  %v3320_v7 = vld [vmem:[#allocation8 + $0x58] sm:$0xff]  ;;  %s3222_s2 = smov [#allocation13]   ;;  %s2658_s12 = sshll.u32 %s4271_s9, 4  ;;  %s2659_s12 = int_to_ptr.hbm [resolvable:$true] %s2658_s12 }
  0x1a   :  { %4293 = vst [vmem:[#allocation21_spill] sm:$0xff] %v3315_v5  ;;  %191 = vmatpush.msra.mxu0 %v3307_v2  ;;  %v3322_v8 = vld [vmem:[#allocation8 + $0x50] sm:$0xff]  ;;  %v3324_v9 = vld [vmem:[#allocation8] sm:$0xff]  ;;  %270 = vmatpush.msra.mxu2 %v3320_v7  ;;  %v3331_v11 = vld [vmem:[#allocation8 + $0x48] sm:$0xff]  ;;  %s2656_s10 = sshll.u32 %s3222_s2, 4  ;;  %s2657_s10 = int_to_ptr.vmem [resolvable:$true] %s2656_s10 }
  0x1b   :  { %211 = vmatpush.msra.mxu1 %v3311_v3  ;;  %118 = vst.msk [vmem:[#allocation2] sm:$0xff] %vm117_vm0, %v115_v6  ;;  %v3326_v10 = vld [vmem:[#allocation8 + $0x20] sm:$0xff]  ;;  %v171_v14 = vld [vmem:[#allocation3] sm:$0xff]  ;;  %v172_v15 = vld [vmem:[#allocation3 + $0x8] sm:$0xff] }
  0x1c   :  { %4294 = vst [vmem:[#allocation22_spill] sm:$0xff] %v3324_v9  ;;  %192 = vmatpush.msra.mxu0 %v3313_v4  ;;  %271 = vmatpush.msra.mxu2 %v3322_v8  ;;  %v3336_v12 = vld [vmem:[#allocation8 + $0x40] sm:$0xff]  ;;  %v116_v16 = vld [vmem:[#allocation6 + $0x8] sm:$0xff]  ;;  %v3352_v22 = vld [vmem:[#allocation11 + $0x10] sm:$0xff] }
  0x1d   :  { %4295 = vst [vmem:[#allocation23_spill] sm:$0xff] %v3326_v10  ;;  %212 = vmatpush.msra.mxu1 %v3315_v5  ;;  %v3348_v17 = vld [vmem:[#allocation11 + $0x18] sm:$0xff]  ;;  %v3355_v25 = vld [vmem:[#allocation11 + $0x8] sm:$0xff]  ;;  %v3358_v26 = vld [vmem:[#allocation11] sm:$0xff] }
  0x1e   :  { %193 = vmatpush.msra.mxu0 %v3324_v9  ;;  %272 = vmatpush.msra.mxu2 %v3331_v11  ;;  %119 = vst.msk [vmem:[#allocation2 + $0x8] sm:$0xff] %vm117_vm0, %v116_v16  ;;  %v3365_v28 = vld [vmem:[#allocation9 + $0x18] sm:$0xff]  ;;  %v3374_v31 = vld [vmem:[#allocation9 + $0x10] sm:$0xff]  ;;  %v3383_v35 = vld [vmem:[#allocation9 + $0x8] sm:$0xff] }
  0x1f   :  { %213 = vmatpush.msra.mxu1 %v3326_v10  ;;  %300 = vmatpush.msra.mxu3 %v3348_v17  ;;  %v3367_v29 = vld [vmem:[#allocation9 + $0x38] sm:$0xff]  ;;  %v3376_v32 = vld [vmem:[#allocation9 + $0x30] sm:$0xff]  ;;  %v3385_v36 = vld [vmem:[#allocation9 + $0x28] sm:$0xff] }
  0x20   :  { %273 = vmatpush.msra.mxu2 %v3336_v12  ;;  %v3369_v30 = vld [vmem:[#allocation9 + $0x58] sm:$0xff]  ;;  %v3378_v33 = vld [vmem:[#allocation9 + $0x50] sm:$0xff]  ;;  %v3387_v37 = vld [vmem:[#allocation9 + $0x48] sm:$0xff] }
  0x21   :  { %301 = vmatpush.msra.mxu3 %v3352_v22  ;;  %343 = vmatpush.msrb.mxu1 %v3365_v28  ;;  %v3393_v40 = vld [vmem:[#allocation9] sm:$0xff]  ;;  %v3408_v44 = vld [vmem:[#allocation11 + $0x38] sm:$0xff]  ;;  %v3410_v45 = vld [vmem:[#allocation11 + $0x30] sm:$0xff] }
  0x22   :  { %v3339_v13 = vld [vmem:[#allocation2] sm:$0xff]  ;;  %366 = vmatpush.msrb.mxu2 %v3367_v29  ;;  %320 = vmatpush.msrb.mxu0 %v3408_v44  ;;  %v3416_v46 = vld [vmem:[#allocation11 + $0x28] sm:$0xff]  ;;  %v3445_v55 = vld [vmem:[#allocation11 + $0x58] sm:$0xff] }
  0x23   :  { %2678 = vmatmul.msk.f32.vlgmr.msra.gmra.mxu0 %vm117_vm0, %v3339_v13  ;;  %2679 = vmatmul.msk.f32.vlgmr.msra.gmra.mxu1 %vm117_vm0, %v3339_v13  ;;  %v3395_v41 = vld [vmem:[#allocation9 + $0x20] sm:$0xff]  ;;  %v3447_v56 = vld [vmem:[#allocation11 + $0x50] sm:$0xff]  ;;  %v3453_v62 = vld [vmem:[#allocation11 + $0x48] sm:$0xff] }
  0x24   :  { %2682 = vmatmul.msk.f32.vlgmr.msra.gmra.mxu2 %vm117_vm0, %v3339_v13  ;;  %302 = vmatpush.msra.mxu3 %v3355_v25  ;;  %v3397_v42 = vld [vmem:[#allocation9 + $0x40] sm:$0xff] }
  0x25   :  { %v3361_v27 = vld [vmem:[#allocation2 + $0x8] sm:$0xff]  ;;  %344 = vmatpush.msrb.mxu1 %v3374_v31  ;;  %367 = vmatpush.msrb.mxu2 %v3376_v32  ;;  %v3422_v47 = vld [vmem:[#allocation11 + $0x20] sm:$0xff] }
  0x26   :  { %303 = vmatpush.msra.mxu3 %v3358_v26  ;;  %321 = vmatpush.msrb.mxu0 %v3410_v45  ;;  %v3435_v52 = vld [vmem:[%s4267_s5] ss:$0 sm:$0xff] }
  0x27   :  { %2683 = vmatmul.msk.f32.vlgmr.msra.gmra.mxu3 %vm117_vm0, %v3361_v27  ;;  %345 = vmatpush.msrb.mxu1 %v3383_v35  ;;  %4296 = vst [vmem:[#allocation24_spill] sm:$0xff] %v3435_v52  ;;  %v3440_v53 = vld [vmem:[%s4265_s3] ss:$0 sm:$0xff] }
  0x28   :  { %389 = vmatpush.msrb.mxu3 %v3369_v30  ;;  %368 = vmatpush.msrb.mxu2 %v3385_v36 }
  0x29   :  { %346 = vmatpush.msrb.mxu1 %v3393_v40  ;;  %322 = vmatpush.msrb.mxu0 %v3416_v46 }
  0x2a   :  { %390 = vmatpush.msrb.mxu3 %v3378_v33  ;;  %369 = vmatpush.msrb.mxu2 %v3395_v41 }
  0x2b   :  { %504 = vmatpush.msra.mxu1 %v3303_v0  ;;  %323 = vmatpush.msrb.mxu0 %v3422_v47 }
  0x2c   :  { %391 = vmatpush.msrb.mxu3 %v3387_v37  ;;  %524 = vmatpush.msra.mxu2 %v3305_v1 }
  0x2d   :  { %505 = vmatpush.msra.mxu1 %v3307_v2  ;;  %2684 = vmatmul.msk.f32.vlgmr.msrb.gmra.mxu0 %vm117_vm0, %v3361_v27 }
  0x2e   :  { %392 = vmatpush.msrb.mxu3 %v3397_v42  ;;  %525 = vmatpush.msra.mxu2 %v3311_v3 }
  0x2f   :  { %506 = vmatpush.msra.mxu1 %v3313_v4  ;;  %351 = vrot.lane.b32.xlu0 %v3435_v52, %s3219_s14 }
  0x30   :  { %584 = vmatpush.msra.mxu3 %v3320_v7  ;;  %526 = vmatpush.msra.mxu2 %v3315_v5 }
  0x31   :  { %507 = vmatpush.msra.mxu1 %v3324_v9  ;;  %449 = vmatpush.msra.mxu0 %v3445_v55 }
  0x32   :  { %585 = vmatpush.msra.mxu3 %v3322_v8  ;;  %527 = vmatpush.msra.mxu2 %v3326_v10 }
  0x33   :  { %450 = vmatpush.msra.mxu0 %v3447_v56 }
  0x34   :  { %586 = vmatpush.msra.mxu3 %v3331_v11 }
  0x35   :  { %451 = vmatpush.msra.mxu0 %v3453_v62 }
  0x36   :  { %587 = vmatpush.msra.mxu3 %v3336_v12 }
  0x37   :  { %374 = vrot.lane.b32.xlu0 %v3435_v52, %s3220_s15 }
  0xa0   :  { %v195_v18 = vpop.f32.mrf.mxu0  ;;  %v215_v19 = vpop.f32.mrf.mxu1 }
  0xa1   :  { %v218_v20 = vadd.f32 %v195_v18, %v171_v14  ;;  %v238_v21 = vadd.f32 %v215_v19, %v172_v15  ;;  %v3458_v15 = vld [vmem:[#allocation11 + $0x40] sm:$0xff] }
  0xa2   :  { %452 = vmatpush.msra.mxu0 %v3458_v15 }
  0xa3   :  { %v2680_v23 = vmul.f32 -1.442695, %v218_v20  ;;  %v2681_v24 = vmul.f32 -1.442695, %v238_v21  ;;  %v173_v20 = vld [vmem:[#allocation3 + $0x10] sm:$0xff]  ;;  %2690 = vmatmul.msk.f32.vlgmr.msra.gmra.mxu0 %vm117_vm0, %v3361_v27 }
  0xa4   :  { %613 = vmatpush.msrb.mxu0 %v3348_v17 }
  0xa5   :  { %2796 = vpow2.f32 %v2680_v23 }
  0xa6   :  { %2798 = vpow2.f32 %v2681_v24  ;;  %614 = vmatpush.msrb.mxu0 %v3352_v22 }
  0xa7   :  { %v275_v59 = vpop.f32.mrf.mxu2 }
  0xa8   :  { %v276_v14 = vadd.f32 %v3440_v53, %v275_v59  ;;  %615 = vmatpush.msrb.mxu0 %v3355_v25 }
  0xaa   :  { %616 = vmatpush.msrb.mxu0 %v3358_v26  ;;  %v305_v59 = vpop.f32.mrf.mxu3 }
  0xab   :  { %v2797_v34 = vpop.eup %2796 }
  0xac   :  { %v2799_v38 = vpop.eup %2798  ;;  %v3389_v39 = vadd.f32 1.0, %v2797_v34  ;;  %696 = vmatpush.msra.mxu0 %v3369_v30 }
  0xad   :  { %v3399_v43 = vadd.f32 1.0, %v2799_v38 }
  0xae   :  { %2800 = vrcp.f32 %v3389_v39  ;;  %v234_v58 = vand.u32 2147483648, %v3389_v39  ;;  %v232_v61 = vand.u32 2147483647, %v3389_v39  ;;  %vm228_vm2 = vweird.f32 %v3389_v39  ;;  %697 = vmatpush.msra.mxu0 %v3378_v33 }
  0xaf   :  { %2802 = vrcp.f32 %v3399_v43  ;;  %vm248_vm5 = vweird.f32 %v3399_v43  ;;  %v254_v23 = vand.u32 2147483648, %v3399_v43  ;;  %v252_v34 = vand.u32 2147483647, %v3399_v43 }
  0xb0   :  { %v235_v16 = vor.u32 1.1754944e-38, %v234_v58  ;;  %vm233_vm4 = vcmp.eq.f32.partialorder %v232_v61, 8.507059e+37  ;;  %698 = vmatpush.msra.mxu0 %v3387_v37  ;;  %v3516_v61 = vpop.permute.xlu0 %351 }
  0xb1   :  { %vm253_vm8 = vcmp.eq.f32.partialorder %v252_v34, 8.507059e+37  ;;  %4297 = vst [vmem:[#allocation25_spill] sm:$0xff] %v3516_v61  ;;  %v490_v34 = vld [vmem:[#allocation3 + $0x20] sm:$0xff] }
  0xb2   :  { %699 = vmatpush.msra.mxu0 %v3397_v42 }
  0xb4   :  { %v2801_v48 = vpop.eup %2800 }
  0xb5   :  { %v2803_v49 = vpop.eup %2802  ;;  %v224_v50 = vmul.f32 %v2801_v48, %v3389_v39  ;;  %vm229_vm1 = vweird.f32 %v2801_v48 }
  0xb6   :  { %v244_v51 = vmul.f32 %v2803_v49, %v3399_v43  ;;  %vm230_vm3 = vmor %vm228_vm2, %vm229_vm1  ;;  %vm249_vm6 = vweird.f32 %v2803_v49 }
  0xb7   :  { %v225_v54 = vsub.f32 1.0, %v224_v50  ;;  %vm250_vm7 = vmor %vm248_vm5, %vm249_vm6 }
  0xb8   :  { %v245_v57 = vsub.f32 1.0, %v244_v51 }
  0xb9   :  { %v226_v60 = vmul.f32 %v2801_v48, %v225_v54 }
  0xba   :  { %v246_v63 = vmul.f32 %v2803_v49, %v245_v57 }
  0xbb   :  { %v227_v6 = vadd.f32 %v2801_v48, %v226_v60 }
  0xbc   :  { %v247_v19 = vadd.f32 %v2803_v49, %v246_v63 }
  0xbd   :  { %v231_v18 = vsel %vm230_vm3, %v2801_v48, %v227_v6  ;;  %v255_v48 = vor.u32 1.1754944e-38, %v254_v23 }
  0xbe   :  { %v236_v21 = vsel %vm233_vm4, %v235_v16, %v231_v18  ;;  %v251_v39 = vsel %vm250_vm7, %v2803_v49, %v247_v19  ;;  %v489_v16 = vld [vmem:[#allocation3 + $0x18] sm:$0xff] }
  0xbf   :  { %v278_v24 = vmul.f32 %v276_v14, %v236_v21  ;;  %v256_v50 = vsel %vm253_vm8, %v255_v48, %v251_v39  ;;  %v325_v14 = vpop.f32.mrf.mxu0 }
  0xc0   :  { %v281_v43 = vsub.f32 1.0, %v256_v50  ;;  %v283_v57 = vmul.f32 %v256_v50, %v3339_v13 }
  0xc1   :  { %v279_v38 = vadd.f32 %v278_v24, %v173_v20 }
  0xc3   :  { %2804 = vtanh.f32 %v279_v38 }
  0xc9   :  { %v2805_v51 = vpop.eup %2804 }
  0xca   :  { %v282_v54 = vmul.f32 %v2805_v51, %v281_v43 }
  0xcc   :  { %v3476_v49 = vadd.f32 %v283_v57, %v282_v54 }
  0xce   :  { %2685 = vmatmul.msk.f32.vlgmr.msrb.gmra.mxu1 %vm117_vm0, %v3476_v49  ;;  %2686 = vmatmul.msk.f32.vlgmr.msrb.gmra.mxu2 %vm117_vm0, %v3476_v49 }
  0xcf   :  { %2687 = vmatmul.msk.f32.vlgmr.msrb.gmra.mxu3 %vm117_vm0, %v3476_v49  ;;  %633 = vmatpush.msrb.mxu1 %v3408_v44 }
  0xd0   :  { %656 = vmatpush.msrb.mxu2 %v3365_v28  ;;  %676 = vmatpush.msrb.mxu3 %v3367_v29 }
  0xd1   :  { %634 = vmatpush.msrb.mxu1 %v3410_v45 }
  0xd2   :  { %657 = vmatpush.msrb.mxu2 %v3374_v31  ;;  %677 = vmatpush.msrb.mxu3 %v3376_v32 }
  0xd3   :  { %635 = vmatpush.msrb.mxu1 %v3416_v46 }
  0xd4   :  { %658 = vmatpush.msrb.mxu2 %v3383_v35  ;;  %678 = vmatpush.msrb.mxu3 %v3385_v36 }
  0xd5   :  { %636 = vmatpush.msrb.mxu1 %v3422_v47 }
  0xd6   :  { %2691 = vmatmul.msk.f32.vlgmr.msra.gmra.mxu1 %vm117_vm0, %v3476_v49  ;;  %2692 = vmatmul.msk.f32.vlgmr.msra.gmra.mxu2 %vm117_vm0, %v3476_v49 }
  0xd7   :  { %2695 = vmatmul.msk.f32.vlgmr.msra.gmra.mxu3 %vm117_vm0, %v3476_v49  ;;  %756 = vmatpush.msra.mxu1 %v3445_v55 }
  0xd8   :  { %659 = vmatpush.msrb.mxu2 %v3393_v40  ;;  %679 = vmatpush.msrb.mxu3 %v3395_v41 }
  0xd9   :  { %757 = vmatpush.msra.mxu1 %v3447_v56 }
  0xda   :  { %810 = vmatpush.msra.mxu2 %v3303_v0  ;;  %830 = vmatpush.msra.mxu3 %v3305_v1 }
  0xdb   :  { %758 = vmatpush.msra.mxu1 %v3453_v62 }
  0xdc   :  { %811 = vmatpush.msra.mxu2 %v3307_v2  ;;  %831 = vmatpush.msra.mxu3 %v3311_v3 }
  0xdd   :  { %759 = vmatpush.msra.mxu1 %v3458_v15 }
  0xde   :  { %812 = vmatpush.msra.mxu2 %v3313_v4  ;;  %832 = vmatpush.msra.mxu3 %v3315_v5 }
  0xe0   :  { %813 = vmatpush.msra.mxu2 %v3324_v9  ;;  %833 = vmatpush.msra.mxu3 %v3326_v10 }
 0x14b   :  { %v348_v13 = vpop.f32.mrf.mxu1 }
 0x14c   :  { %v349_v58 = vadd.f32 %v3435_v52, %v348_v13 }
 0x14e   :  { %v397_v60 = vadd.f32 %v349_v58, %v305_v59 }
 0x150   :  { %v2688_v63 = vmul.f32 -1.442695, %v397_v60 }
 0x151   :  { %v371_v6 = vpop.f32.mrf.mxu2 }
 0x152   :  { %2806 = vpow2.f32 %v2688_v63  ;;  %v372_v18 = vadd.f32 %v371_v6, %v3516_v61  ;;  %v394_v59 = vpop.f32.mrf.mxu3 }
 0x153   :  { %v509_v19 = vpop.f32.mrf.mxu1 }
 0x154   :  { %v417_v20 = vadd.f32 %v372_v18, %v325_v14  ;;  %v532_v21 = vadd.f32 %v509_v19, %v489_v16  ;;  %v3527_v14 = vld [vmem:[%s4269_s7] ss:$0 sm:$0xff]  ;;  %v454_v18 = vpop.f32.mrf.mxu0 }
 0x155   :  { %4298 = vst [vmem:[#allocation26_spill] sm:$0xff] %v3527_v14 }
 0x156   :  { %v2689_v23 = vmul.f32 -1.442695, %v417_v20  ;;  %v2693_v24 = vmul.f32 -1.442695, %v532_v21  ;;  %v3529_v20 = vpop.permute.xlu0 %374 }
 0x157   :  { %4299 = vst [vmem:[#allocation27_spill] sm:$0xff] %v3529_v20 }
 0x158   :  { %v2807_v38 = vpop.eup %2806  ;;  %2808 = vpow2.f32 %v2689_v23 }
 0x159   :  { %v401_v39 = vadd.f32 1.0, %v2807_v38  ;;  %2810 = vpow2.f32 %v2693_v24  ;;  %v529_v48 = vpop.f32.mrf.mxu2 }
 0x15a   :  { %v552_v50 = vadd.f32 %v529_v48, %v490_v34 }
 0x15b   :  { %2812 = vrcp.f32 %v401_v39  ;;  %v411_v21 = vand.u32 2147483647, %v401_v39  ;;  %v413_v23 = vand.u32 2147483648, %v401_v39  ;;  %vm407_vm10 = vweird.f32 %v401_v39 }
 0x15c   :  { %v2694_v43 = vmul.f32 -1.442695, %v552_v50  ;;  %v455_v50 = vadd.f32 %v3527_v14, %v454_v18  ;;  %v589_v18 = vpop.f32.mrf.mxu3 }
 0x15d   :  { %vm412_vm12 = vcmp.eq.f32.partialorder %v411_v21, 8.507059e+37  ;;  %v414_v61 = vor.u32 1.1754944e-38, %v413_v23 }
 0x15e   :  { %v2809_v51 = vpop.eup %2808  ;;  %2814 = vpow2.f32 %v2694_v43  ;;  %v395_v43 = vadd.f32 %v394_v59, %v3529_v20 }
 0x15f   :  { %v2811_v54 = vpop.eup %2810  ;;  %v3519_v57 = vadd.f32 1.0, %v2809_v51 }
 0x160   :  { %v536_v13 = vadd.f32 1.0, %v2811_v54 }
 0x161   :  { %v2813_v58 = vpop.eup %2812  ;;  %2816 = vrcp.f32 %v3519_v57  ;;  %vm427_vm15 = vweird.f32 %v3519_v57  ;;  %v431_v21 = vand.u32 2147483647, %v3519_v57 }
 0x162   :  { %2818 = vrcp.f32 %v536_v13  ;;  %v403_v60 = vmul.f32 %v2813_v58, %v401_v39  ;;  %vm408_vm9 = vweird.f32 %v2813_v58  ;;  %v548_v10 = vand.u32 2147483648, %v536_v13 }
 0x163   :  { %vm409_vm11 = vmor %vm407_vm10, %vm408_vm9  ;;  %v546_v4 = vand.u32 2147483647, %v536_v13  ;;  %vm542_vm2 = vweird.f32 %v536_v13  ;;  %vm432_vm6 = vcmp.eq.f32.partialorder %v431_v21, 8.507059e+37  ;;  %vm479_vm10 = vcmask 253952  }
 0x164   :  { %v2815_v63 = vpop.eup %2814  ;;  %v404_v16 = vsub.f32 1.0, %v403_v60  ;;  %v433_v60 = vand.u32 2147483648, %v3519_v57 }
 0x165   :  { %v3522_v6 = vadd.f32 1.0, %v2815_v63  ;;  %vm547_vm4 = vcmp.eq.f32.partialorder %v546_v4, 8.507059e+37 }
 0x166   :  { %v405_v38 = vmul.f32 %v2813_v58, %v404_v16 }
 0x167   :  { %v2817_v19 = vpop.eup %2816  ;;  %2820 = vrcp.f32 %v3522_v6  ;;  %vm562_vm7 = vweird.f32 %v3522_v6 }
 0x168   :  { %v2819_v24 = vpop.eup %2818  ;;  %v423_v34 = vmul.f32 %v2817_v19, %v3519_v57  ;;  %v406_v54 = vadd.f32 %v2813_v58, %v405_v38  ;;  %vm428_vm13 = vweird.f32 %v2817_v19 }
 0x169   :  { %v538_v48 = vmul.f32 %v2819_v24, %v536_v13  ;;  %vm543_vm14 = vweird.f32 %v2819_v24  ;;  %vm3538_vm1 = vmor %vm427_vm15, %vm428_vm13 }
 0x16a   :  { %v424_v51 = vsub.f32 1.0, %v423_v34  ;;  %v410_v9 = vsel %vm409_vm11, %v2813_v58, %v406_v54  ;;  %vm544_vm3 = vmor %vm542_vm2, %vm543_vm14  ;;  %v491_v54 = vld [vmem:[#allocation3 + $0x28] sm:$0xff] }
 0x16b   :  { %v539_v63 = vsub.f32 1.0, %v538_v48  ;;  %v415_v14 = vsel %vm412_vm12, %v414_v61, %v410_v9  ;;  %v549_v48 = vor.u32 1.1754944e-38, %v548_v10  ;;  %v566_v10 = vand.u32 2147483647, %v3522_v6 }
 0x16c   :  { %v425_v52 = vmul.f32 %v2817_v19, %v424_v51  ;;  %v457_v34 = vmul.f32 %v455_v50, %v415_v14  ;;  %v590_v51 = vadd.f32 %v3440_v53, %v589_v18 }
 0x16d   :  { %v2821_v16 = vpop.eup %2820  ;;  %v540_v5 = vmul.f32 %v2819_v24, %v539_v63  ;;  %vm567_vm9 = vcmp.eq.f32.partialorder %v566_v10, 8.507059e+37  ;;  %v4307_v10 = vld [vmem:[#allocation25_spill] sm:$0xff] }
 0x16e   :  { %v426_v59 = vadd.f32 %v2817_v19, %v425_v52  ;;  %v558_v39 = vmul.f32 %v2821_v16, %v3522_v6  ;;  %v458_v9 = vadd.f32 %v457_v34, %v395_v43  ;;  %v434_v52 = vor.u32 1.1754944e-38, %v433_v60 }
 0x16f   :  { %v541_v23 = vadd.f32 %v2819_v24, %v540_v5  ;;  %vm563_vm5 = vweird.f32 %v2821_v16  ;;  %v568_v5 = vand.u32 2147483648, %v3522_v6 }
 0x170   :  { %v559_v58 = vsub.f32 1.0, %v558_v39  ;;  %v430_v14 = vsel %vm3538_vm1, %v2817_v19, %v426_v59  ;;  %2822 = vtanh.f32 %v458_v9  ;;  %vm564_vm8 = vmor %vm562_vm7, %vm563_vm5 }
 0x171   :  { %v545_v61 = vsel %vm544_vm3, %v2819_v24, %v541_v23  ;;  %v435_v43 = vsel %vm432_vm6, %v434_v52, %v430_v14  ;;  %v569_v60 = vor.u32 1.1754944e-38, %v568_v5  ;;  %v4302_v14 = vld [vmem:[#allocation20_spill] sm:$0xff] }
 0x172   :  { %v560_v50 = vmul.f32 %v2821_v16, %v559_v58  ;;  %v550_v63 = vsel %vm547_vm4, %v549_v48, %v545_v61  ;;  %v460_v19 = vsub.f32 1.0, %v435_v43  ;;  %v462_v34 = vmul.f32 %v435_v43, %v3361_v27 }
 0x173   :  { %v592_v57 = vmul.f32 %v590_v51, %v550_v63  ;;  %v4305_v63 = vld [vmem:[#allocation23_spill] sm:$0xff] }
 0x174   :  { %v561_v13 = vadd.f32 %v2821_v16, %v560_v50  ;;  %v4303_v50 = vld [vmem:[#allocation21_spill] sm:$0xff] }
 0x175   :  { %v593_v4 = vadd.f32 %v592_v57, %v491_v54  ;;  %v4304_v54 = vld [vmem:[#allocation22_spill] sm:$0xff]  ;;  %v4306_v57 = vld [vmem:[#allocation24_spill] sm:$0xff] }
 0x176   :  { %v565_v24 = vsel %vm564_vm8, %v2821_v16, %v561_v13  ;;  %v2823_v18 = vpop.eup %2822 }
 0x177   :  { %2824 = vtanh.f32 %v593_v4  ;;  %v570_v59 = vsel %vm567_vm9, %v569_v60, %v565_v24  ;;  %v461_v39 = vmul.f32 %v2823_v18, %v460_v19  ;;  %v795_v19 = vld [vmem:[#allocation3 + $0x30] sm:$0xff]  ;;  %v796_v18 = vld [vmem:[#allocation3 + $0x38] sm:$0xff] }
 0x178   :  { %v595_v21 = vsub.f32 1.0, %v570_v59  ;;  %v597_v48 = vmul.f32 %v570_v59, %v3476_v49 }
 0x179   :  { %v3550_v38 = vadd.f32 %v462_v34, %v461_v39 }
 0x17b   :  { %v465_v6 = vrot.slane %v3550_v38, 1  ;;  %v466_v58 = vrot.slane %v3550_v38, 2  ;;  %v467_v16 = vrot.slane %v3550_v38, 3  ;;  %480 = vst.msk [vmem:[#allocation12] sm:$0x1] %vm479_vm10, %v3550_v38  ;;  %2696 = vmatmul.msk.f32.vlgmr.msrb.gmra.mxu0 %vm117_vm0, %v3550_v38  ;;  %2697 = vmatmul.msk.f32.vlgmr.msrb.gmra.mxu1 %vm117_vm0, %v3550_v38  ;;  %v468_v51 = vrot.slane %v3550_v38, 4 }
 0x17c   :  { %890 = vmatpush.msrb.mxu0 %v3320_v7  ;;  %919 = vmatpush.msrb.mxu1 %v3348_v17  ;;  %v469_v9 = vrot.slane %v3550_v38, 5  ;;  %v470_v61 = vrot.slane %v3550_v38, 6  ;;  %v471_v49 = vrot.slane %v3550_v38, 7 }
 0x17d   :  { %v2825_v23 = vpop.eup %2824  ;;  %481 = vst.msk [vmem:[#allocation12 + $0x8] sm:$0x1] %vm479_vm10, %v465_v6 }
 0x17e   :  { %v596_v27 = vmul.f32 %v2825_v23, %v595_v21  ;;  %482 = vst.msk [vmem:[#allocation12 + $0x10] sm:$0x1] %vm479_vm10, %v466_v58  ;;  %891 = vmatpush.msrb.mxu0 %v3322_v8  ;;  %920 = vmatpush.msrb.mxu1 %v3352_v22 }
 0x17f   :  { %483 = vst.msk [vmem:[#allocation12 + $0x18] sm:$0x1] %vm479_vm10, %v467_v16 }
 0x180   :  { %v3567_v52 = vadd.f32 %v597_v48, %v596_v27  ;;  %484 = vst.msk [vmem:[#allocation12 + $0x20] sm:$0x1] %vm479_vm10, %v468_v51  ;;  %892 = vmatpush.msrb.mxu0 %v3331_v11  ;;  %921 = vmatpush.msrb.mxu1 %v3355_v25 }
 0x181   :  { %485 = vst.msk [vmem:[#allocation12 + $0x28] sm:$0x1] %vm479_vm10, %v469_v9 }
 0x182   :  { %2698 = vmatmul.msk.f32.vlgmr.msrb.gmra.mxu2 %vm117_vm0, %v3567_v52  ;;  %2699 = vmatmul.msk.f32.vlgmr.msrb.gmra.mxu3 %vm117_vm0, %v3567_v52  ;;  %486 = vst.msk [vmem:[#allocation12 + $0x30] sm:$0x1] %vm479_vm10, %v470_v61 }
 0x183   :  { %939 = vmatpush.msrb.mxu2 %v3408_v44  ;;  %962 = vmatpush.msrb.mxu3 %v3365_v28  ;;  %487 = vst.msk [vmem:[#allocation12 + $0x38] sm:$0x1] %vm479_vm10, %v471_v49 }
 0x184   :  { %2700 = vmatmul.msk.f32.vlgmr.msra.gmra.mxu0 %vm117_vm0, %v3567_v52  ;;  %2703 = vmatmul.msk.f32.vlgmr.msra.gmra.mxu1 %vm117_vm0, %v3550_v38 }
 0x185   :  { %893 = vmatpush.msrb.mxu0 %v3336_v12  ;;  %940 = vmatpush.msrb.mxu2 %v3410_v45 }
 0x186   :  { %922 = vmatpush.msrb.mxu1 %v3358_v26  ;;  %963 = vmatpush.msrb.mxu3 %v3374_v31 }
 0x187   :  { %982 = vmatpush.msra.mxu0 %v3367_v29  ;;  %941 = vmatpush.msrb.mxu2 %v3416_v46 }
 0x188   :  { %1002 = vmatpush.msra.mxu1 %v3369_v30  ;;  %964 = vmatpush.msrb.mxu3 %v3383_v35 }
 0x189   :  { %983 = vmatpush.msra.mxu0 %v3376_v32  ;;  %942 = vmatpush.msrb.mxu2 %v3422_v47 }
 0x18a   :  { %2704 = vmatmul.msk.f32.vlgmr.msra.gmra.mxu2 %vm117_vm0, %v3567_v52  ;;  %2705 = vmatmul.msk.f32.vlgmr.msra.gmra.mxu3 %vm117_vm0, %v3567_v52 }
 0x18b   :  { %1062 = vmatpush.msra.mxu2 %v3445_v55  ;;  %984 = vmatpush.msra.mxu0 %v3385_v36 }
 0x18c   :  { %2708 = vmatmul.msk.f32.vlgmr.msrb.gmra.mxu0 %vm117_vm0, %v3567_v52  ;;  %1003 = vmatpush.msra.mxu1 %v3378_v33 }
 0x18d   :  { %1063 = vmatpush.msra.mxu2 %v3447_v56  ;;  %965 = vmatpush.msrb.mxu3 %v3393_v40 }
 0x18e   :  { %985 = vmatpush.msra.mxu0 %v3395_v41  ;;  %1004 = vmatpush.msra.mxu1 %v3387_v37 }
 0x18f   :  { %1064 = vmatpush.msra.mxu2 %v3453_v62  ;;  %1116 = vmatpush.msra.mxu3 %v3303_v0 }
 0x190   :  { %1005 = vmatpush.msra.mxu1 %v3397_v42  ;;  %1136 = vmatpush.msrb.mxu0 %v3305_v1 }
 0x191   :  { %1065 = vmatpush.msra.mxu2 %v3458_v15  ;;  %1117 = vmatpush.msra.mxu3 %v3307_v2 }
 0x192   :  { %1137 = vmatpush.msrb.mxu0 %v3311_v3 }
 0x193   :  { %1118 = vmatpush.msra.mxu3 %v4302_v14 }
 0x194   :  { %1138 = vmatpush.msrb.mxu0 %v4303_v50 }
 0x195   :  { %1119 = vmatpush.msra.mxu3 %v4304_v54 }
 0x196   :  { %1139 = vmatpush.msrb.mxu0 %v4305_v63 }
 0x1f8   :  { %v618_v43 = vpop.f32.mrf.mxu0  ;;  %v638_v4 = vpop.f32.mrf.mxu1 }
 0x201   :  { %v701_v54 = vpop.f32.mrf.mxu0 }
 0x205   :  { %v661_v5 = vpop.f32.mrf.mxu2  ;;  %v681_v0 = vpop.f32.mrf.mxu3 }
 0x206   :  { %v662_v13 = vadd.f32 %v4306_v57, %v661_v5  ;;  %v682_v1 = vadd.f32 %v681_v0, %v4307_v10 }
 0x208   :  { %v704_v24 = vadd.f32 %v662_v13, %v618_v43  ;;  %v724_v2 = vadd.f32 %v682_v1, %v638_v4  ;;  %v761_v43 = vpop.f32.mrf.mxu1 }
 0x20a   :  { %v2701_v60 = vmul.f32 -1.442695, %v704_v24  ;;  %v2702_v3 = vmul.f32 -1.442695, %v724_v2 }
 0x20c   :  { %2826 = vpow2.f32 %v2701_v60 }
 0x20d   :  { %2828 = vpow2.f32 %v2702_v3  ;;  %v815_v59 = vpop.f32.mrf.mxu2  ;;  %v835_v39 = vpop.f32.mrf.mxu3 }
 0x20e   :  { %v838_v34 = vadd.f32 %v815_v59, %v795_v19  ;;  %v858_v21 = vadd.f32 %v835_v39, %v796_v18  ;;  %v702_v19 = vadd.f32 %v701_v54, %v3529_v20  ;;  %v4308_v39 = vld [vmem:[#allocation26_spill] sm:$0xff]  ;;  %v895_v54 = vpop.f32.mrf.mxu0 }
 0x210   :  { %v2706_v23 = vmul.f32 -1.442695, %v838_v34  ;;  %v2707_v6 = vmul.f32 -1.442695, %v858_v21  ;;  %v762_v34 = vadd.f32 %v4308_v39, %v761_v43 }
 0x212   :  { %v2827_v58 = vpop.eup %2826  ;;  %2830 = vpow2.f32 %v2706_v23 }
 0x213   :  { %v2829_v16 = vpop.eup %2828  ;;  %v708_v27 = vadd.f32 1.0, %v2827_v58  ;;  %2832 = vpow2.f32 %v2707_v6 }
 0x214   :  { %v728_v48 = vadd.f32 1.0, %v2829_v16 }
 0x215   :  { %2834 = vrcp.f32 %v708_v27  ;;  %v720_v13 = vand.u32 2147483648, %v708_v27  ;;  %v718_v24 = vand.u32 2147483647, %v708_v27  ;;  %vm714_vm12 = vweird.f32 %v708_v27 }
 0x216   :  { %2836 = vrcp.f32 %v728_v48  ;;  %v740_v23 = vand.u32 2147483648, %v728_v48  ;;  %vm734_vm2 = vweird.f32 %v728_v48  ;;  %v738_v43 = vand.u32 2147483647, %v728_v48 }
 0x217   :  { %v721_v21 = vor.u32 1.1754944e-38, %v720_v13  ;;  %vm719_vm14 = vcmp.eq.f32.partialorder %v718_v24, 8.507059e+37 }
 0x218   :  { %v2831_v51 = vpop.eup %2830  ;;  %vm739_vm7 = vcmp.eq.f32.partialorder %v738_v43, 8.507059e+37 }
 0x219   :  { %v2833_v9 = vpop.eup %2832  ;;  %v842_v61 = vadd.f32 1.0, %v2831_v51 }
 0x21a   :  { %v3627_v49 = vadd.f32 1.0, %v2833_v9 }
 0x21b   :  { %v2835_v14 = vpop.eup %2834  ;;  %2838 = vrcp.f32 %v842_v61  ;;  %v854_v51 = vand.u32 2147483648, %v842_v61  ;;  %vm848_vm4 = vweird.f32 %v842_v61 }
 0x21c   :  { %v2837_v50 = vpop.eup %2836  ;;  %v710_v63 = vmul.f32 %v2835_v14, %v708_v27  ;;  %2840 = vrcp.f32 %v3627_v49  ;;  %vm715_vm11 = vweird.f32 %v2835_v14  ;;  %v852_v27 = vand.u32 2147483647, %v842_v61 }
 0x21d   :  { %v730_v5 = vmul.f32 %v2837_v50, %v728_v48  ;;  %vm716_vm13 = vmor %vm714_vm12, %vm715_vm11  ;;  %vm735_vm15 = vweird.f32 %v2837_v50  ;;  %v797_v48 = vld [vmem:[#allocation3 + $0x40] sm:$0xff]  ;;  %vm868_vm9 = vweird.f32 %v3627_v49 }
 0x21e   :  { %v711_v0 = vsub.f32 1.0, %v710_v63  ;;  %vm3633_vm3 = vmor %vm734_vm2, %vm735_vm15  ;;  %vm853_vm6 = vcmp.eq.f32.partialorder %v852_v27, 8.507059e+37 }
 0x21f   :  { %v731_v1 = vsub.f32 1.0, %v730_v5 }
 0x220   :  { %v712_v4 = vmul.f32 %v2835_v14, %v711_v0 }
 0x221   :  { %v2839_v2 = vpop.eup %2838  ;;  %v732_v60 = vmul.f32 %v2837_v50, %v731_v1 }
 0x222   :  { %v2841_v3 = vpop.eup %2840  ;;  %v713_v18 = vadd.f32 %v2835_v14, %v712_v4  ;;  %v844_v59 = vmul.f32 %v2839_v2, %v842_v61  ;;  %vm849_vm1 = vweird.f32 %v2839_v2  ;;  %v874_v61 = vand.u32 2147483648, %v3627_v49 }
 0x223   :  { %v864_v6 = vmul.f32 %v2841_v3, %v3627_v49  ;;  %v733_v63 = vadd.f32 %v2837_v50, %v732_v60  ;;  %v896_v60 = vadd.f32 %v3440_v53, %v895_v54  ;;  %vm850_vm5 = vmor %vm848_vm4, %vm849_vm1  ;;  %vm869_vm8 = vweird.f32 %v2841_v3 }
 0x224   :  { %v717_v58 = vsel %vm716_vm13, %v2835_v14, %v713_v18  ;;  %v845_v16 = vsub.f32 1.0, %v844_v59  ;;  %v855_v18 = vor.u32 1.1754944e-38, %v854_v51  ;;  %v741_v59 = vor.u32 1.1754944e-38, %v740_v23  ;;  %vm870_vm11 = vmor %vm868_vm9, %vm869_vm8 }
 0x225   :  { %v722_v9 = vsel %vm719_vm14, %v721_v21, %v717_v58  ;;  %v865_v5 = vsub.f32 1.0, %v864_v6  ;;  %v737_v24 = vsel %vm3633_vm3, %v2837_v50, %v733_v63  ;;  %v872_v50 = vand.u32 2147483647, %v3627_v49 }
 0x226   :  { %v764_v0 = vmul.f32 %v762_v34, %v722_v9  ;;  %v846_v1 = vmul.f32 %v2839_v2, %v845_v16  ;;  %v742_v6 = vsel %vm739_vm7, %v741_v59, %v737_v24 }
 0x227   :  { %v866_v4 = vmul.f32 %v2841_v3, %v865_v5  ;;  %v767_v39 = vsub.f32 1.0, %v742_v6  ;;  %v769_v9 = vmul.f32 %v742_v6, %v3550_v38  ;;  %vm873_vm12 = vcmp.eq.f32.partialorder %v872_v50, 8.507059e+37 }
 0x228   :  { %v765_v13 = vadd.f32 %v764_v0, %v702_v19  ;;  %v847_v14 = vadd.f32 %v2839_v2, %v846_v1 }
 0x229   :  { %v867_v21 = vadd.f32 %v2841_v3, %v866_v4 }
 0x22a   :  { %2842 = vtanh.f32 %v765_v13  ;;  %v851_v34 = vsel %vm850_vm5, %v2839_v2, %v847_v14  ;;  %v875_v2 = vor.u32 1.1754944e-38, %v874_v61 }
 0x22b   :  { %v856_v19 = vsel %vm853_vm6, %v855_v18, %v851_v34  ;;  %v871_v16 = vsel %vm870_vm11, %v2841_v3, %v867_v21 }
 0x22c   :  { %v898_v58 = vmul.f32 %v896_v60, %v856_v19  ;;  %v876_v63 = vsel %vm873_vm12, %v875_v2, %v871_v16 }
 0x22d   :  { %v901_v3 = vsub.f32 1.0, %v876_v63  ;;  %v903_v4 = vmul.f32 %v876_v63, %v3567_v52 }
 0x22e   :  { %v899_v53 = vadd.f32 %v898_v58, %v797_v48 }
 0x230   :  { %v2843_v23 = vpop.eup %2842  ;;  %2844 = vtanh.f32 %v899_v53 }
 0x231   :  { %v768_v51 = vmul.f32 %v2843_v23, %v767_v39 }
 0x233   :  { %v3644_v5 = vadd.f32 %v769_v9, %v768_v51 }
 0x235   :  { %v772_v0 = vrot.slane %v3644_v5, 1  ;;  %v773_v54 = vrot.slane %v3644_v5, 2  ;;  %v774_v49 = vrot.slane %v3644_v5, 3  ;;  %786 = vst.msk [vmem:[#allocation12 + $0x1] sm:$0x1] %vm479_vm10, %v3644_v5  ;;  %2709 = vmatmul.msk.f32.vlgmr.msrb.gmra.mxu1 %vm117_vm0, %v3644_v5  ;;  %2710 = vmatmul.msk.f32.vlgmr.msrb.gmra.mxu2 %vm117_vm0, %v3644_v5  ;;  %v775_v1 = vrot.slane %v3644_v5, 4 }
 0x236   :  { %v2845_v38 = vpop.eup %2844  ;;  %1196 = vmatpush.msrb.mxu1 %v3320_v7  ;;  %1225 = vmatpush.msrb.mxu2 %v3348_v17  ;;  %v776_v27 = vrot.slane %v3644_v5, 5  ;;  %v777_v13 = vrot.slane %v3644_v5, 6  ;;  %v778_v14 = vrot.slane %v3644_v5, 7  ;;  %v3720_v17 = vld [vmem:[#allocation8 + $0x30] sm:$0xff] }
 0x237   :  { %787 = vst.msk [vmem:[#allocation12 + $0x9] sm:$0x1] %vm479_vm10, %v772_v0  ;;  %v902_v43 = vmul.f32 %v2845_v38, %v901_v3  ;;  %v4316_v38 = vld [vmem:[#allocation26_spill] sm:$0xff] }
 0x238   :  { %788 = vst.msk [vmem:[#allocation12 + $0x11] sm:$0x1] %vm479_vm10, %v773_v54  ;;  %1197 = vmatpush.msrb.mxu1 %v3322_v8  ;;  %1226 = vmatpush.msrb.mxu2 %v3352_v22  ;;  %v3709_v8 = vld [vmem:[#allocation8 + $0x18] sm:$0xff]  ;;  %v3723_v22 = vld [vmem:[#allocation8 + $0x8] sm:$0xff] }
 0x239   :  { %789 = vst.msk [vmem:[#allocation12 + $0x19] sm:$0x1] %vm479_vm10, %v774_v49  ;;  %v3667_v7 = vadd.f32 %v903_v4, %v902_v43 }
 0x23a   :  { %790 = vst.msk [vmem:[#allocation12 + $0x21] sm:$0x1] %vm479_vm10, %v775_v1  ;;  %1198 = vmatpush.msrb.mxu1 %v3331_v11  ;;  %1227 = vmatpush.msrb.mxu2 %v3355_v25  ;;  %v3713_v11 = vld [vmem:[#allocation8 + $0x38] sm:$0xff]  ;;  %v3726_v25 = vld [vmem:[#allocation8 + $0x28] sm:$0xff] }
 0x23b   :  { %791 = vst.msk [vmem:[#allocation12 + $0x29] sm:$0x1] %vm479_vm10, %v776_v27  ;;  %2711 = vmatmul.msk.f32.vlgmr.msrb.gmra.mxu3 %vm117_vm0, %v3667_v7  ;;  %2712 = vmatmul.msk.f32.vlgmr.msra.gmra.mxu0 %vm117_vm0, %v3667_v7 }
 0x23c   :  { %792 = vst.msk [vmem:[#allocation12 + $0x31] sm:$0x1] %vm479_vm10, %v777_v13  ;;  %1199 = vmatpush.msrb.mxu1 %v3336_v12  ;;  %1245 = vmatpush.msrb.mxu3 %v3408_v44  ;;  %v3717_v12 = vld [vmem:[#allocation8 + $0x10] sm:$0xff] }
 0x23d   :  { %793 = vst.msk [vmem:[#allocation12 + $0x39] sm:$0x1] %vm479_vm10, %v778_v14  ;;  %2713 = vmatmul.msk.f32.vlgmr.msra.gmra.mxu1 %vm117_vm0, %v3667_v7  ;;  %2716 = vmatmul.msk.f32.vlgmr.msra.gmra.mxu2 %vm117_vm0, %v3644_v5 }
 0x23e   :  { %1246 = vmatpush.msrb.mxu3 %v3410_v45  ;;  %1268 = vmatpush.msra.mxu0 %v3365_v28  ;;  %4311 = vst [vmem:[#allocation20_spill] sm:$0xff] %v3720_v17  ;;  %v3732_v28 = vld [vmem:[#allocation8 + $0x20] sm:$0xff] }
 0x23f   :  { %1228 = vmatpush.msrb.mxu2 %v3358_v26  ;;  %1288 = vmatpush.msra.mxu1 %v3367_v29  ;;  %4312 = vst [vmem:[#allocation21_spill] sm:$0xff] %v3723_v22  ;;  %v3729_v26 = vld [vmem:[#allocation8] sm:$0xff] }
 0x240   :  { %1247 = vmatpush.msrb.mxu3 %v3416_v46  ;;  %1269 = vmatpush.msra.mxu0 %v3374_v31  ;;  %4313 = vst [vmem:[#allocation22_spill] sm:$0xff] %v3726_v25 }
 0x241   :  { %1289 = vmatpush.msra.mxu1 %v3376_v32  ;;  %1308 = vmatpush.msra.mxu2 %v3369_v30  ;;  %4314 = vst [vmem:[#allocation23_spill] sm:$0xff] %v3729_v26 }
 0x242   :  { %1248 = vmatpush.msrb.mxu3 %v3422_v47  ;;  %1270 = vmatpush.msra.mxu0 %v3383_v35  ;;  %4315 = vst [vmem:[#allocation24_spill] sm:$0xff] %v3732_v28  ;;  %v1101_v47 = vld [vmem:[#allocation3 + $0x48] sm:$0xff] }
 0x243   :  { %2717 = vmatmul.msk.f32.vlgmr.msra.gmra.mxu3 %vm117_vm0, %v3667_v7  ;;  %2718 = vmatmul.msk.f32.vlgmr.msrb.gmra.mxu0 %vm117_vm0, %v3667_v7 }
 0x244   :  { %1368 = vmatpush.msra.mxu3 %v3445_v55  ;;  %1290 = vmatpush.msra.mxu1 %v3385_v36  ;;  %v1102_v36 = vld [vmem:[#allocation3 + $0x50] sm:$0xff] }
 0x245   :  { %2721 = vmatmul.msk.f32.vlgmr.msrb.gmra.mxu1 %vm117_vm0, %v3667_v7  ;;  %1309 = vmatpush.msra.mxu2 %v3378_v33 }
 0x246   :  { %1369 = vmatpush.msra.mxu3 %v3447_v56  ;;  %1271 = vmatpush.msra.mxu0 %v3393_v40 }
 0x247   :  { %1291 = vmatpush.msra.mxu1 %v3395_v41  ;;  %1310 = vmatpush.msra.mxu2 %v3387_v37 }
 0x248   :  { %1370 = vmatpush.msra.mxu3 %v3453_v62  ;;  %1422 = vmatpush.msrb.mxu0 %v3709_v8 }
 0x249   :  { %1311 = vmatpush.msra.mxu2 %v3397_v42  ;;  %1442 = vmatpush.msrb.mxu1 %v3713_v11 }
 0x24a   :  { %1371 = vmatpush.msra.mxu3 %v3458_v15  ;;  %1423 = vmatpush.msrb.mxu0 %v3717_v12 }
 0x24b   :  { %1443 = vmatpush.msrb.mxu1 %v3720_v17 }
 0x24c   :  { %1424 = vmatpush.msrb.mxu0 %v3723_v22 }
 0x24d   :  { %1444 = vmatpush.msrb.mxu1 %v3726_v25 }
 0x24e   :  { %1425 = vmatpush.msrb.mxu0 %v3729_v26 }
 0x24f   :  { %1445 = vmatpush.msrb.mxu1 %v3732_v28 }
 0x2b2   :  { %v924_v40 = vpop.f32.mrf.mxu1 }
 0x2b8   :  { %v987_v29 = vpop.f32.mrf.mxu0  ;;  %v944_v31 = vpop.f32.mrf.mxu2 }
 0x2b9   :  { %v988_v30 = vadd.f32 %v987_v29, %v4307_v10 }
 0x2ba   :  { %v1007_v58 = vpop.f32.mrf.mxu1 }
 0x2bb   :  { %v1030_v32 = vadd.f32 %v988_v30, %v944_v31  ;;  %v1008_v49 = vadd.f32 %v1007_v58, %v3529_v20 }
 0x2bd   :  { %v2715_v33 = vmul.f32 -1.442695, %v1030_v32 }
 0x2be   :  { %v967_v35 = vpop.f32.mrf.mxu3 }
 0x2bf   :  { %2846 = vpow2.f32 %v2715_v33  ;;  %v968_v37 = vadd.f32 %v4306_v57, %v967_v35 }
 0x2c0   :  { %v1141_v41 = vpop.f32.mrf.mxu0  ;;  %v1067_v51 = vpop.f32.mrf.mxu2 }
 0x2c1   :  { %v1010_v42 = vadd.f32 %v968_v37, %v924_v40  ;;  %v1164_v44 = vadd.f32 %v1141_v41, %v1102_v36  ;;  %v1068_v1 = vadd.f32 %v4316_v38, %v1067_v51  ;;  %v3792_v51 = vld [vmem:[#allocation8 + $0x58] sm:$0xff]  ;;  %v3806_v38 = vld [vmem:[#allocation11 + $0x10] sm:$0xff]  ;;  %v3864_v40 = vld [vmem:[#allocation9 + $0x8] sm:$0xff] }
 0x2c2   :  { %v1201_v32 = vpop.f32.mrf.mxu1 }
 0x2c3   :  { %v2714_v45 = vmul.f32 -1.442695, %v1010_v42  ;;  %v2720_v46 = vmul.f32 -1.442695, %v1164_v44 }
 0x2c5   :  { %v2847_v55 = vpop.eup %2846  ;;  %2848 = vpow2.f32 %v2714_v45  ;;  %v3770_v45 = vld [vmem:[%s4265_s3] ss:$0 sm:$0xff] }
 0x2c6   :  { %v3737_v56 = vadd.f32 1.0, %v2847_v55  ;;  %2850 = vpow2.f32 %v2720_v46  ;;  %v1121_v62 = vpop.f32.mrf.mxu3  ;;  %v1202_v46 = vadd.f32 %v3770_v45, %v1201_v32  ;;  %v3849_v32 = vld [vmem:[#allocation11 + $0x28] sm:$0xff] }
 0x2c7   :  { %v1144_v15 = vadd.f32 %v1121_v62, %v1101_v47 }
 0x2c8   :  { %2852 = vrcp.f32 %v3737_v56  ;;  %v1046_v43 = vand.u32 2147483648, %v3737_v56  ;;  %vm1040_vm4 = vweird.f32 %v3737_v56  ;;  %v1044_v36 = vand.u32 2147483647, %v3737_v56 }
 0x2c9   :  { %v2719_v52 = vmul.f32 -1.442695, %v1144_v15  ;;  %v1103_v15 = vld [vmem:[#allocation3 + $0x58] sm:$0xff] }
 0x2ca   :  { %v1047_v55 = vor.u32 1.1754944e-38, %v1046_v43  ;;  %vm1045_vm9 = vcmp.eq.f32.partialorder %v1044_v36, 8.507059e+37  ;;  %v3817_v43 = vld [vmem:[#allocation11 + $0x8] sm:$0xff]  ;;  %v3858_v36 = vld [vmem:[#allocation9 + $0x58] sm:$0xff] }
 0x2cb   :  { %v2849_v24 = vpop.eup %2848  ;;  %2854 = vpow2.f32 %v2719_v52 }
 0x2cc   :  { %v2851_v57 = vpop.eup %2850  ;;  %v1014_v60 = vadd.f32 1.0, %v2849_v24 }
 0x2cd   :  { %v3740_v18 = vadd.f32 1.0, %v2851_v57 }
 0x2ce   :  { %2856 = vrcp.f32 %v1014_v60  ;;  %v3742_v59 = vpop.eup %2852  ;;  %v1026_v39 = vand.u32 2147483648, %v1014_v60  ;;  %v1024_v2 = vand.u32 2147483647, %v1014_v60  ;;  %vm1020_vm14 = vweird.f32 %v1014_v60 }
 0x2cf   :  { %2858 = vrcp.f32 %v3740_v18  ;;  %v1036_v48 = vmul.f32 %v3742_v59, %v3737_v56  ;;  %vm1041_vm2 = vweird.f32 %v3742_v59  ;;  %v1180_v57 = vand.u32 2147483648, %v3740_v18 }
 0x2d0   :  { %v1027_v3 = vor.u32 1.1754944e-38, %v1026_v39  ;;  %vm1025_vm1 = vcmp.eq.f32.partialorder %v1024_v2, 8.507059e+37  ;;  %vm3760_vm5 = vmor %vm1040_vm4, %vm1041_vm2  ;;  %vm1174_vm12 = vweird.f32 %v3740_v18 }
 0x2d1   :  { %v2855_v34 = vpop.eup %2854  ;;  %v1037_v50 = vsub.f32 1.0, %v1036_v48  ;;  %v1181_v58 = vor.u32 1.1754944e-38, %v1180_v57 }
 0x2d2   :  { %v1148_v19 = vadd.f32 1.0, %v2855_v34 }
 0x2d3   :  { %v1038_v63 = vmul.f32 %v3742_v59, %v1037_v50 }
 0x2d4   :  { %v2857_v21 = vpop.eup %2856  ;;  %2860 = vrcp.f32 %v1148_v19  ;;  %v1160_v30 = vand.u32 2147483648, %v1148_v19  ;;  %v1158_v35 = vand.u32 2147483647, %v1148_v19  ;;  %vm1154_vm6 = vweird.f32 %v1148_v19 }
 0x2d5   :  { %v3747_v6 = vpop.eup %2858  ;;  %v1016_v61 = vmul.f32 %v2857_v21, %v1014_v60  ;;  %vm1021_vm13 = vweird.f32 %v2857_v21  ;;  %v1039_v29 = vadd.f32 %v3742_v59, %v1038_v63 }
 0x2d6   :  { %v1170_v16 = vmul.f32 %v3747_v6, %v3740_v18  ;;  %vm1022_vm15 = vmor %vm1020_vm14, %vm1021_vm13  ;;  %v1161_v47 = vor.u32 1.1754944e-38, %v1160_v30  ;;  %vm1159_vm8 = vcmp.eq.f32.partialorder %v1158_v35, 8.507059e+37  ;;  %vm1175_vm11 = vweird.f32 %v3747_v6  ;;  %v3843_v30 = vld [vmem:[#allocation11] sm:$0xff]  ;;  %v3855_v35 = vld [vmem:[#allocation9 + $0x30] sm:$0xff] }
 0x2d7   :  { %v1017_v53 = vsub.f32 1.0, %v1016_v61  ;;  %v1043_v44 = vsel %vm3760_vm5, %v3742_v59, %v1039_v29  ;;  %v1178_v59 = vand.u32 2147483647, %v3740_v18  ;;  %vm1176_vm13 = vmor %vm1174_vm12, %vm1175_vm11  ;;  %v3840_v29 = vld [vmem:[#allocation9 + $0x18] sm:$0xff] }
 0x2d8   :  { %v1171_v27 = vsub.f32 1.0, %v1170_v16  ;;  %v1048_v24 = vsel %vm1045_vm9, %v1047_v55, %v1043_v44  ;;  %v3879_v44 = vld [vmem:[#allocation9 + $0x50] sm:$0xff]  ;;  %v3888_v55 = vld [vmem:[#allocation9 + $0x20] sm:$0xff] }
 0x2d9   :  { %v1018_v23 = vmul.f32 %v2857_v21, %v1017_v53  ;;  %v1073_v48 = vsub.f32 1.0, %v1048_v24  ;;  %v1075_v50 = vmul.f32 %v1048_v24, %v3644_v5  ;;  %vm1179_vm14 = vcmp.eq.f32.partialorder %v1178_v59, 8.507059e+37 }
 0x2da   :  { %v2861_v9 = vpop.eup %2860  ;;  %v1172_v37 = vmul.f32 %v3747_v6, %v1171_v27 }
 0x2db   :  { %v1019_v0 = vadd.f32 %v2857_v21, %v1018_v23  ;;  %v1150_v54 = vmul.f32 %v2861_v9, %v1148_v19  ;;  %vm1155_vm3 = vweird.f32 %v2861_v9 }
 0x2dc   :  { %vm1156_vm7 = vmor %vm1154_vm6, %vm1155_vm3  ;;  %v1173_v62 = vadd.f32 %v3747_v6, %v1172_v37  ;;  %v3861_v37 = vld [vmem:[#allocation11 + $0x20] sm:$0xff] }
 0x2dd   :  { %v1023_v4 = vsel %vm1022_vm15, %v2857_v21, %v1019_v0  ;;  %v1151_v13 = vsub.f32 1.0, %v1150_v54 }
 0x2de   :  { %v1028_v14 = vsel %vm1025_vm1, %v1027_v3, %v1023_v4  ;;  %v1177_v19 = vsel %vm1176_vm13, %v3747_v6, %v1173_v62  ;;  %v3803_v3 = vld [vmem:[#allocation8 + $0x50] sm:$0xff]  ;;  %v3826_v4 = vld [vmem:[#allocation8 + $0x40] sm:$0xff]  ;;  %v3894_v62 = vld [vmem:[#allocation11 + $0x48] sm:$0xff] }
 0x2df   :  { %v1070_v31 = vmul.f32 %v1068_v1, %v1028_v14  ;;  %v1152_v33 = vmul.f32 %v2861_v9, %v1151_v13  ;;  %v1182_v53 = vsel %vm1179_vm14, %v1181_v58, %v1177_v19  ;;  %v3829_v13 = vld [vmem:[#allocation11 + $0x38] sm:$0xff]  ;;  %v3837_v14 = vld [vmem:[#allocation11 + $0x30] sm:$0xff] }
 0x2e0   :  { %v1207_v6 = vsub.f32 1.0, %v1182_v53  ;;  %v1209_v0 = vmul.f32 %v1182_v53, %v3667_v7  ;;  %v3814_v7 = vld [vmem:[#allocation8 + $0x48] sm:$0xff]  ;;  %v1407_v53 = vld [vmem:[#allocation3 + $0x60] sm:$0xff] }
 0x2e1   :  { %v1071_v41 = vadd.f32 %v1070_v31, %v1008_v49  ;;  %v1153_v42 = vadd.f32 %v2861_v9, %v1152_v33  ;;  %v3846_v31 = vld [vmem:[#allocation9 + $0x38] sm:$0xff]  ;;  %v3852_v33 = vld [vmem:[#allocation9 + $0x10] sm:$0xff] }
 0x2e3   :  { %2862 = vtanh.f32 %v1071_v41  ;;  %v1157_v56 = vsel %vm1156_vm7, %v2861_v9, %v1153_v42  ;;  %v3795_v9 = vld [vmem:[#allocation11 + $0x18] sm:$0xff]  ;;  %v3874_v42 = vld [vmem:[#allocation9 + $0x28] sm:$0xff] }
 0x2e4   :  { %v1162_v52 = vsel %vm1159_vm8, %v1161_v47, %v1157_v56  ;;  %v3871_v41 = vld [vmem:[#allocation11 + $0x58] sm:$0xff]  ;;  %v3885_v47 = vld [vmem:[#allocation9] sm:$0xff]  ;;  %v3891_v56 = vld [vmem:[#allocation9 + $0x48] sm:$0xff] }
 0x2e5   :  { %v1204_v60 = vmul.f32 %v1202_v46, %v1162_v52  ;;  %v3882_v46 = vld [vmem:[#allocation11 + $0x50] sm:$0xff]  ;;  %v3902_v52 = vld [vmem:[#allocation11 + $0x40] sm:$0xff] }
 0x2e7   :  { %v1205_v34 = vadd.f32 %v1204_v60, %v1103_v15  ;;  %v3898_v15 = vld [vmem:[#allocation9 + $0x40] sm:$0xff] }
 0x2e8   :  { %v3914_v60 = vld [vmem:[%s4267_s5] ss:$0 sm:$0xff] }
 0x2e9   :  { %v2863_v21 = vpop.eup %2862  ;;  %2864 = vtanh.f32 %v1205_v34  ;;  %4319 = vst [vmem:[#allocation26_spill] sm:$0xff] %v3914_v60 }
 0x2ea   :  { %v1074_v61 = vmul.f32 %v2863_v21, %v1073_v48 }
 0x2ec   :  { %v3780_v39 = vadd.f32 %v1075_v50, %v1074_v61 }
 0x2ee   :  { %v1078_v16 = vrot.slane %v3780_v39, 1  ;;  %v1079_v23 = vrot.slane %v3780_v39, 2  ;;  %v1080_v18 = vrot.slane %v3780_v39, 3  ;;  %1092 = vst.msk [vmem:[#allocation12 + $0x2] sm:$0x1] %vm479_vm10, %v3780_v39  ;;  %2722 = vmatmul.msk.f32.vlgmr.msrb.gmra.mxu2 %vm117_vm0, %v3780_v39  ;;  %2723 = vmatmul.msk.f32.vlgmr.msrb.gmra.mxu3 %vm117_vm0, %v3780_v39  ;;  %v1081_v2 = vrot.slane %v3780_v39, 4 }
 0x2ef   :  { %v2865_v5 = vpop.eup %2864  ;;  %1502 = vmatpush.msrb.mxu2 %v3792_v51  ;;  %1531 = vmatpush.msrb.mxu3 %v3795_v9  ;;  %v1082_v63 = vrot.slane %v3780_v39, 5  ;;  %v1083_v49 = vrot.slane %v3780_v39, 6  ;;  %v1084_v1 = vrot.slane %v3780_v39, 7 }
 0x2f0   :  { %1093 = vst.msk [vmem:[#allocation12 + $0xa] sm:$0x1] %vm479_vm10, %v1078_v16  ;;  %v1208_v54 = vmul.f32 %v2865_v5, %v1207_v6  ;;  %v1408_v16 = vld [vmem:[#allocation3 + $0x68] sm:$0xff] }
 0x2f1   :  { %1094 = vst.msk [vmem:[#allocation12 + $0x12] sm:$0x1] %vm479_vm10, %v1079_v23  ;;  %1503 = vmatpush.msrb.mxu2 %v3803_v3  ;;  %1532 = vmatpush.msrb.mxu3 %v3806_v38 }
 0x2f2   :  { %1095 = vst.msk [vmem:[#allocation12 + $0x1a] sm:$0x1] %vm479_vm10, %v1080_v18  ;;  %v3811_v27 = vadd.f32 %v1209_v0, %v1208_v54 }
 0x2f3   :  { %1096 = vst.msk [vmem:[#allocation12 + $0x22] sm:$0x1] %vm479_vm10, %v1081_v2  ;;  %1504 = vmatpush.msrb.mxu2 %v3814_v7  ;;  %1533 = vmatpush.msrb.mxu3 %v3817_v43 }
 0x2f4   :  { %1097 = vst.msk [vmem:[#allocation12 + $0x2a] sm:$0x1] %vm479_vm10, %v1082_v63  ;;  %2724 = vmatmul.msk.f32.vlgmr.msra.gmra.mxu0 %vm117_vm0, %v3811_v27  ;;  %2725 = vmatmul.msk.f32.vlgmr.msra.gmra.mxu1 %vm117_vm0, %v3811_v27 }
 0x2f5   :  { %1098 = vst.msk [vmem:[#allocation12 + $0x32] sm:$0x1] %vm479_vm10, %v1083_v49  ;;  %1505 = vmatpush.msrb.mxu2 %v3826_v4  ;;  %1551 = vmatpush.msra.mxu0 %v3829_v13 }
 0x2f6   :  { %1099 = vst.msk [vmem:[#allocation12 + $0x3a] sm:$0x1] %vm479_vm10, %v1084_v1  ;;  %2726 = vmatmul.msk.f32.vlgmr.msra.gmra.mxu2 %vm117_vm0, %v3811_v27  ;;  %2729 = vmatmul.msk.f32.vlgmr.msra.gmra.mxu3 %vm117_vm0, %v3780_v39 }
 0x2f7   :  { %1552 = vmatpush.msra.mxu0 %v3837_v14  ;;  %1574 = vmatpush.msra.mxu1 %v3840_v29 }
 0x2f8   :  { %1534 = vmatpush.msrb.mxu3 %v3843_v30  ;;  %1594 = vmatpush.msra.mxu2 %v3846_v31 }
 0x2f9   :  { %1553 = vmatpush.msra.mxu0 %v3849_v32  ;;  %1575 = vmatpush.msra.mxu1 %v3852_v33 }
 0x2fa   :  { %1595 = vmatpush.msra.mxu2 %v3855_v35  ;;  %1614 = vmatpush.msra.mxu3 %v3858_v36 }
 0x2fb   :  { %1554 = vmatpush.msra.mxu0 %v3861_v37  ;;  %1576 = vmatpush.msra.mxu1 %v3864_v40 }
 0x2fc   :  { %2730 = vmatmul.msk.f32.vlgmr.msrb.gmra.mxu0 %vm117_vm0, %v3811_v27  ;;  %2731 = vmatmul.msk.f32.vlgmr.msrb.gmra.mxu1 %vm117_vm0, %v3811_v27 }
 0x2fd   :  { %1674 = vmatpush.msrb.mxu0 %v3871_v41  ;;  %1596 = vmatpush.msra.mxu2 %v3874_v42 }
 0x2fe   :  { %2734 = vmatmul.msk.f32.vlgmr.msrb.gmra.mxu2 %vm117_vm0, %v3811_v27  ;;  %1615 = vmatpush.msra.mxu3 %v3879_v44 }
 0x2ff   :  { %1675 = vmatpush.msrb.mxu0 %v3882_v46  ;;  %1577 = vmatpush.msra.mxu1 %v3885_v47 }
 0x300   :  { %1597 = vmatpush.msra.mxu2 %v3888_v55  ;;  %1616 = vmatpush.msra.mxu3 %v3891_v56 }
 0x301   :  { %1676 = vmatpush.msrb.mxu0 %v3894_v62  ;;  %1728 = vmatpush.msrb.mxu1 %v3709_v8 }
 0x302   :  { %1617 = vmatpush.msra.mxu3 %v3898_v15  ;;  %1748 = vmatpush.msrb.mxu2 %v3713_v11 }
 0x303   :  { %1677 = vmatpush.msrb.mxu0 %v3902_v52  ;;  %1729 = vmatpush.msrb.mxu1 %v3717_v12 }
 0x304   :  { %1749 = vmatpush.msrb.mxu2 %v3720_v17 }
 0x305   :  { %1730 = vmatpush.msrb.mxu1 %v3723_v22 }
 0x306   :  { %1750 = vmatpush.msrb.mxu2 %v3726_v25 }
 0x307   :  { %1731 = vmatpush.msrb.mxu1 %v3729_v26 }
 0x308   :  { %1751 = vmatpush.msrb.mxu2 %v3732_v28 }
 0x371   :  { %v1273_v24 = vpop.f32.mrf.mxu0  ;;  %v1293_v57 = vpop.f32.mrf.mxu1 }
 0x372   :  { %v1274_v59 = vadd.f32 %v3914_v60, %v1273_v24  ;;  %v1294_v34 = vadd.f32 %v1293_v57, %v4307_v10  ;;  %v1230_v48 = vpop.f32.mrf.mxu2  ;;  %v1250_v19 = vpop.f32.mrf.mxu3 }
 0x374   :  { %v1316_v21 = vadd.f32 %v1274_v59, %v1230_v48  ;;  %v1336_v58 = vadd.f32 %v1294_v34, %v1250_v19 }
 0x376   :  { %v2727_v61 = vmul.f32 -1.442695, %v1316_v21  ;;  %v2728_v50 = vmul.f32 -1.442695, %v1336_v58 }
 0x378   :  { %2866 = vpow2.f32 %v2727_v61 }
 0x379   :  { %2868 = vpow2.f32 %v2728_v50  ;;  %v1427_v23 = vpop.f32.mrf.mxu0  ;;  %v1447_v18 = vpop.f32.mrf.mxu1 }
 0x37a   :  { %v1450_v6 = vadd.f32 %v1427_v23, %v1407_v53  ;;  %v1470_v5 = vadd.f32 %v1447_v18, %v1408_v16  ;;  %v1313_v21 = vpop.f32.mrf.mxu2 }
 0x37c   :  { %v2732_v2 = vmul.f32 -1.442695, %v1450_v6  ;;  %v2733_v63 = vmul.f32 -1.442695, %v1470_v5  ;;  %v1373_v6 = vpop.f32.mrf.mxu3 }
 0x37e   :  { %v2867_v0 = vpop.eup %2866  ;;  %2870 = vpow2.f32 %v2732_v2 }
 0x37f   :  { %v2869_v54 = vpop.eup %2868  ;;  %v1320_v49 = vadd.f32 1.0, %v2867_v0  ;;  %2872 = vpow2.f32 %v2733_v63  ;;  %v1314_v0 = vadd.f32 %v1313_v21, %v3529_v20 }
 0x380   :  { %v1340_v1 = vadd.f32 1.0, %v2869_v54 }
 0x381   :  { %2874 = vrcp.f32 %v1320_v49  ;;  %v1332_v16 = vand.u32 2147483648, %v1320_v49  ;;  %v1330_v18 = vand.u32 2147483647, %v1320_v49  ;;  %vm1326_vm1 = vweird.f32 %v1320_v49 }
 0x382   :  { %2876 = vrcp.f32 %v1340_v1  ;;  %v1507_v25 = vpop.f32.mrf.mxu2  ;;  %vm1346_vm6 = vweird.f32 %v1340_v1  ;;  %v1350_v22 = vand.u32 2147483647, %v1340_v1 }
 0x383   :  { %v1333_v10 = vor.u32 1.1754944e-38, %v1332_v16  ;;  %vm1331_vm3 = vcmp.eq.f32.partialorder %v1330_v18, 8.507059e+37 }
 0x384   :  { %v2871_v24 = vpop.eup %2870  ;;  %vm1351_vm12 = vcmp.eq.f32.partialorder %v1350_v22, 8.507059e+37 }
 0x385   :  { %v2873_v57 = vpop.eup %2872  ;;  %v1454_v59 = vadd.f32 1.0, %v2871_v24 }
 0x386   :  { %v3918_v34 = vadd.f32 1.0, %v2873_v57  ;;  %v1352_v57 = vand.u32 2147483648, %v1340_v1 }
 0x387   :  { %v2875_v48 = vpop.eup %2874  ;;  %2878 = vrcp.f32 %v1454_v59  ;;  %v1466_v28 = vand.u32 2147483648, %v1454_v59  ;;  %v1464_v16 = vand.u32 2147483647, %v1454_v59  ;;  %vm1460_vm8 = vweird.f32 %v1454_v59 }
 0x388   :  { %v2877_v19 = vpop.eup %2876  ;;  %v1322_v58 = vmul.f32 %v2875_v48, %v1320_v49  ;;  %2880 = vrcp.f32 %v3918_v34  ;;  %vm1327_vm15 = vweird.f32 %v2875_v48  ;;  %vm1480_vm14 = vweird.f32 %v3918_v34 }
 0x389   :  { %v1342_v61 = vmul.f32 %v2877_v19, %v1340_v1  ;;  %vm1328_vm2 = vmor %vm1326_vm1, %vm1327_vm15  ;;  %vm1347_vm4 = vweird.f32 %v2877_v19  ;;  %vm1465_vm11 = vcmp.eq.f32.partialorder %v1464_v16, 8.507059e+37 }
 0x38a   :  { %v1323_v50 = vsub.f32 1.0, %v1322_v58  ;;  %v3925_v58 = vld [vmem:[%s4269_s7] ss:$0 sm:$0xff]  ;;  %vm3929_vm7 = vmor %vm1346_vm6, %vm1347_vm4 }
 0x38b   :  { %v1343_v53 = vsub.f32 1.0, %v1342_v61  ;;  %v1374_v61 = vadd.f32 %v3925_v58, %v1373_v6 }
 0x38c   :  { %v1324_v23 = vmul.f32 %v2875_v48, %v1323_v50 }
 0x38d   :  { %v2879_v5 = vpop.eup %2878  ;;  %v1344_v2 = vmul.f32 %v2877_v19, %v1343_v53 }
 0x38e   :  { %v2881_v63 = vpop.eup %2880  ;;  %v1325_v54 = vadd.f32 %v2875_v48, %v1324_v23  ;;  %v1456_v24 = vmul.f32 %v2879_v5, %v1454_v59  ;;  %vm1461_vm5 = vweird.f32 %v2879_v5  ;;  %v1484_v59 = vand.u32 2147483647, %v3918_v34 }
 0x38f   :  { %v1476_v50 = vmul.f32 %v2881_v63, %v3918_v34  ;;  %v1345_v49 = vadd.f32 %v2877_v19, %v1344_v2  ;;  %vm1462_vm9 = vmor %vm1460_vm8, %vm1461_vm5  ;;  %v1508_v2 = vadd.f32 %v3770_v45, %v1507_v25  ;;  %vm1481_vm13 = vweird.f32 %v2881_v63 }
 0x390   :  { %v1329_v60 = vsel %vm1328_vm2, %v2875_v48, %v1325_v54  ;;  %v1457_v53 = vsub.f32 1.0, %v1456_v24  ;;  %v1353_v54 = vor.u32 1.1754944e-38, %v1352_v57  ;;  %vm1482_vm15 = vmor %vm1480_vm14, %vm1481_vm13  ;;  %vm1485_vm1 = vcmp.eq.f32.partialorder %v1484_v59, 8.507059e+37 }
 0x391   :  { %v1334_v21 = vsel %vm1331_vm3, %v1333_v10, %v1329_v60  ;;  %v1477_v23 = vsub.f32 1.0, %v1476_v50  ;;  %v1349_v10 = vsel %vm3929_vm7, %v2877_v19, %v1345_v49  ;;  %v1467_v60 = vor.u32 1.1754944e-38, %v1466_v28 }
 0x392   :  { %v1376_v20 = vmul.f32 %v1374_v61, %v1334_v21  ;;  %v1458_v26 = vmul.f32 %v2879_v5, %v1457_v53  ;;  %v1409_v61 = vld [vmem:[#allocation3 + $0x70] sm:$0xff]  ;;  %v1354_v53 = vsel %vm1351_vm12, %v1353_v54, %v1349_v10  ;;  %v4323_v54 = vld [vmem:[#allocation21_spill] sm:$0xff] }
 0x393   :  { %v1478_v17 = vmul.f32 %v2881_v63, %v1477_v23  ;;  %v1379_v25 = vsub.f32 1.0, %v1354_v53 }
 0x394   :  { %v1377_v48 = vadd.f32 %v1376_v20, %v1314_v0  ;;  %v1459_v18 = vadd.f32 %v2879_v5, %v1458_v26  ;;  %v1486_v20 = vand.u32 2147483648, %v3918_v34 }
 0x395   :  { %v1479_v1 = vadd.f32 %v2881_v63, %v1478_v17  ;;  %v1381_v17 = vmul.f32 %v1354_v53, %v3780_v39 }
 0x396   :  { %2882 = vtanh.f32 %v1377_v48  ;;  %v1463_v24 = vsel %vm1462_vm9, %v2879_v5, %v1459_v18  ;;  %v1487_v5 = vor.u32 1.1754944e-38, %v1486_v20 }
 0x397   :  { %v1468_v50 = vsel %vm1465_vm11, %v1467_v60, %v1463_v24  ;;  %v1483_v19 = vsel %vm1482_vm15, %v2881_v63, %v1479_v1  ;;  %v4324_v24 = vld [vmem:[#allocation22_spill] sm:$0xff]  ;;  %v4325_v1 = vld [vmem:[#allocation23_spill] sm:$0xff] }
 0x398   :  { %v1510_v26 = vmul.f32 %v1508_v2, %v1468_v50  ;;  %v1488_v57 = vsel %vm1485_vm1, %v1487_v5, %v1483_v19 }
 0x399   :  { %v1513_v63 = vsub.f32 1.0, %v1488_v57  ;;  %v1515_v18 = vmul.f32 %v1488_v57, %v3811_v27  ;;  %v4322_v27 = vld [vmem:[#allocation20_spill] sm:$0xff] }
 0x39a   :  { %v1511_v28 = vadd.f32 %v1510_v26, %v1409_v61  ;;  %v4326_v61 = vld [vmem:[#allocation24_spill] sm:$0xff] }
 0x39c   :  { %v2883_v0 = vpop.eup %2882  ;;  %2884 = vtanh.f32 %v1511_v28  ;;  %v1713_v28 = vld [vmem:[#allocation3 + $0x78] sm:$0xff] }
 0x39d   :  { %v1380_v22 = vmul.f32 %v2883_v0, %v1379_v25 }
 0x39f   :  { %v3940_v21 = vadd.f32 %v1381_v17, %v1380_v22 }
 0x3a1   :  { %v1384_v49 = vrot.slane %v3940_v21, 1  ;;  %v1385_v23 = vrot.slane %v3940_v21, 2  ;;  %v1386_v34 = vrot.slane %v3940_v21, 3  ;;  %1398 = vst.msk [vmem:[#allocation12 + $0x3] sm:$0x1] %vm479_vm10, %v3940_v21  ;;  %2735 = vmatmul.msk.f32.vlgmr.msrb.gmra.mxu3 %vm117_vm0, %v3940_v21  ;;  %2736 = vmatmul.msk.f32.vlgmr.msra.gmra.mxu0 %vm117_vm0, %v3940_v21  ;;  %v1387_v16 = vrot.slane %v3940_v21, 4 }
 0x3a2   :  { %v2885_v39 = vpop.eup %2884  ;;  %1808 = vmatpush.msrb.mxu3 %v3792_v51  ;;  %1837 = vmatpush.msra.mxu0 %v3795_v9  ;;  %v1388_v6 = vrot.slane %v3940_v21, 5  ;;  %v1389_v10 = vrot.slane %v3940_v21, 6  ;;  %v1390_v60 = vrot.slane %v3940_v21, 7 }
 0x3a3   :  { %1399 = vst.msk [vmem:[#allocation12 + $0xb] sm:$0x1] %vm479_vm10, %v1384_v49  ;;  %v1514_v48 = vmul.f32 %v2885_v39, %v1513_v63  ;;  %v1714_v49 = vld [vmem:[#allocation3 + $0x80] sm:$0xff] }
 0x3a4   :  { %1400 = vst.msk [vmem:[#allocation12 + $0x13] sm:$0x1] %vm479_vm10, %v1385_v23  ;;  %1809 = vmatpush.msrb.mxu3 %v3803_v3  ;;  %1838 = vmatpush.msra.mxu0 %v3806_v38 }
 0x3a5   :  { %1401 = vst.msk [vmem:[#allocation12 + $0x1b] sm:$0x1] %vm479_vm10, %v1386_v34  ;;  %v3963_v2 = vadd.f32 %v1515_v18, %v1514_v48 }
 0x3a6   :  { %1402 = vst.msk [vmem:[#allocation12 + $0x23] sm:$0x1] %vm479_vm10, %v1387_v16  ;;  %1810 = vmatpush.msrb.mxu3 %v3814_v7  ;;  %1839 = vmatpush.msra.mxu0 %v3817_v43 }
 0x3a7   :  { %1403 = vst.msk [vmem:[#allocation12 + $0x2b] sm:$0x1] %vm479_vm10, %v1388_v6  ;;  %2737 = vmatmul.msk.f32.vlgmr.msra.gmra.mxu1 %vm117_vm0, %v3963_v2  ;;  %2738 = vmatmul.msk.f32.vlgmr.msra.gmra.mxu2 %vm117_vm0, %v3963_v2 }
 0x3a8   :  { %1404 = vst.msk [vmem:[#allocation12 + $0x33] sm:$0x1] %vm479_vm10, %v1389_v10  ;;  %1811 = vmatpush.msrb.mxu3 %v3826_v4  ;;  %1857 = vmatpush.msra.mxu1 %v3829_v13 }
 0x3a9   :  { %1405 = vst.msk [vmem:[#allocation12 + $0x3b] sm:$0x1] %vm479_vm10, %v1390_v60  ;;  %2739 = vmatmul.msk.f32.vlgmr.msra.gmra.mxu3 %vm117_vm0, %v3963_v2  ;;  %2742 = vmatmul.msk.f32.vlgmr.msrb.gmra.mxu0 %vm117_vm0, %v3940_v21 }
 0x3aa   :  { %1858 = vmatpush.msra.mxu1 %v3837_v14  ;;  %1880 = vmatpush.msra.mxu2 %v3840_v29 }
 0x3ab   :  { %1840 = vmatpush.msra.mxu0 %v3843_v30  ;;  %1900 = vmatpush.msra.mxu3 %v3846_v31 }
 0x3ac   :  { %1859 = vmatpush.msra.mxu1 %v3849_v32  ;;  %1881 = vmatpush.msra.mxu2 %v3852_v33 }
 0x3ad   :  { %1901 = vmatpush.msra.mxu3 %v3855_v35  ;;  %1920 = vmatpush.msrb.mxu0 %v3858_v36 }
 0x3ae   :  { %1860 = vmatpush.msra.mxu1 %v3861_v37  ;;  %1882 = vmatpush.msra.mxu2 %v3864_v40 }
 0x3af   :  { %2743 = vmatmul.msk.f32.vlgmr.msrb.gmra.mxu1 %vm117_vm0, %v3963_v2  ;;  %2744 = vmatmul.msk.f32.vlgmr.msrb.gmra.mxu2 %vm117_vm0, %v3963_v2 }
 0x3b0   :  { %1980 = vmatpush.msrb.mxu1 %v3871_v41  ;;  %1902 = vmatpush.msra.mxu3 %v3874_v42 }
 0x3b1   :  { %2747 = vmatmul.msk.f32.vlgmr.msrb.gmra.mxu3 %vm117_vm0, %v3963_v2  ;;  %1921 = vmatpush.msrb.mxu0 %v3879_v44 }
 0x3b2   :  { %1981 = vmatpush.msrb.mxu1 %v3882_v46  ;;  %1883 = vmatpush.msra.mxu2 %v3885_v47 }
 0x3b3   :  { %1903 = vmatpush.msra.mxu3 %v3888_v55  ;;  %1922 = vmatpush.msrb.mxu0 %v3891_v56 }
 0x3b4   :  { %1982 = vmatpush.msrb.mxu1 %v3894_v62  ;;  %2034 = vmatpush.msrb.mxu2 %v3709_v8  ;;  %v4327_v8 = vld [vmem:[#allocation26_spill] sm:$0xff] }
 0x3b5   :  { %1923 = vmatpush.msrb.mxu0 %v3898_v15  ;;  %2054 = vmatpush.msrb.mxu3 %v3713_v11 }
 0x3b6   :  { %1983 = vmatpush.msrb.mxu1 %v3902_v52  ;;  %2035 = vmatpush.msrb.mxu2 %v3717_v12  ;;  %v4328_v12 = vld [vmem:[#allocation25_spill] sm:$0xff] }
 0x3b7   :  { %2055 = vmatpush.msrb.mxu3 %v4322_v27 }
 0x3b8   :  { %2036 = vmatpush.msrb.mxu2 %v4323_v54 }
 0x3b9   :  { %2056 = vmatpush.msrb.mxu3 %v4324_v24 }
 0x3ba   :  { %2037 = vmatpush.msrb.mxu2 %v4325_v1 }
 0x3bb   :  { %2057 = vmatpush.msrb.mxu3 %v4326_v61 }
 0x41e   :  { %v1556_v19 = vpop.f32.mrf.mxu0 }
 0x424   :  { %v1579_v50 = vpop.f32.mrf.mxu1  ;;  %v1536_v20 = vpop.f32.mrf.mxu3 }
 0x425   :  { %v1580_v53 = vadd.f32 %v4327_v8, %v1579_v50 }
 0x427   :  { %v1622_v26 = vadd.f32 %v1580_v53, %v1536_v20 }
 0x429   :  { %v2740_v11 = vmul.f32 -1.442695, %v1622_v26 }
 0x42a   :  { %v1599_v59 = vpop.f32.mrf.mxu2 }
 0x42b   :  { %2886 = vpow2.f32 %v2740_v11  ;;  %v1600_v25 = vadd.f32 %v1599_v59, %v4328_v12  ;;  %v1679_v11 = vpop.f32.mrf.mxu0 }
 0x42c   :  { %v1733_v0 = vpop.f32.mrf.mxu1  ;;  %v1619_v1 = vpop.f32.mrf.mxu3 }
 0x42d   :  { %v1642_v5 = vadd.f32 %v1600_v25, %v1556_v19  ;;  %v1756_v22 = vadd.f32 %v1733_v0, %v1713_v28 }
 0x42f   :  { %v2741_v17 = vmul.f32 -1.442695, %v1642_v5  ;;  %v2745_v57 = vmul.f32 -1.442695, %v1756_v22  ;;  %v1680_v22 = vadd.f32 %v3925_v58, %v1679_v11 }
 0x431   :  { %v2887_v23 = vpop.eup %2886  ;;  %2888 = vpow2.f32 %v2741_v17 }
 0x432   :  { %v1626_v34 = vadd.f32 1.0, %v2887_v23  ;;  %2890 = vpow2.f32 %v2745_v57  ;;  %v1753_v63 = vpop.f32.mrf.mxu2  ;;  %v4329_v23 = vld [vmem:[#allocation27_spill] sm:$0xff] }
 0x433   :  { %v1776_v39 = vadd.f32 %v1753_v63, %v1714_v49  ;;  %v1620_v63 = vadd.f32 %v1619_v1, %v4329_v23 }
 0x434   :  { %2892 = vrcp.f32 %v1626_v34  ;;  %v1638_v61 = vand.u32 2147483648, %v1626_v34  ;;  %v1636_v20 = vand.u32 2147483647, %v1626_v34  ;;  %vm1632_vm3 = vweird.f32 %v1626_v34 }
 0x435   :  { %v2746_v16 = vmul.f32 -1.442695, %v1776_v39 }
 0x436   :  { %v1639_v19 = vor.u32 1.1754944e-38, %v1638_v61  ;;  %vm1637_vm5 = vcmp.eq.f32.partialorder %v1636_v20, 8.507059e+37  ;;  %v1813_v20 = vpop.f32.mrf.mxu3 }
 0x437   :  { %v2889_v6 = vpop.eup %2888  ;;  %2894 = vpow2.f32 %v2746_v16 }
 0x438   :  { %v2891_v48 = vpop.eup %2890  ;;  %v1646_v18 = vadd.f32 1.0, %v2889_v6 }
 0x439   :  { %v1760_v10 = vadd.f32 1.0, %v2891_v48 }
 0x43a   :  { %v2893_v60 = vpop.eup %2892  ;;  %2896 = vrcp.f32 %v1646_v18  ;;  %v1658_v49 = vand.u32 2147483648, %v1646_v18  ;;  %vm1652_vm8 = vweird.f32 %v1646_v18 }
 0x43b   :  { %v1628_v27 = vmul.f32 %v2893_v60, %v1626_v34  ;;  %2898 = vrcp.f32 %v1760_v10  ;;  %vm1633_vm2 = vweird.f32 %v2893_v60  ;;  %v1772_v48 = vand.u32 2147483648, %v1760_v10 }
 0x43c   :  { %vm1634_vm4 = vmor %vm1632_vm3, %vm1633_vm2  ;;  %v1656_v34 = vand.u32 2147483647, %v1646_v18  ;;  %v1659_v11 = vor.u32 1.1754944e-38, %v1658_v49  ;;  %vm1766_vm11 = vweird.f32 %v1760_v10 }
 0x43d   :  { %v2895_v54 = vpop.eup %2894  ;;  %v1629_v24 = vsub.f32 1.0, %v1628_v27 }
 0x43e   :  { %v4017_v50 = vadd.f32 1.0, %v2895_v54  ;;  %vm1657_vm13 = vcmp.eq.f32.partialorder %v1656_v34, 8.507059e+37 }
 0x43f   :  { %v1630_v53 = vmul.f32 %v2893_v60, %v1629_v24  ;;  %v1770_v24 = vand.u32 2147483647, %v1760_v10 }
 0x440   :  { %v2897_v26 = vpop.eup %2896  ;;  %2900 = vrcp.f32 %v4017_v50  ;;  %vm1786_vm1 = vweird.f32 %v4017_v50 }
 0x441   :  { %v2899_v59 = vpop.eup %2898  ;;  %v1631_v28 = vadd.f32 %v2893_v60, %v1630_v53  ;;  %v1648_v25 = vmul.f32 %v2897_v26, %v1646_v18  ;;  %vm1653_vm6 = vweird.f32 %v2897_v26  ;;  %vm1771_vm14 = vcmp.eq.f32.partialorder %v1770_v24, 8.507059e+37 }
 0x442   :  { %v1762_v0 = vmul.f32 %v2899_v59, %v1760_v10  ;;  %vm1767_vm7 = vweird.f32 %v2899_v59  ;;  %vm1654_vm9 = vmor %vm1652_vm8, %vm1653_vm6  ;;  %v1790_v10 = vand.u32 2147483647, %v4017_v50 }
 0x443   :  { %v1635_v5 = vsel %vm1634_vm4, %v2893_v60, %v1631_v28  ;;  %v1649_v17 = vsub.f32 1.0, %v1648_v25  ;;  %vm1768_vm12 = vmor %vm1766_vm11, %vm1767_vm7 }
 0x444   :  { %v1640_v57 = vsel %vm1637_vm5, %v1639_v19, %v1635_v5  ;;  %v1763_v39 = vsub.f32 1.0, %v1762_v0  ;;  %v1773_v19 = vor.u32 1.1754944e-38, %v1772_v48  ;;  %v1814_v5 = vadd.f32 %v3770_v45, %v1813_v20 }
 0x445   :  { %v1682_v16 = vmul.f32 %v1680_v22, %v1640_v57  ;;  %v1650_v6 = vmul.f32 %v2897_v26, %v1649_v17  ;;  %v1715_v17 = vld [vmem:[#allocation3 + $0x88] sm:$0xff]  ;;  %vm1791_vm3 = vcmp.eq.f32.partialorder %v1790_v10, 8.507059e+37 }
 0x446   :  { %v2901_v27 = vpop.eup %2900  ;;  %v1764_v54 = vmul.f32 %v2899_v59, %v1763_v39 }
 0x447   :  { %v1651_v60 = vadd.f32 %v2897_v26, %v1650_v6  ;;  %v1683_v61 = vadd.f32 %v1682_v16, %v1620_v63  ;;  %v1782_v53 = vmul.f32 %v2901_v27, %v4017_v50  ;;  %vm1787_vm15 = vweird.f32 %v2901_v27 }
 0x448   :  { %v1765_v28 = vadd.f32 %v2899_v59, %v1764_v54  ;;  %v1792_v63 = vand.u32 2147483648, %v4017_v50  ;;  %vm1788_vm2 = vmor %vm1786_vm1, %vm1787_vm15 }
 0x449   :  { %v1655_v1 = vsel %vm1654_vm9, %v2897_v26, %v1651_v60  ;;  %2902 = vtanh.f32 %v1683_v61  ;;  %v1783_v25 = vsub.f32 1.0, %v1782_v53 }
 0x44a   :  { %v1769_v0 = vsel %vm1768_vm12, %v2899_v59, %v1765_v28  ;;  %v1660_v18 = vsel %vm1657_vm13, %v1659_v11, %v1655_v1  ;;  %v1793_v34 = vor.u32 1.1754944e-38, %v1792_v63 }
 0x44b   :  { %v1784_v22 = vmul.f32 %v2901_v27, %v1783_v25  ;;  %v1774_v57 = vsel %vm1771_vm14, %v1773_v19, %v1769_v0  ;;  %v1685_v26 = vsub.f32 1.0, %v1660_v18  ;;  %v1687_v45 = vmul.f32 %v1660_v18, %v3940_v21 }
 0x44c   :  { %v1816_v49 = vmul.f32 %v1814_v5, %v1774_v57 }
 0x44d   :  { %v1785_v39 = vadd.f32 %v2901_v27, %v1784_v22 }
 0x44e   :  { %v1817_v16 = vadd.f32 %v1816_v49, %v1715_v17 }
 0x44f   :  { %v2903_v59 = vpop.eup %2902  ;;  %v1789_v6 = vsel %vm1788_vm2, %v2901_v27, %v1785_v39 }
 0x450   :  { %v1686_v48 = vmul.f32 %v2903_v59, %v1685_v26  ;;  %2904 = vtanh.f32 %v1817_v16  ;;  %v1794_v24 = vsel %vm1791_vm3, %v1793_v34, %v1789_v6 }
 0x451   :  { %v1819_v27 = vsub.f32 1.0, %v1794_v24  ;;  %v1821_v1 = vmul.f32 %v1794_v24, %v3963_v2 }
 0x452   :  { %v4028_v54 = vadd.f32 %v1687_v45, %v1686_v48 }
 0x454   :  { %v1690_v60 = vrot.slane %v4028_v54, 1  ;;  %v1691_v61 = vrot.slane %v4028_v54, 2  ;;  %v1692_v50 = vrot.slane %v4028_v54, 3  ;;  %1704 = vst.msk [vmem:[#allocation12 + $0x4] sm:$0x1] %vm479_vm10, %v4028_v54  ;;  %2748 = vmatmul.msk.f32.vlgmr.msra.gmra.mxu0 %vm117_vm0, %v4028_v54  ;;  %2749 = vmatmul.msk.f32.vlgmr.msra.gmra.mxu1 %vm117_vm0, %v4028_v54  ;;  %v1693_v21 = vrot.slane %v4028_v54, 4 }
 0x455   :  { %2114 = vmatpush.msra.mxu0 %v3792_v51  ;;  %2143 = vmatpush.msra.mxu1 %v3795_v9  ;;  %v1694_v20 = vrot.slane %v4028_v54, 5  ;;  %v1695_v11 = vrot.slane %v4028_v54, 6  ;;  %v1696_v51 = vrot.slane %v4028_v54, 7 }
 0x456   :  { %v2905_v53 = vpop.eup %2904  ;;  %1705 = vst.msk [vmem:[#allocation12 + $0xc] sm:$0x1] %vm479_vm10, %v1690_v60 }
 0x457   :  { %1706 = vst.msk [vmem:[#allocation12 + $0x14] sm:$0x1] %vm479_vm10, %v1691_v61  ;;  %v1820_v28 = vmul.f32 %v2905_v53, %v1819_v27  ;;  %2115 = vmatpush.msra.mxu0 %v3803_v3  ;;  %2144 = vmatpush.msra.mxu1 %v3806_v38  ;;  %v2995_v3 = vld [vmem:[#allocation8 + $0x18] sm:$0xff] }
 0x458   :  { %1707 = vst.msk [vmem:[#allocation12 + $0x1c] sm:$0x1] %vm479_vm10, %v1692_v50  ;;  %v2996_v38 = vld [vmem:[#allocation8 + $0x38] sm:$0xff] }
 0x459   :  { %1708 = vst.msk [vmem:[#allocation12 + $0x24] sm:$0x1] %vm479_vm10, %v1693_v21  ;;  %v4052_v9 = vadd.f32 %v1821_v1, %v1820_v28  ;;  %2116 = vmatpush.msra.mxu0 %v3814_v7  ;;  %2145 = vmatpush.msra.mxu1 %v3817_v43  ;;  %v2997_v7 = vld [vmem:[#allocation8 + $0x10] sm:$0xff] }
 0x45a   :  { %1709 = vst.msk [vmem:[#allocation12 + $0x2c] sm:$0x1] %vm479_vm10, %v1694_v20  ;;  %v2998_v43 = vld [vmem:[#allocation8 + $0x30] sm:$0xff] }
 0x45b   :  { %1710 = vst.msk [vmem:[#allocation12 + $0x34] sm:$0x1] %vm479_vm10, %v1695_v11  ;;  %2750 = vmatmul.msk.f32.vlgmr.msra.gmra.mxu2 %vm117_vm0, %v4052_v9  ;;  %2751 = vmatmul.msk.f32.vlgmr.msra.gmra.mxu3 %vm117_vm0, %v4052_v9 }
 0x45c   :  { %1711 = vst.msk [vmem:[#allocation12 + $0x3c] sm:$0x1] %vm479_vm10, %v1696_v51  ;;  %2752 = vmatmul.msk.f32.vlgmr.msrb.gmra.mxu0 %vm117_vm0, %v4052_v9  ;;  %2755 = vmatmul.msk.f32.vlgmr.msrb.gmra.mxu1 %vm117_vm0, %v4028_v54 }
 0x45d   :  { %2117 = vmatpush.msra.mxu0 %v3826_v4  ;;  %2163 = vmatpush.msra.mxu2 %v3829_v13  ;;  %v2999_v4 = vld [vmem:[#allocation8 + $0x8] sm:$0xff] }
 0x45e   :  { %2186 = vmatpush.msra.mxu3 %v3840_v29  ;;  %2146 = vmatpush.msra.mxu1 %v3843_v30  ;;  %v3000_v13 = vld [vmem:[#allocation8 + $0x28] sm:$0xff]  ;;  %v3002_v29 = vld [vmem:[#allocation8 + $0x20] sm:$0xff] }
 0x45f   :  { %2164 = vmatpush.msra.mxu2 %v3837_v14  ;;  %2206 = vmatpush.msrb.mxu0 %v3846_v31  ;;  %v3001_v14 = vld [vmem:[#allocation8] sm:$0xff] }
 0x460   :  { %2187 = vmatpush.msra.mxu3 %v3852_v33  ;;  %2226 = vmatpush.msrb.mxu1 %v3858_v36 }
 0x461   :  { %2165 = vmatpush.msra.mxu2 %v3849_v32  ;;  %2207 = vmatpush.msrb.mxu0 %v3855_v35 }
 0x462   :  { %2188 = vmatpush.msra.mxu3 %v3864_v40  ;;  %2227 = vmatpush.msrb.mxu1 %v3879_v44  ;;  %v2019_v44 = vld [vmem:[#allocation3 + $0x90] sm:$0xff] }
 0x463   :  { %2756 = vmatmul.msk.f32.vlgmr.msrb.gmra.mxu2 %vm117_vm0, %v4052_v9  ;;  %2757 = vmatmul.msk.f32.vlgmr.msrb.gmra.mxu3 %vm117_vm0, %v4052_v9 }
 0x464   :  { %2760 = vmatmul.msk.f32.vlgmr.msra.gmra.mxu0 %vm117_vm0, %v4052_v9  ;;  %2166 = vmatpush.msra.mxu2 %v3861_v37 }
 0x465   :  { %2208 = vmatpush.msrb.mxu0 %v3874_v42  ;;  %2189 = vmatpush.msra.mxu3 %v3885_v47 }
 0x466   :  { %2286 = vmatpush.msrb.mxu2 %v3871_v41  ;;  %2228 = vmatpush.msrb.mxu1 %v3891_v56 }
 0x467   :  { %2209 = vmatpush.msrb.mxu0 %v3888_v55  ;;  %2340 = vmatpush.msrb.mxu3 %v2995_v3 }
 0x468   :  { %2287 = vmatpush.msrb.mxu2 %v3882_v46  ;;  %2229 = vmatpush.msrb.mxu1 %v3898_v15  ;;  %v2020_v46 = vld [vmem:[#allocation3 + $0x98] sm:$0xff] }
 0x469   :  { %2360 = vmatpush.msra.mxu0 %v2996_v38  ;;  %2341 = vmatpush.msrb.mxu3 %v2997_v7 }
 0x46a   :  { %2288 = vmatpush.msrb.mxu2 %v3894_v62 }
 0x46b   :  { %2361 = vmatpush.msra.mxu0 %v2998_v43  ;;  %2342 = vmatpush.msrb.mxu3 %v2999_v4 }
 0x46c   :  { %2289 = vmatpush.msrb.mxu2 %v3902_v52 }
 0x46d   :  { %2362 = vmatpush.msra.mxu0 %v3000_v13  ;;  %2343 = vmatpush.msrb.mxu3 %v3001_v14 }
 0x46f   :  { %2363 = vmatpush.msra.mxu0 %v3002_v29 }
 0x4d1   :  { %v1842_v35 = vpop.f32.mrf.mxu0  ;;  %v1862_v36 = vpop.f32.mrf.mxu1 }
 0x4d9   :  { %v1925_v63 = vpop.f32.mrf.mxu0  ;;  %v1985_v59 = vpop.f32.mrf.mxu1 }
 0x4da   :  { %v1926_v60 = vadd.f32 %v1925_v63, %v4329_v23  ;;  %v1986_v21 = vadd.f32 %v3925_v58, %v1985_v59 }
 0x4de   :  { %v1885_v30 = vpop.f32.mrf.mxu2  ;;  %v1905_v31 = vpop.f32.mrf.mxu3 }
 0x4df   :  { %v1886_v32 = vadd.f32 %v4327_v8, %v1885_v30  ;;  %v1906_v33 = vadd.f32 %v1905_v31, %v4328_v12  ;;  %v3029_v31 = vld [vmem:[#allocation11 + $0x48] sm:$0xff] }
 0x4e1   :  { %v1928_v37 = vadd.f32 %v1886_v32, %v1842_v35  ;;  %v1948_v40 = vadd.f32 %v1906_v33, %v1862_v36  ;;  %v2119_v43 = vpop.f32.mrf.mxu0  ;;  %v4112_v35 = vld [vmem:[%s4265_s3] ss:$0 sm:$0xff] }
 0x4e2   :  { %v2120_v36 = vadd.f32 %v4112_v35, %v2119_v43  ;;  %v3023_v43 = vld [vmem:[#allocation9 + $0x28] sm:$0xff] }
 0x4e3   :  { %v2753_v41 = vmul.f32 -1.442695, %v1928_v37  ;;  %v2754_v42 = vmul.f32 -1.442695, %v1948_v40 }
 0x4e5   :  { %2906 = vpow2.f32 %v2753_v41 }
 0x4e6   :  { %2908 = vpow2.f32 %v2754_v42  ;;  %v2039_v47 = vpop.f32.mrf.mxu2  ;;  %v2059_v55 = vpop.f32.mrf.mxu3  ;;  %v2021_v42 = vld [vmem:[#allocation3 + $0xa0] sm:$0xff] }
 0x4e7   :  { %v2062_v56 = vadd.f32 %v2039_v47, %v2019_v44  ;;  %v2082_v62 = vadd.f32 %v2059_v55, %v2020_v46 }
 0x4e9   :  { %v2758_v15 = vmul.f32 -1.442695, %v2062_v56  ;;  %v2759_v52 = vmul.f32 -1.442695, %v2082_v62 }
 0x4eb   :  { %v2907_v2 = vpop.eup %2906  ;;  %2910 = vpow2.f32 %v2758_v15 }
 0x4ec   :  { %v2909_v8 = vpop.eup %2908  ;;  %v1932_v25 = vadd.f32 1.0, %v2907_v2  ;;  %2912 = vpow2.f32 %v2759_v52 }
 0x4ed   :  { %v1952_v19 = vadd.f32 1.0, %v2909_v8 }
 0x4ee   :  { %2914 = vrcp.f32 %v1932_v25  ;;  %v1944_v26 = vand.u32 2147483648, %v1932_v25  ;;  %v1942_v48 = vand.u32 2147483647, %v1932_v25  ;;  %vm1938_vm5 = vweird.f32 %v1932_v25 }
 0x4ef   :  { %2916 = vrcp.f32 %v1952_v19  ;;  %v1964_v53 = vand.u32 2147483648, %v1952_v19  ;;  %vm1958_vm11 = vweird.f32 %v1952_v19  ;;  %v1962_v14 = vand.u32 2147483647, %v1952_v19 }
 0x4f0   :  { %v1945_v27 = vor.u32 1.1754944e-38, %v1944_v26  ;;  %vm1943_vm7 = vcmp.eq.f32.partialorder %v1942_v48, 8.507059e+37  ;;  %v3006_v48 = vld [vmem:[#allocation8 + $0x50] sm:$0xff] }
 0x4f1   :  { %v2911_v0 = vpop.eup %2910  ;;  %v1965_v40 = vor.u32 1.1754944e-38, %v1964_v53  ;;  %vm1963_vm1 = vcmp.eq.f32.partialorder %v1962_v14, 8.507059e+37  ;;  %v3014_v53 = vld [vmem:[#allocation11] sm:$0xff] }
 0x4f2   :  { %v2913_v5 = vpop.eup %2912  ;;  %v2066_v18 = vadd.f32 1.0, %v2911_v0  ;;  %v3026_v14 = vld [vmem:[#allocation9] sm:$0xff] }
 0x4f3   :  { %v4097_v22 = vadd.f32 1.0, %v2913_v5 }
 0x4f4   :  { %v2915_v17 = vpop.eup %2914  ;;  %2918 = vrcp.f32 %v2066_v18  ;;  %v2078_v1 = vand.u32 2147483648, %v2066_v18  ;;  %v2076_v13 = vand.u32 2147483647, %v2066_v18  ;;  %vm2072_vm13 = vweird.f32 %v2066_v18 }
 0x4f5   :  { %v2917_v57 = vpop.eup %2916  ;;  %v1934_v49 = vmul.f32 %v2915_v17, %v1932_v25  ;;  %2920 = vrcp.f32 %v4097_v22  ;;  %vm1939_vm4 = vweird.f32 %v2915_v17  ;;  %v2098_v56 = vand.u32 2147483648, %v4097_v22 }
 0x4f6   :  { %v1954_v39 = vmul.f32 %v2917_v57, %v1952_v19  ;;  %vm1940_vm6 = vmor %vm1938_vm5, %vm1939_vm4  ;;  %vm1959_vm8 = vweird.f32 %v2917_v57  ;;  %v2079_v37 = vor.u32 1.1754944e-38, %v2078_v1  ;;  %vm2077_vm15 = vcmp.eq.f32.partialorder %v2076_v13, 8.507059e+37  ;;  %v3018_v1 = vld [vmem:[#allocation9 + $0x30] sm:$0xff] }
 0x4f7   :  { %v1935_v10 = vsub.f32 1.0, %v1934_v49  ;;  %vm4103_vm12 = vmor %vm1958_vm11, %vm1959_vm8  ;;  %vm2092_vm3 = vweird.f32 %v4097_v22  ;;  %v2096_v62 = vand.u32 2147483647, %v4097_v22  ;;  %v2099_v25 = vor.u32 1.1754944e-38, %v2098_v56  ;;  %v3025_v13 = vld [vmem:[#allocation11 + $0x50] sm:$0xff] }
 0x4f8   :  { %v1955_v16 = vsub.f32 1.0, %v1954_v39  ;;  %v3004_v39 = vld [vmem:[#allocation8 + $0x58] sm:$0xff] }
 0x4f9   :  { %v1936_v6 = vmul.f32 %v2915_v17, %v1935_v10  ;;  %vm2097_vm5 = vcmp.eq.f32.partialorder %v2096_v62, 8.507059e+37  ;;  %v3005_v10 = vld [vmem:[#allocation11 + $0x18] sm:$0xff] }
 0x4fa   :  { %v2919_v45 = vpop.eup %2918  ;;  %v1956_v34 = vmul.f32 %v2917_v57, %v1955_v16 }
 0x4fb   :  { %v2921_v24 = vpop.eup %2920  ;;  %v1937_v61 = vadd.f32 %v2915_v17, %v1936_v6  ;;  %v2068_v50 = vmul.f32 %v2919_v45, %v2066_v18  ;;  %vm2073_vm9 = vweird.f32 %v2919_v45 }
 0x4fc   :  { %v2088_v20 = vmul.f32 %v2921_v24, %v4097_v22  ;;  %v1957_v3 = vadd.f32 %v2917_v57, %v1956_v34  ;;  %vm2074_vm14 = vmor %vm2072_vm13, %vm2073_vm9  ;;  %vm2093_vm2 = vweird.f32 %v2921_v24 }
 0x4fd   :  { %v1941_v11 = vsel %vm1940_vm6, %v2915_v17, %v1937_v61  ;;  %v2069_v28 = vsub.f32 1.0, %v2068_v50  ;;  %vm2094_vm4 = vmor %vm2092_vm3, %vm2093_vm2  ;;  %v3009_v61 = vld [vmem:[#allocation11 + $0x8] sm:$0xff]  ;;  %v3011_v50 = vld [vmem:[#allocation11 + $0x38] sm:$0xff] }
 0x4fe   :  { %v1946_v51 = vsel %vm1943_vm7, %v1945_v27, %v1941_v11  ;;  %v2089_v38 = vsub.f32 1.0, %v2088_v20  ;;  %v1961_v33 = vsel %vm4103_vm12, %v2917_v57, %v1957_v3  ;;  %v3013_v27 = vld [vmem:[#allocation9 + $0x18] sm:$0xff]  ;;  %v3016_v11 = vld [vmem:[#allocation11 + $0x28] sm:$0xff]  ;;  %v3020_v3 = vld [vmem:[#allocation11 + $0x20] sm:$0xff] }
 0x4ff   :  { %v1988_v7 = vmul.f32 %v1986_v21, %v1946_v51  ;;  %v2070_v4 = vmul.f32 %v2919_v45, %v2069_v28  ;;  %v1966_v47 = vsel %vm1963_vm1, %v1965_v40, %v1961_v33  ;;  %v3012_v21 = vld [vmem:[#allocation11 + $0x30] sm:$0xff]  ;;  %v3015_v20 = vld [vmem:[#allocation9 + $0x38] sm:$0xff]  ;;  %v3031_v33 = vld [vmem:[#allocation11 + $0x40] sm:$0xff] }
 0x500   :  { %v2090_v29 = vmul.f32 %v2921_v24, %v2089_v38  ;;  %v1991_v52 = vsub.f32 1.0, %v1966_v47  ;;  %v1993_v0 = vmul.f32 %v1966_v47, %v4028_v54  ;;  %v3017_v28 = vld [vmem:[#allocation9 + $0x10] sm:$0xff]  ;;  %v3019_v51 = vld [vmem:[#allocation9 + $0x58] sm:$0xff]  ;;  %v3021_v38 = vld [vmem:[#allocation9 + $0x8] sm:$0xff] }
 0x501   :  { %v1989_v30 = vadd.f32 %v1988_v7, %v1926_v60  ;;  %v2071_v32 = vadd.f32 %v2919_v45, %v2070_v4  ;;  %v3008_v60 = vld [vmem:[#allocation8 + $0x48] sm:$0xff]  ;;  %v3022_v7 = vld [vmem:[#allocation11 + $0x58] sm:$0xff]  ;;  %v3024_v4 = vld [vmem:[#allocation9 + $0x50] sm:$0xff] }
 0x502   :  { %v2091_v46 = vadd.f32 %v2921_v24, %v2090_v29  ;;  %v3027_v29 = vld [vmem:[#allocation9 + $0x20] sm:$0xff] }
 0x503   :  { %2922 = vtanh.f32 %v1989_v30  ;;  %v2075_v41 = vsel %vm2074_vm14, %v2919_v45, %v2071_v32  ;;  %v3007_v45 = vld [vmem:[#allocation11 + $0x10] sm:$0xff]  ;;  %v3028_v30 = vld [vmem:[#allocation9 + $0x48] sm:$0xff]  ;;  %v3030_v32 = vld [vmem:[#allocation9 + $0x40] sm:$0xff] }
 0x504   :  { %v2080_v44 = vsel %vm2077_vm15, %v2079_v37, %v2075_v41  ;;  %v2095_v2 = vsel %vm2094_vm4, %v2921_v24, %v2091_v46  ;;  %v2326_v46 = vld [vmem:[#allocation3 + $0xb0] sm:$0xff] }
 0x505   :  { %v2122_v55 = vmul.f32 %v2120_v36, %v2080_v44  ;;  %v2100_v5 = vsel %vm2097_vm5, %v2099_v25, %v2095_v2  ;;  %v4162_v47 = vld [vmem:[%s4267_s5] ss:$0 sm:$0xff]  ;;  %v2325_v25 = vld [vmem:[#allocation3 + $0xa8] sm:$0xff] }
 0x506   :  { %v2125_v63 = vsub.f32 1.0, %v2100_v5  ;;  %v2127_v59 = vmul.f32 %v2100_v5, %v4052_v9  ;;  %v3010_v9 = vld [vmem:[#allocation8 + $0x40] sm:$0xff] }
 0x507   :  { %v2123_v15 = vadd.f32 %v2122_v55, %v2021_v42 }
 0x509   :  { %v2923_v8 = vpop.eup %2922  ;;  %2924 = vtanh.f32 %v2123_v15 }
 0x50a   :  { %v1992_v19 = vmul.f32 %v2923_v8, %v1991_v52 }
 0x50c   :  { %v4119_v18 = vadd.f32 %v1993_v0, %v1992_v19 }
 0x50e   :  { %v1996_v17 = vrot.slane %v4119_v18, 1  ;;  %v1997_v57 = vrot.slane %v4119_v18, 2  ;;  %v1998_v22 = vrot.slane %v4119_v18, 3  ;;  %2010 = vst.msk [vmem:[#allocation12 + $0x5] sm:$0x1] %vm479_vm10, %v4119_v18  ;;  %2761 = vmatmul.msk.f32.vlgmr.msra.gmra.mxu1 %vm117_vm0, %v4119_v18  ;;  %2762 = vmatmul.msk.f32.vlgmr.msra.gmra.mxu2 %vm117_vm0, %v4119_v18  ;;  %v1999_v49 = vrot.slane %v4119_v18, 4 }
 0x50f   :  { %v2925_v54 = vpop.eup %2924  ;;  %2420 = vmatpush.msra.mxu1 %v3004_v39  ;;  %2449 = vmatpush.msra.mxu2 %v3005_v10  ;;  %v2000_v26 = vrot.slane %v4119_v18, 5  ;;  %v2001_v6 = vrot.slane %v4119_v18, 6  ;;  %v2002_v34 = vrot.slane %v4119_v18, 7 }
 0x510   :  { %2011 = vst.msk [vmem:[#allocation12 + $0xd] sm:$0x1] %vm479_vm10, %v1996_v17  ;;  %v2126_v16 = vmul.f32 %v2925_v54, %v2125_v63 }
 0x511   :  { %2012 = vst.msk [vmem:[#allocation12 + $0x15] sm:$0x1] %vm479_vm10, %v1997_v57  ;;  %2421 = vmatpush.msra.mxu1 %v3006_v48  ;;  %2450 = vmatpush.msra.mxu2 %v3007_v45 }
 0x512   :  { %2013 = vst.msk [vmem:[#allocation12 + $0x1d] sm:$0x1] %vm479_vm10, %v1998_v22  ;;  %v4138_v24 = vadd.f32 %v2127_v59, %v2126_v16 }
 0x513   :  { %2014 = vst.msk [vmem:[#allocation12 + $0x25] sm:$0x1] %vm479_vm10, %v1999_v49  ;;  %2422 = vmatpush.msra.mxu1 %v3008_v60  ;;  %2451 = vmatpush.msra.mxu2 %v3009_v61 }
 0x514   :  { %2015 = vst.msk [vmem:[#allocation12 + $0x2d] sm:$0x1] %vm479_vm10, %v2000_v26  ;;  %2763 = vmatmul.msk.f32.vlgmr.msra.gmra.mxu3 %vm117_vm0, %v4138_v24  ;;  %2764 = vmatmul.msk.f32.vlgmr.msrb.gmra.mxu0 %vm117_vm0, %v4138_v24 }
 0x515   :  { %2016 = vst.msk [vmem:[#allocation12 + $0x35] sm:$0x1] %vm479_vm10, %v2001_v6  ;;  %2423 = vmatpush.msra.mxu1 %v3010_v9  ;;  %2469 = vmatpush.msra.mxu3 %v3011_v50 }
 0x516   :  { %2017 = vst.msk [vmem:[#allocation12 + $0x3d] sm:$0x1] %vm479_vm10, %v2002_v34  ;;  %2765 = vmatmul.msk.f32.vlgmr.msrb.gmra.mxu1 %vm117_vm0, %v4138_v24  ;;  %2768 = vmatmul.msk.f32.vlgmr.msrb.gmra.mxu2 %vm117_vm0, %v4119_v18 }
 0x517   :  { %2470 = vmatpush.msra.mxu3 %v3012_v21  ;;  %2492 = vmatpush.msrb.mxu0 %v3013_v27 }
 0x518   :  { %2452 = vmatpush.msra.mxu2 %v3014_v53  ;;  %2512 = vmatpush.msrb.mxu1 %v3015_v20 }
 0x519   :  { %2471 = vmatpush.msra.mxu3 %v3016_v11  ;;  %2493 = vmatpush.msrb.mxu0 %v3017_v28 }
 0x51a   :  { %2513 = vmatpush.msrb.mxu1 %v3018_v1  ;;  %2532 = vmatpush.msrb.mxu2 %v3019_v51 }
 0x51b   :  { %2472 = vmatpush.msra.mxu3 %v3020_v3  ;;  %2494 = vmatpush.msrb.mxu0 %v3021_v38 }
 0x51c   :  { %2769 = vmatmul.msk.f32.vlgmr.msrb.gmra.mxu3 %vm117_vm0, %v4138_v24  ;;  %2770 = vmatmul.msk.f32.vlgmr.msra.gmra.mxu0 %vm117_vm0, %v4138_v24 }
 0x51d   :  { %2592 = vmatpush.msrb.mxu3 %v3022_v7  ;;  %2514 = vmatpush.msrb.mxu1 %v3023_v43 }
 0x51e   :  { %2773 = vmatmul.msk.f32.vlgmr.msra.gmra.mxu1 %vm117_vm0, %v4138_v24  ;;  %2533 = vmatpush.msrb.mxu2 %v3024_v4 }
 0x51f   :  { %2593 = vmatpush.msrb.mxu3 %v3025_v13  ;;  %2495 = vmatpush.msrb.mxu0 %v3026_v14 }
 0x520   :  { %2515 = vmatpush.msrb.mxu1 %v3027_v29  ;;  %2534 = vmatpush.msrb.mxu2 %v3028_v30 }
 0x521   :  { %2594 = vmatpush.msrb.mxu3 %v3029_v31 }
 0x522   :  { %2535 = vmatpush.msrb.mxu2 %v3030_v32 }
 0x523   :  { %2595 = vmatpush.msrb.mxu3 %v3031_v33 }
 0x58b   :  { %v2148_v56 = vpop.f32.mrf.mxu1 }
 0x591   :  { %v2211_v36 = vpop.f32.mrf.mxu0  ;;  %v2168_v40 = vpop.f32.mrf.mxu2 }
 0x592   :  { %v2212_v37 = vadd.f32 %v2211_v36, %v4328_v12 }
 0x593   :  { %v2231_v48 = vpop.f32.mrf.mxu1 }
 0x594   :  { %v2254_v41 = vadd.f32 %v2212_v37, %v2168_v40  ;;  %v2232_v1 = vadd.f32 %v2231_v48, %v4329_v23 }
 0x596   :  { %v2767_v42 = vmul.f32 -1.442695, %v2254_v41 }
 0x597   :  { %v2191_v44 = vpop.f32.mrf.mxu3 }
 0x598   :  { %2926 = vpow2.f32 %v2767_v42  ;;  %v2192_v55 = vadd.f32 %v4162_v47, %v2191_v44 }
 0x599   :  { %v2365_v62 = vpop.f32.mrf.mxu0  ;;  %v2291_v27 = vpop.f32.mrf.mxu2 }
 0x59a   :  { %v2234_v15 = vadd.f32 %v2192_v55, %v2148_v56  ;;  %v2388_v52 = vadd.f32 %v2365_v62, %v2326_v46  ;;  %v2292_v3 = vadd.f32 %v3925_v58, %v2291_v27 }
 0x59b   :  { %v2425_v31 = vpop.f32.mrf.mxu1 }
 0x59c   :  { %v2766_v2 = vmul.f32 -1.442695, %v2234_v15  ;;  %v2772_v8 = vmul.f32 -1.442695, %v2388_v52  ;;  %v2426_v44 = vadd.f32 %v4112_v35, %v2425_v31  ;;  %v2327_v52 = vld [vmem:[#allocation3 + $0xb8] sm:$0xff] }
 0x59e   :  { %v2927_v19 = vpop.eup %2926  ;;  %2928 = vpow2.f32 %v2766_v2 }
 0x59f   :  { %v4165_v0 = vadd.f32 1.0, %v2927_v19  ;;  %2930 = vpow2.f32 %v2772_v8  ;;  %v2345_v5 = vpop.f32.mrf.mxu3 }
 0x5a0   :  { %v2368_v17 = vadd.f32 %v2345_v5, %v2325_v25 }
 0x5a1   :  { %2932 = vrcp.f32 %v4165_v0  ;;  %v2270_v7 = vand.u32 2147483648, %v4165_v0  ;;  %vm2264_vm13 = vweird.f32 %v4165_v0  ;;  %v2268_v58 = vand.u32 2147483647, %v4165_v0 }
 0x5a2   :  { %v2771_v57 = vmul.f32 -1.442695, %v2368_v17 }
 0x5a3   :  { %v2271_v55 = vor.u32 1.1754944e-38, %v2270_v7  ;;  %vm2269_vm3 = vcmp.eq.f32.partialorder %v2268_v58, 8.507059e+37 }
 0x5a4   :  { %v2929_v22 = vpop.eup %2928  ;;  %2934 = vpow2.f32 %v2771_v57 }
 0x5a5   :  { %v2931_v63 = vpop.eup %2930  ;;  %v2238_v54 = vadd.f32 1.0, %v2929_v22 }
 0x5a6   :  { %v4168_v49 = vadd.f32 1.0, %v2931_v63 }
 0x5a7   :  { %2936 = vrcp.f32 %v2238_v54  ;;  %v4170_v39 = vpop.eup %2932  ;;  %v2250_v61 = vand.u32 2147483648, %v2238_v54  ;;  %v2248_v21 = vand.u32 2147483647, %v2238_v54  ;;  %vm2244_vm7 = vweird.f32 %v2238_v54 }
 0x5a8   :  { %2938 = vrcp.f32 %v4168_v49  ;;  %v2260_v26 = vmul.f32 %v4170_v39, %v4165_v0  ;;  %vm2265_vm11 = vweird.f32 %v4170_v39  ;;  %v2404_v8 = vand.u32 2147483648, %v4168_v49 }
 0x5a9   :  { %v2251_v51 = vor.u32 1.1754944e-38, %v2250_v61  ;;  %vm2249_vm9 = vcmp.eq.f32.partialorder %v2248_v21, 8.507059e+37  ;;  %vm4188_vm14 = vmor %vm2264_vm13, %vm2265_vm11  ;;  %vm2398_vm5 = vweird.f32 %v4168_v49  ;;  %v2402_v35 = vand.u32 2147483647, %v4168_v49 }
 0x5aa   :  { %v2935_v10 = vpop.eup %2934  ;;  %v2261_v34 = vsub.f32 1.0, %v2260_v26  ;;  %v2405_v57 = vor.u32 1.1754944e-38, %v2404_v8 }
 0x5ab   :  { %v2372_v16 = vadd.f32 1.0, %v2935_v10 }
 0x5ac   :  { %v2262_v20 = vmul.f32 %v4170_v39, %v2261_v34 }
 0x5ad   :  { %v2937_v59 = vpop.eup %2936  ;;  %2940 = vrcp.f32 %v2372_v16  ;;  %v2384_v29 = vand.u32 2147483648, %v2372_v16  ;;  %v2382_v33 = vand.u32 2147483647, %v2372_v16  ;;  %vm2378_vm15 = vweird.f32 %v2372_v16 }
 0x5ae   :  { %v4175_v6 = vpop.eup %2938  ;;  %v2240_v45 = vmul.f32 %v2937_v59, %v2238_v54  ;;  %vm2245_vm6 = vweird.f32 %v2937_v59  ;;  %v2263_v14 = vadd.f32 %v4170_v39, %v2262_v20 }
 0x5af   :  { %v2394_v9 = vmul.f32 %v4175_v6, %v4168_v49  ;;  %vm2246_vm8 = vmor %vm2244_vm7, %vm2245_vm6  ;;  %v2385_v46 = vor.u32 1.1754944e-38, %v2384_v29  ;;  %vm2383_vm2 = vcmp.eq.f32.partialorder %v2382_v33, 8.507059e+37  ;;  %vm2399_vm4 = vweird.f32 %v4175_v6 }
 0x5b0   :  { %v2241_v60 = vsub.f32 1.0, %v2240_v45  ;;  %v2267_v42 = vsel %vm4188_vm14, %v4170_v39, %v2263_v14  ;;  %vm2400_vm6 = vmor %vm2398_vm5, %vm2399_vm4  ;;  %vm2403_vm7 = vcmp.eq.f32.partialorder %v2402_v35, 8.507059e+37 }
 0x5b1   :  { %v2395_v38 = vsub.f32 1.0, %v2394_v9  ;;  %v2272_v2 = vsel %vm2269_vm3, %v2271_v55, %v2267_v42  ;;  %v3033_v42 = vld [vmem:[%s4269_s7] ss:$0 sm:$0xff]  ;;  %s3221_s7 = smov [#allocation12]  }
 0x5b2   :  { %v2242_v50 = vmul.f32 %v2937_v59, %v2241_v60  ;;  %v2297_v0 = vsub.f32 1.0, %v2272_v2  ;;  %v2299_v63 = vmul.f32 %v2272_v2, %v4119_v18  ;;  %s2643_s0 = sshll.u32 %s3221_s7, 4  ;;  %s2644_s0 = int_to_ptr.vmem [resolvable:$true] %s2643_s0 }
 0x5b3   :  { %v2941_v53 = vpop.eup %2940  ;;  %v2396_v36 = vmul.f32 %v4175_v6, %v2395_v38 }
 0x5b4   :  { %v2243_v11 = vadd.f32 %v2937_v59, %v2242_v50  ;;  %v2374_v28 = vmul.f32 %v2941_v53, %v2372_v16  ;;  %vm2379_vm12 = vweird.f32 %v2941_v53 }
 0x5b5   :  { %vm2380_vm1 = vmor %vm2378_vm15, %vm2379_vm12  ;;  %v2397_v62 = vadd.f32 %v4175_v6, %v2396_v36 }
 0x5b6   :  { %v2247_v43 = vsel %vm2246_vm8, %v2937_v59, %v2243_v11  ;;  %v2375_v4 = vsub.f32 1.0, %v2374_v28 }
 0x5b7   :  { %v2252_v13 = vsel %vm2249_vm9, %v2251_v51, %v2247_v43  ;;  %v2401_v5 = vsel %vm2400_vm6, %v4175_v6, %v2397_v62 }
 0x5b8   :  { %v2294_v30 = vmul.f32 %v2292_v3, %v2252_v13  ;;  %v2376_v32 = vmul.f32 %v2941_v53, %v2375_v4  ;;  %v2406_v54 = vsel %vm2403_vm7, %v2405_v57, %v2401_v5 }
 0x5b9   :  { %v2431_v18 = vsub.f32 1.0, %v2406_v54  ;;  %v2433_v45 = vmul.f32 %v2406_v54, %v4138_v24 }
 0x5ba   :  { %v2295_v40 = vadd.f32 %v2294_v30, %v2232_v1  ;;  %v2377_v41 = vadd.f32 %v2941_v53, %v2376_v32 }
 0x5bc   :  { %2942 = vtanh.f32 %v2295_v40  ;;  %v2381_v56 = vsel %vm2380_vm1, %v2941_v53, %v2377_v41 }
 0x5bd   :  { %v2386_v15 = vsel %vm2383_vm2, %v2385_v46, %v2381_v56 }
 0x5be   :  { %v2428_v25 = vmul.f32 %v2426_v44, %v2386_v15 }
 0x5c0   :  { %v2429_v19 = vadd.f32 %v2428_v25, %v2327_v52 }
 0x5c2   :  { %v2943_v17 = vpop.eup %2942  ;;  %2944 = vtanh.f32 %v2429_v19 }
 0x5c3   :  { %v2298_v22 = vmul.f32 %v2943_v17, %v2297_v0 }
 0x5c5   :  { %v4203_v39 = vadd.f32 %v2299_v63, %v2298_v22 }
 0x5c7   :  { %v2302_v10 = vrot.slane %v4203_v39, 1  ;;  %v2303_v26 = vrot.slane %v4203_v39, 2  ;;  %v2304_v49 = vrot.slane %v4203_v39, 3  ;;  %2316 = vst.msk [vmem:[#allocation12 + $0x6] sm:$0x1] %vm479_vm10, %v4203_v39  ;;  %2774 = vmatmul.msk.f32.vlgmr.msra.gmra.mxu2 %vm117_vm0, %v4203_v39  ;;  %2775 = vmatmul.msk.f32.vlgmr.msra.gmra.mxu3 %vm117_vm0, %v4203_v39  ;;  %v2305_v59 = vrot.slane %v4203_v39, 4 }
 0x5c8   :  { %v2945_v16 = vpop.eup %2944  ;;  %v2306_v6 = vrot.slane %v4203_v39, 5  ;;  %v2307_v34 = vrot.slane %v4203_v39, 6  ;;  %v2308_v60 = vrot.slane %v4203_v39, 7 }
 0x5c9   :  { %2317 = vst.msk [vmem:[#allocation12 + $0xe] sm:$0x1] %vm479_vm10, %v2302_v10  ;;  %v2432_v48 = vmul.f32 %v2945_v16, %v2431_v18 }
 0x5ca   :  { %2318 = vst.msk [vmem:[#allocation12 + $0x16] sm:$0x1] %vm479_vm10, %v2303_v26 }
 0x5cb   :  { %2319 = vst.msk [vmem:[#allocation12 + $0x1e] sm:$0x1] %vm479_vm10, %v2304_v49  ;;  %v2434_v61 = vadd.f32 %v2433_v45, %v2432_v48 }
 0x5cc   :  { %2320 = vst.msk [vmem:[#allocation12 + $0x26] sm:$0x1] %vm479_vm10, %v2305_v59 }
 0x5cd   :  { %2321 = vst.msk [vmem:[#allocation12 + $0x2e] sm:$0x1] %vm479_vm10, %v2306_v6  ;;  %2776 = vmatmul.msk.f32.vlgmr.msrb.gmra.mxu0 %vm117_vm0, %v2434_v61  ;;  %2777 = vmatmul.msk.f32.vlgmr.msrb.gmra.mxu1 %vm117_vm0, %v2434_v61 }
 0x5ce   :  { %2322 = vst.msk [vmem:[#allocation12 + $0x36] sm:$0x1] %vm479_vm10, %v2307_v34 }
 0x5cf   :  { %2323 = vst.msk [vmem:[#allocation12 + $0x3e] sm:$0x1] %vm479_vm10, %v2308_v60  ;;  %2778 = vmatmul.msk.f32.vlgmr.msrb.gmra.mxu2 %vm117_vm0, %v2434_v61  ;;  %2781 = vmatmul.msk.f32.vlgmr.msrb.gmra.mxu3 %vm117_vm0, %v4203_v39 }
 0x5d0   :  { %2630 = vst.msk [vmem:[#allocation2] sm:$0xff] %vm117_vm0, %v2434_v61 }
 0x5d7   :  { %v2635_v24 = vld [vmem:[#allocation2] sm:$0xff] }
 0x5d8   :  { %2637 = vst.msk [vmem:[#allocation13] sm:$0xff] %vm117_vm0, %v2635_v24 }
 0x64a   :  { %v2497_v9 = vpop.f32.mrf.mxu0  ;;  %v2517_v50 = vpop.f32.mrf.mxu1 }
 0x64b   :  { %v2498_v21 = vadd.f32 %v4162_v47, %v2497_v9  ;;  %v2518_v27 = vadd.f32 %v2517_v50, %v4328_v12  ;;  %v2454_v53 = vpop.f32.mrf.mxu2  ;;  %v2474_v20 = vpop.f32.mrf.mxu3 }
 0x64d   :  { %v2540_v11 = vadd.f32 %v2498_v21, %v2454_v53  ;;  %v2560_v28 = vadd.f32 %v2518_v27, %v2474_v20 }
 0x64f   :  { %v2779_v1 = vmul.f32 -1.442695, %v2540_v11  ;;  %v2780_v51 = vmul.f32 -1.442695, %v2560_v28 }
 0x651   :  { %2946 = vpow2.f32 %v2779_v1 }
 0x652   :  { %2948 = vpow2.f32 %v2780_v51 }
 0x653   :  { %v2597_v58 = vpop.f32.mrf.mxu3  ;;  %v2537_v37 = vpop.f32.mrf.mxu2 }
 0x654   :  { %v2598_v44 = vadd.f32 %v3033_v42, %v2597_v58  ;;  %v2538_v62 = vadd.f32 %v2537_v37, %v4329_v23 }
 0x657   :  { %v2947_v3 = vpop.eup %2946 }
 0x658   :  { %v2949_v38 = vpop.eup %2948  ;;  %v2544_v7 = vadd.f32 1.0, %v2947_v3 }
 0x659   :  { %v2564_v43 = vadd.f32 1.0, %v2949_v38 }
 0x65a   :  { %2950 = vrcp.f32 %v2544_v7  ;;  %v2556_v30 = vand.u32 2147483648, %v2544_v7  ;;  %v2554_v32 = vand.u32 2147483647, %v2544_v7  ;;  %vm2550_vm9 = vweird.f32 %v2544_v7 }
 0x65b   :  { %2952 = vrcp.f32 %v2564_v43  ;;  %v2576_v56 = vand.u32 2147483648, %v2564_v43  ;;  %vm2570_vm14 = vweird.f32 %v2564_v43  ;;  %v2574_v52 = vand.u32 2147483647, %v2564_v43 }
 0x65c   :  { %v2557_v40 = vor.u32 1.1754944e-38, %v2556_v30  ;;  %vm2555_vm12 = vcmp.eq.f32.partialorder %v2554_v32, 8.507059e+37 }
 0x65d   :  { %v2577_v25 = vor.u32 1.1754944e-38, %v2576_v56  ;;  %vm2575_vm1 = vcmp.eq.f32.partialorder %v2574_v52, 8.507059e+37 }
 0x660   :  { %v2951_v4 = vpop.eup %2950 }
 0x661   :  { %v2953_v13 = vpop.eup %2952  ;;  %v2546_v14 = vmul.f32 %v2951_v4, %v2544_v7  ;;  %vm2551_vm8 = vweird.f32 %v2951_v4 }
 0x662   :  { %v2566_v47 = vmul.f32 %v2953_v13, %v2564_v43  ;;  %vm2552_vm11 = vmor %vm2550_vm9, %vm2551_vm8  ;;  %vm2571_vm13 = vweird.f32 %v2953_v13 }
 0x663   :  { %v2547_v29 = vsub.f32 1.0, %v2546_v14  ;;  %vm2572_vm15 = vmor %vm2570_vm14, %vm2571_vm13 }
 0x664   :  { %v2567_v12 = vsub.f32 1.0, %v2566_v47 }
 0x665   :  { %v2548_v31 = vmul.f32 %v2951_v4, %v2547_v29 }
 0x666   :  { %v2568_v33 = vmul.f32 %v2953_v13, %v2567_v12 }
 0x667   :  { %v2549_v36 = vadd.f32 %v2951_v4, %v2548_v31 }
 0x668   :  { %v2569_v55 = vadd.f32 %v2953_v13, %v2568_v33 }
 0x669   :  { %v2553_v41 = vsel %vm2552_vm11, %v2951_v4, %v2549_v36 }
 0x66a   :  { %v2558_v46 = vsel %vm2555_vm12, %v2557_v40, %v2553_v41  ;;  %v2573_v8 = vsel %vm2572_vm15, %v2953_v13, %v2569_v55 }
 0x66b   :  { %v2600_v15 = vmul.f32 %v2598_v44, %v2558_v46  ;;  %v2578_v35 = vsel %vm2575_vm1, %v2577_v25, %v2573_v8 }
 0x66c   :  { %v2603_v19 = vsub.f32 1.0, %v2578_v35  ;;  %v2605_v17 = vmul.f32 %v2578_v35, %v4203_v39 }
 0x66d   :  { %v2601_v2 = vadd.f32 %v2600_v15, %v2538_v62 }
 0x66f   :  { %2954 = vtanh.f32 %v2601_v2 }
 0x675   :  { %v2955_v0 = vpop.eup %2954 }
 0x676   :  { %v2604_v5 = vmul.f32 %v2955_v0, %v2603_v19 }
 0x678   :  { %v2606_v57 = vadd.f32 %v2605_v17, %v2604_v5 }
 0x67a   :  { %v2608_v22 = vrot.slane %v2606_v57, 1  ;;  %v2609_v63 = vrot.slane %v2606_v57, 2  ;;  %v2610_v54 = vrot.slane %v2606_v57, 3  ;;  %2622 = vst.msk [vmem:[#allocation12 + $0x7] sm:$0x1] %vm479_vm10, %v2606_v57  ;;  %v2611_v23 = vrot.slane %v2606_v57, 4 }
 0x67b   :  { %2631 = vst.msk [vmem:[#allocation2 + $0x8] sm:$0xff] %vm117_vm0, %v2606_v57  ;;  %v2612_v10 = vrot.slane %v2606_v57, 5  ;;  %v2613_v26 = vrot.slane %v2606_v57, 6  ;;  %v2614_v39 = vrot.slane %v2606_v57, 7 }
 0x67c   :  { %2623 = vst.msk [vmem:[#allocation12 + $0xf] sm:$0x1] %vm479_vm10, %v2608_v22 }
 0x67d   :  { %2624 = vst.msk [vmem:[#allocation12 + $0x17] sm:$0x1] %vm479_vm10, %v2609_v63 }
 0x67e   :  { %2625 = vst.msk [vmem:[#allocation12 + $0x1f] sm:$0x1] %vm479_vm10, %v2610_v54 }
 0x67f   :  { %2626 = vst.msk [vmem:[#allocation12 + $0x27] sm:$0x1] %vm479_vm10, %v2611_v23 }
 0x680   :  { %2627 = vst.msk [vmem:[#allocation12 + $0x2f] sm:$0x1] %vm479_vm10, %v2612_v10 }
 0x681   :  { %2628 = vst.msk [vmem:[#allocation12 + $0x37] sm:$0x1] %vm479_vm10, %v2613_v26 }
 0x682   :  { %2629 = vst.msk [vmem:[#allocation12 + $0x3f] sm:$0x1] %vm479_vm10, %v2614_v39  ;;  %v2636_v49 = vld [vmem:[#allocation2 + $0x8] sm:$0xff] }
 0x683   :  { %2651 = dma.vmem_to_hbm [thread:$0]  %s2644_s0, 1024, %s2646_s30, [#allocation5], %s3213_s17, %s3213_s17, %s3214_s18   ;;  %2638 = vst.msk [vmem:[#allocation13 + $0x8] sm:$0xff] %vm117_vm0, %v2636_v49 }
 0x684   :  { %2664 = dma.vmem_to_hbm [thread:$0]  %s2657_s10, 256, %s2659_s12, [#allocation14], %s3213_s17, %s3213_s17, %s3214_s18  }
 0x685   :  { %3208 = dma.done.wait [#allocation5], 1024  }
 0x686   :  { %3209 = vsyncadd [#allocation5], 4294966272 }
 0x687   :  { %3210 = dma.done.wait [#allocation14], 256  }
 0x688   :  { %3211 = vsyncadd [#allocation14], 4294967040 }
 0x689   :  { %2673 = vsyncpa [#allocation4], 1 }
 0x68a   :  { %2674 = vsyncpa [#allocation7], 1 }
 0x68b   :  { %2675 = vsyncpa [#allocation10], 1 }
 0x68c   :  { %2676 = vsyncpa [#allocation5], 1 }
 0x68d   :  { %2677 = vsyncpa [#allocation14], 1 }

</bundles_post_ra>
